<compile_context>
chip_gen: v5e
topology: v5e:2x2
jax: 0.10.0
libtpu: 0.0.40
codegen_flags: <defaults>
</compile_context>

<pallas_src>
import jax
import jax.numpy as jnp
from jax import lax
from jax.experimental import pallas as pl
from jax.experimental.pallas import tpu as pltpu


def _round_up(a, b):
    return (a + b - 1) // b * b


# ---------------------------------------------------------------------------
# Kernels
# ---------------------------------------------------------------------------

def _linear_kernel_fullk(x_ref, w_ref, b_ref, o_ref):
    """K untiled: one dot per N tile, bias added inline, direct store."""
    # x: (b_rows, k_pad) bf16, w: (tn, k_pad) bf16 (native layout, no transpose),
    # contraction on the last dims of both -> (b_rows, tn) f32.
    o_ref[...] = (
        lax.dot_general(
            x_ref[...], w_ref[...],
            dimension_numbers=(((1,), (1,)), ((), ())),
            preferred_element_type=jnp.float32,
        )
        + b_ref[...]
    ).astype(o_ref.dtype)


def _make_linear_kernel_ksplit(tk):
    """K tiled on the grid: f32 accumulator, bias folded into the init."""

    def kernel(x_ref, w_ref, b_ref, o_ref, acc_ref):
        k = pl.program_id(1)

        @pl.when(k == 0)
        def _init():
            # Fold the bias into the accumulator init (removes the finalize add).
            acc_ref[...] = jnp.broadcast_to(b_ref[...], acc_ref.shape)

        # x is fully resident in VMEM; slice the current K chunk out of it.
        start = pl.multiple_of(k * tk, 128)
        xt = x_ref[:, pl.ds(start, tk)]
        acc_ref[...] += lax.dot_general(
            xt, w_ref[...],
            dimension_numbers=(((1,), (1,)), ((), ())),
            preferred_element_type=jnp.float32,
        )

        @pl.when(k == pl.num_programs(1) - 1)
        def _finalize():
            o_ref[...] = acc_ref[...].astype(o_ref.dtype)

    return kernel


# ---------------------------------------------------------------------------
# One-time parameter preparation (cast + pad + tile choice)
# ---------------------------------------------------------------------------

def prepare_linear_params(weight, bias, *, weight_dtype=jnp.bfloat16,
                          expected_batch=16, min_n_tiles=1,
                          vmem_budget_bytes=24 << 20):
    """One-time prep: bf16 cast, TPU-friendly padding, tile choice.

    weight: (num_labels, dim) f32, bias: (num_labels,) f32.
    expected_batch should be >= the largest batch passed at call time
    (it only affects VMEM sizing used to pick tiles, not correctness).
    """
    num_labels, dim = weight.shape
    w_bytes = jnp.dtype(weight_dtype).itemsize
    b_rows = _round_up(max(int(expected_batch), 1), 16)   # packed bf16 sublanes

    n_full = _round_up(num_labels, 128)   # lane-dense output
    k_full = _round_up(dim, 128)

    def vmem_need(tn_, tk_):
        k_t = pl.cdiv(k_full, tk_)
        k_pad_ = _round_up(dim, tk_)
        return (2 * b_rows * k_pad_ * 2          # bf16 x, resident (2 bufs worst case)
                + 2 * tn_ * tk_ * w_bytes        # weight stream, double-buffered
                + 2 * tn_ * 4                    # bias tile
                + 2 * b_rows * tn_ * 4           # output block (resident across K)
                + (b_rows * tn_ * 4 if k_t > 1 else 0))  # f32 accumulator scratch

    # Fewest grid steps first: a single (n_full x k_full) weight tile.
    # Shrink tn before tk so K stays untiled (no accumulator ping-pong) as
    # long as possible.
    tn, tk = n_full, k_full
    while tn > 128 and vmem_need(tn, tk) > vmem_budget_bytes:
        tn = _round_up(max(tn // 2, 128), 128)
    while tk > 128 and vmem_need(tn, tk) > vmem_budget_bytes:
        tk = _round_up(max(tk // 2, 128), 128)

    # Optionally force >= min_n_tiles N tiles (v7x: pass 2 so the N axis can
    # shard across both TensorCores).
    while min_n_tiles > 1 and pl.cdiv(n_full, tn) < min_n_tiles and tn > 128:
        tn = _round_up(max(tn // 2, 128), 128)

    n_pad = _round_up(num_labels, tn)
    k_pad = _round_up(dim, tk)

    # Zero-padding along K contributes nothing to the matmul; extra N columns
    # and extra batch rows are sliced off after the call.
    w_p = jnp.zeros((n_pad, k_pad), dtype=weight_dtype)
    w_p = w_p.at[:num_labels, :dim].set(weight.astype(weight_dtype))
    b_p = jnp.zeros((1, n_pad), dtype=jnp.float32)
    b_p = b_p.at[0, :num_labels].set(bias.astype(jnp.float32))

    return {"weight": w_p, "bias": b_p, "dim": dim, "num_labels": num_labels,
            "tn": tn, "tk": tk}


# ---------------------------------------------------------------------------
# Forward
# ---------------------------------------------------------------------------

def linear_classifier_forward(x_nchw, params, *, out_dtype=jnp.float32):
    """x_nchw: (B, C, H, W) with C*H*W == dim; params from prepare_linear_params."""
    B = x_nchw.shape[0]
    dim, num_labels = params["dim"], params["num_labels"]
    tn, tk = params["tn"], params["tk"]
    w_p, b_p = params["weight"], params["bias"]
    n_pad, k_pad = w_p.shape
    n_tiles = n_pad // tn
    k_tiles = k_pad // tk

    # Flatten exactly like torch's x.view(x.size(0), -1) (row-major NCHW).
    x2d = x_nchw.reshape(B, -1)
    assert x2d.shape[1] == dim, (x2d.shape, dim)

    # Pad + cast to bf16 in ONE op.  Rows padded to a multiple of 16 (packed
    # bf16 sublanes); padded K columns are zero so they don't affect the dot.
    b_rows = _round_up(B, 16)
    x_p = jnp.zeros((b_rows, k_pad), dtype=jnp.bfloat16).at[:B, :dim].set(
        x2d.astype(jnp.bfloat16))

    # Explicit VMEM limit with headroom (v5e default scoped is 16 MiB; v7x
    # physical is 64 MiB — stay under both with the 48 MiB cap).
    wb = w_p.dtype.itemsize
    ob = jnp.dtype(out_dtype).itemsize
    need = (2 * b_rows * k_pad * 2
            + 2 * tn * tk * wb
            + 2 * tn * 4
            + 2 * b_rows * tn * ob
            + (b_rows * tn * 4 if k_tiles > 1 else 0))
    vmem_limit = int(min(max(2 * need, 16 << 20), 48 << 20))

    if k_tiles == 1:
        # Single K column: no accumulator, bias added inline, 1-D grid over N.
        out = pl.pallas_call(
            _linear_kernel_fullk,
            out_shape=jax.ShapeDtypeStruct((b_rows, n_pad), out_dtype),
            grid_spec=pltpu.PrefetchScalarGridSpec(
                num_scalar_prefetch=0,
                grid=(n_tiles,),
                in_specs=[
                    pl.BlockSpec((b_rows, k_pad), lambda n: (0, 0)),   # x: resident
                    pl.BlockSpec((tn, k_pad), lambda n: (n, 0)),       # W: native (N,K)
                    pl.BlockSpec((1, tn), lambda n: (0, n)),           # bias
                ],
                out_specs=pl.BlockSpec((b_rows, tn), lambda n: (0, n)),
            ),
            compiler_params=pltpu.CompilerParams(
                dimension_semantics=("parallel",),
                vmem_limit_bytes=vmem_limit,
            ),
        )(x_p, w_p, b_p)
    else:
        # K tiled: stream weight K-chunks, x stays resident, f32 accumulator.
        out = pl.pallas_call(
            _make_linear_kernel_ksplit(tk),
            out_shape=jax.ShapeDtypeStruct((b_rows, n_pad), out_dtype),
            grid_spec=pltpu.PrefetchScalarGridSpec(
                num_scalar_prefetch=0,
                grid=(n_tiles, k_tiles),                               # K innermost
                in_specs=[
                    pl.BlockSpec((b_rows, k_pad), lambda n, k: (0, 0)),  # x: resident
                    pl.BlockSpec((tn, tk), lambda n, k: (n, k)),         # W stream
                    pl.BlockSpec((1, tn), lambda n, k: (0, n)),          # bias
                ],
                out_specs=pl.BlockSpec((b_rows, tn), lambda n, k: (0, n)),
                scratch_shapes=[pltpu.VMEM((b_rows, tn), jnp.float32)],
            ),
            compiler_params=pltpu.CompilerParams(
                dimension_semantics=("parallel", "arbitrary"),
                vmem_limit_bytes=vmem_limit,
            ),
        )(x_p, w_p, b_p)

    return out[:B, :num_labels]


# ---------------------------------------------------------------------------
# Demo / self-test
# ---------------------------------------------------------------------------

if __name__ == "__main__":
    key = jax.random.PRNGKey(0)
    k_x, k_w = jax.random.split(key)

    # Small shapes consistent with the module: B=2, C=4, H=W=16 -> dim = 1024.
    # num_labels=1000 (the module's default) exercises the pad-to-128 path.
    B, C, H, W = 2, 4, 16, 16
    dim = C * H * W
    num_labels = 1000

    x = jax.random.normal(k_x, (B, C, H, W), dtype=jnp.float32)

    # Deterministic parameter init matching the module: W ~ N(0, 0.01), b = 0.
    weight = 0.01 * jax.random.normal(k_w, (num_labels, dim), dtype=jnp.float32)
    bias = jnp.zeros((num_labels,), dtype=jnp.float32)

    params = prepare_linear_params(weight, bias)   # one-time: bf16 cast + pad
    out = linear_classifier_forward(x, params)
    jax.block_until_ready(out)

    assert out.shape == (B, num_labels), out.shape

    # Reference 1: same bf16-operand / f32-accumulation math as the kernel.
    x2d = x.reshape(B, -1)
    ref_bf16 = jnp.dot(x2d.astype(jnp.bfloat16), weight.astype(jnp.bfloat16).T,
                       preferred_element_type=jnp.float32) + bias
    assert jnp.allclose(out, ref_bf16, atol=1e-4, rtol=1e-4), \
        float(jnp.max(jnp.abs(out - ref_bf16)))

    # Reference 2: the original module's pure-f32 math (loose tolerance: the
    # kernel deliberately streams the weight and x in bf16).
    ref_f32 = x2d @ weight.T + bias
    assert jnp.allclose(out, ref_f32, atol=5e-3, rtol=5e-2), \
        float(jnp.max(jnp.abs(out - ref_f32)))

    print("KERNEL_OK")
</pallas_src>

<mosaic_0001>
module attributes {stable_mosaic.version = 11 : i64} {
  func.func @_linear_kernel_fullk(%arg0: i32, %arg1: memref<16x1024xbf16, #tpu.memory_space<vmem>>, %arg2: memref<1024x1024xbf16, #tpu.memory_space<vmem>>, %arg3: memref<1x1024xf32, #tpu.memory_space<vmem>>, %arg4: memref<16x1024xf32, #tpu.memory_space<vmem>>) attributes {dimension_semantics = [#tpu.dimension_semantics<parallel>], iteration_bounds = array<i64: 1>, scalar_prefetch = 0 : i64, scratch_operands = 0 : i64, tpu.core_type = #tpu.core_type<tc>, window_params = [{pipeline_mode = #tpu.pipeline_mode<synchronous>, transform_indices = @transform_0, window_bounds = array<i64: 16, 1024>}, {transform_indices = @transform_1, window_bounds = array<i64: 1024, 1024>}, {transform_indices = @transform_2, window_bounds = array<i64: 1, 1024>}, {transform_indices = @transform_3, window_bounds = array<i64: 16, 1024>}]} {
    %c0 = arith.constant 0 : index
    %c0_0 = arith.constant 0 : index
    %0 = vector.load %arg1[%c0, %c0_0] : memref<16x1024xbf16, #tpu.memory_space<vmem>>, vector<16x1024xbf16>
    %c0_1 = arith.constant 0 : index
    %c0_2 = arith.constant 0 : index
    %1 = vector.load %arg2[%c0_1, %c0_2] : memref<1024x1024xbf16, #tpu.memory_space<vmem>>, vector<1024x1024xbf16>
    %cst = arith.constant dense<0.000000e+00> : vector<16x1024xf32>
    %2 = tpu.matmul %0, %1, %cst {dimension_numbers = #tpu.dot_dimension_numbers<[1], [1], [0], [0], [0, 0, 1, 0], [], []>} : vector<16x1024xbf16>, vector<1024x1024xbf16>, vector<16x1024xf32> -> vector<16x1024xf32>
    %c0_3 = arith.constant 0 : index
    %c0_4 = arith.constant 0 : index
    %3 = vector.load %arg3[%c0_3, %c0_4] : memref<1x1024xf32, #tpu.memory_space<vmem>>, vector<1x1024xf32>
    %4 = vector.broadcast %3 : vector<1x1024xf32> to vector<16x1024xf32>
    %5 = arith.addf %2, %4 : vector<16x1024xf32>
    %c0_5 = arith.constant 0 : index
    %c0_6 = arith.constant 0 : index
    %6 = vector.load %arg4[%c0_5, %c0_6] : memref<16x1024xf32, #tpu.memory_space<vmem>>, vector<16x1024xf32>
    tpu.vector_store %arg4[%c0_5, %c0_6], %5 {strides = array<i32>} : memref<16x1024xf32, #tpu.memory_space<vmem>>, vector<16x1024xf32>,
    return
  }
  func.func @transform_0(%arg0: i32) -> (i32, i32) {
    %c0_i32 = arith.constant 0 : i32
    %c0_i32_0 = arith.constant 0 : i32
    %c0_i32_1 = arith.constant 0 : i32
    return %c0_i32, %c0_i32_0 : i32, i32
  }
  func.func @transform_1(%arg0: i32) -> (i32, i32) {
    %c0_i32 = arith.constant 0 : i32
    %c0_i32_0 = arith.constant 0 : i32
    return %arg0, %c0_i32 : i32, i32
  }
  func.func @transform_2(%arg0: i32) -> (i32, i32) {
    %c0_i32 = arith.constant 0 : i32
    %c0_i32_0 = arith.constant 0 : i32
    return %c0_i32, %arg0 : i32, i32
  }
  func.func @transform_3(%arg0: i32) -> (i32, i32) {
    %c0_i32 = arith.constant 0 : i32
    %c0_i32_0 = arith.constant 0 : i32
    return %c0_i32, %arg0 : i32, i32
  }
}

</mosaic_0001>

<bundles_post_ra>
// kernel: tpu_custom_call.1
= control target key start
LH: loop header
LB: loop body
LE: loop exit
PB: predicated region body
PF: predicated region fallthrough
CT: control target
= control target key end

     0   :  { %8 = vsyncpa [#allocation3], 0  ;;  %s6975_s0 = inlined_call_operand.hbm [shape: bf16[16,1024], index: 0, kind: input, shape index: {}]   ;;  %s6976_s1 = inlined_call_operand.hbm [shape: bf16[1024,1024], index: 1, kind: input, shape index: {}]   ;;  %s6977_s2 = inlined_call_operand.hbm [shape: f32[1,1024], index: 2, kind: input, shape index: {}]   ;;  %s6978_s3 = inlined_call_operand.hbm [shape: f32[16,1024], index: 3, kind: output, shape index: {}]  }
   0x1   :  { %9 = vsyncpa [#allocation6], 0 }
   0x2   :  { %10 = vsyncpa [#allocation4], 0  ;;  %s28_s14 = sshll.u32 %s6976_s1, 4  ;;  %s6843_s15 = smov [#allocation5]   ;;  %s29_s14 = int_to_ptr.hbm [resolvable:$true] %s28_s14 }
   0x3   :  { %s30_s16 = sshll.u32 %s6843_s15, 4  ;;  %s15_s19 = sshll.u32 %s6975_s0, 4  ;;  %s31_s16 = int_to_ptr.vmem [resolvable:$true] %s30_s16  ;;  %s16_s19 = int_to_ptr.hbm [resolvable:$true] %s15_s19 }
   0x4   :  { %s6844_s20 = smov 512   ;;  %s6845_s21 = smov 32  }
   0x5   :  { %36 = dma.hbm_to_vmem [thread:$0]  %s29_s14, 65536, %s31_s16, [#allocation6], %s6844_s20, %s6844_s20, %s6845_s21  }
   0x6   :  { %s6846_s22 = smov [#allocation2]   ;;  %s42_s26 = sshll.u32 %s6977_s2, 4  ;;  %s43_s26 = int_to_ptr.hbm [resolvable:$true] %s42_s26 }
   0x7   :  { %s17_s23 = sshll.u32 %s6846_s22, 4  ;;  %s6847_s1 = smov [#allocation7]   ;;  %s18_s23 = int_to_ptr.vmem [resolvable:$true] %s17_s23 }
   0x8   :  { %23 = dma.hbm_to_vmem [thread:$0]  %s16_s19, 1024, %s18_s23, [#allocation3], %s6844_s20, %s6844_s20, %s6845_s21  }
   0x9   :  { %s44_s27 = sshll.u32 %s6847_s1, 4  ;;  %s45_s27 = int_to_ptr.vmem [resolvable:$true] %s44_s27 }
   0xa   :  { %47 = dma.hbm_to_vmem [thread:$0]  %s43_s26, 128, %s45_s27, [#allocation6]  }
   0xb   :  { %6837 = dma.done.wait [#allocation3], 1024  }
   0xc   :  { %6838 = vsyncadd [#allocation3], 4294966272 }
   0xd   :  { %6839 = dma.done.wait [#allocation6], 65664  }
   0xe   :  { %6840 = vsyncadd [#allocation6], 4294901632  ;;  %v4388_v0 = vld [vmem:[#allocation5 + $0x1c0] sm:$0xf]  ;;  %v6274_v2 = vld [vmem:[#allocation5 + $0x1c4] sm:$0xf] }
   0xf   :  { %v6278_v1 = vld [vmem:[#allocation5 + $0x1dc] sm:$0xf0]  ;;  %v4390_v4 = vld [vmem:[#allocation5 + $0x1e0] sm:$0xf0]  ;;  %v4396_v5 = vld [vmem:[#allocation5 + $0x1c8] sm:$0xf] }
  0x10   :  { %v4389_v3 = vor.u32 %v6278_v1, %v4388_v0  ;;  %v6279_v6 = vld [vmem:[#allocation5 + $0x1e4] sm:$0xf0]  ;;  %v4393_v7 = vor.u32 %v6274_v2, %v4390_v4  ;;  %v6275_v9 = vld [vmem:[#allocation5 + $0x1cc] sm:$0xf]  ;;  %v4356_v12 = vld [vmem:[#allocation5 + $0x180] sm:$0xf] }
  0x11   :  { %v4397_v8 = vor.u32 %v6279_v6, %v4396_v5  ;;  %v4398_v10 = vld [vmem:[#allocation5 + $0x1e8] sm:$0xf0]  ;;  %v6270_v13 = vld [vmem:[#allocation5 + $0x19c] sm:$0xf0]  ;;  %v6266_v14 = vld [vmem:[#allocation5 + $0x184] sm:$0xf] }
  0x12   :  { %3198 = vmatpush.bf16.xpose.msra.mxu0 %v4389_v3  ;;  %v4401_v11 = vor.u32 %v6275_v9, %v4398_v10  ;;  %3212 = vmatpush.bf16.xpose.msra.mxu1 %v4393_v7  ;;  %v4358_v15 = vld [vmem:[#allocation5 + $0x1a0] sm:$0xf0]  ;;  %v4364_v16 = vld [vmem:[#allocation5 + $0x188] sm:$0xf]  ;;  %v6267_v18 = vld [vmem:[#allocation5 + $0x18c] sm:$0xf]  ;;  %v4357_v20 = vor.u32 %v6270_v13, %v4356_v12 }
  0x13   :  { %3226 = vmatpush.bf16.xpose.msra.mxu2 %v4397_v8  ;;  %v6271_v17 = vld [vmem:[#allocation5 + $0x1a4] sm:$0xf0]  ;;  %v4366_v19 = vld [vmem:[#allocation5 + $0x1a8] sm:$0xf0]  ;;  %v4361_v21 = vor.u32 %v6266_v14, %v4358_v15  ;;  %v4324_v24 = vld [vmem:[#allocation5 + $0x140] sm:$0xf] }
  0x14   :  { %3240 = vmatpush.bf16.xpose.msra.mxu3 %v4401_v11  ;;  %v4365_v22 = vor.u32 %v6271_v17, %v4364_v16  ;;  %v4369_v23 = vor.u32 %v6267_v18, %v4366_v19  ;;  %v6262_v25 = vld [vmem:[#allocation5 + $0x15c] sm:$0xf0]  ;;  %v6258_v26 = vld [vmem:[#allocation5 + $0x144] sm:$0xf]  ;;  %v4332_v28 = vld [vmem:[#allocation5 + $0x148] sm:$0xf] }
  0x15   :  { %v4326_v27 = vld [vmem:[#allocation5 + $0x160] sm:$0xf0]  ;;  %v6263_v29 = vld [vmem:[#allocation5 + $0x164] sm:$0xf0]  ;;  %v6259_v30 = vld [vmem:[#allocation5 + $0x14c] sm:$0xf]  ;;  %v4325_v32 = vor.u32 %v6262_v25, %v4324_v24 }
  0x16   :  { %v4334_v31 = vld [vmem:[#allocation5 + $0x168] sm:$0xf0]  ;;  %v4329_v33 = vor.u32 %v6258_v26, %v4326_v27  ;;  %v4333_v34 = vor.u32 %v6263_v29, %v4332_v28  ;;  %v4292_v36 = vld [vmem:[#allocation5 + $0x100] sm:$0xf]  ;;  %v6250_v38 = vld [vmem:[#allocation5 + $0x104] sm:$0xf] }
  0x17   :  { %v4337_v35 = vor.u32 %v6259_v30, %v4334_v31  ;;  %v6254_v37 = vld [vmem:[#allocation5 + $0x11c] sm:$0xf0]  ;;  %v4294_v39 = vld [vmem:[#allocation5 + $0x120] sm:$0xf0]  ;;  %v4300_v40 = vld [vmem:[#allocation5 + $0x108] sm:$0xf] }
  0x18   :  { %v6255_v41 = vld [vmem:[#allocation5 + $0x124] sm:$0xf0]  ;;  %v6251_v42 = vld [vmem:[#allocation5 + $0x10c] sm:$0xf]  ;;  %v4293_v44 = vor.u32 %v6254_v37, %v4292_v36  ;;  %v4297_v45 = vor.u32 %v6250_v38, %v4294_v39  ;;  %v4260_v48 = vld [vmem:[#allocation5 + $0xc0] sm:$0xf] }
  0x19   :  { %v4302_v43 = vld [vmem:[#allocation5 + $0x128] sm:$0xf0]  ;;  %v4301_v46 = vor.u32 %v6255_v41, %v4300_v40  ;;  %v6246_v49 = vld [vmem:[#allocation5 + $0xdc] sm:$0xf0]  ;;  %v6242_v50 = vld [vmem:[#allocation5 + $0xc4] sm:$0xf] }
  0x1a   :  { %3199 = vmatpush.bf16.xpose.msra.mxu0 %v4357_v20  ;;  %3213 = vmatpush.bf16.xpose.msra.mxu1 %v4361_v21  ;;  %v4305_v47 = vor.u32 %v6251_v42, %v4302_v43  ;;  %v4262_v51 = vld [vmem:[#allocation5 + $0xe0] sm:$0xf0]  ;;  %v4268_v52 = vld [vmem:[#allocation5 + $0xc8] sm:$0xf]  ;;  %v6243_v54 = vld [vmem:[#allocation5 + $0xcc] sm:$0xf]  ;;  %v4261_v56 = vor.u32 %v6246_v49, %v4260_v48 }
  0x1b   :  { %3227 = vmatpush.bf16.xpose.msra.mxu2 %v4365_v22  ;;  %v6247_v53 = vld [vmem:[#allocation5 + $0xe4] sm:$0xf0]  ;;  %v4270_v55 = vld [vmem:[#allocation5 + $0xe8] sm:$0xf0]  ;;  %v4265_v57 = vor.u32 %v6242_v50, %v4262_v51  ;;  %v4228_v60 = vld [vmem:[#allocation5 + $0x80] sm:$0xf] }
  0x1c   :  { %3241 = vmatpush.bf16.xpose.msra.mxu3 %v4369_v23  ;;  %v4269_v58 = vor.u32 %v6247_v53, %v4268_v52  ;;  %v4273_v59 = vor.u32 %v6243_v54, %v4270_v55  ;;  %v6238_v61 = vld [vmem:[#allocation5 + $0x9c] sm:$0xf0]  ;;  %v6234_v62 = vld [vmem:[#allocation5 + $0x84] sm:$0xf]  ;;  %v4236_v0 = vld [vmem:[#allocation5 + $0x88] sm:$0xf] }
  0x1d   :  { %v4230_v63 = vld [vmem:[#allocation5 + $0xa0] sm:$0xf0]  ;;  %v6239_v1 = vld [vmem:[#allocation5 + $0xa4] sm:$0xf0]  ;;  %v6235_v2 = vld [vmem:[#allocation5 + $0x8c] sm:$0xf]  ;;  %v4229_v4 = vor.u32 %v6238_v61, %v4228_v60 }
  0x1e   :  { %v4238_v3 = vld [vmem:[#allocation5 + $0xa8] sm:$0xf0]  ;;  %v4233_v5 = vor.u32 %v6234_v62, %v4230_v63  ;;  %v4237_v6 = vor.u32 %v6239_v1, %v4236_v0  ;;  %v4196_v8 = vld [vmem:[#allocation5 + $0x40] sm:$0xf]  ;;  %v6226_v10 = vld [vmem:[#allocation5 + $0x44] sm:$0xf] }
  0x1f   :  { %v4241_v7 = vor.u32 %v6235_v2, %v4238_v3  ;;  %v6230_v9 = vld [vmem:[#allocation5 + $0x5c] sm:$0xf0]  ;;  %v4198_v11 = vld [vmem:[#allocation5 + $0x60] sm:$0xf0]  ;;  %v4204_v12 = vld [vmem:[#allocation5 + $0x48] sm:$0xf] }
  0x20   :  { %v6231_v13 = vld [vmem:[#allocation5 + $0x64] sm:$0xf0]  ;;  %v6227_v14 = vld [vmem:[#allocation5 + $0x4c] sm:$0xf]  ;;  %v4197_v16 = vor.u32 %v6230_v9, %v4196_v8  ;;  %v4201_v17 = vor.u32 %v6226_v10, %v4198_v11  ;;  %v4164_v20 = vld [vmem:[#allocation5] sm:$0xf] }
  0x21   :  { %v4206_v15 = vld [vmem:[#allocation5 + $0x68] sm:$0xf0]  ;;  %v4205_v18 = vor.u32 %v6231_v13, %v4204_v12  ;;  %v6222_v21 = vld [vmem:[#allocation5 + $0x1c] sm:$0xf0]  ;;  %v6218_v22 = vld [vmem:[#allocation5 + $0x4] sm:$0xf] }
  0x22   :  { %3200 = vmatpush.bf16.xpose.msra.mxu0 %v4325_v32  ;;  %3214 = vmatpush.bf16.xpose.msra.mxu1 %v4329_v33  ;;  %v4209_v19 = vor.u32 %v6227_v14, %v4206_v15  ;;  %v4166_v23 = vld [vmem:[#allocation5 + $0x20] sm:$0xf0]  ;;  %v4172_v24 = vld [vmem:[#allocation5 + $0x8] sm:$0xf]  ;;  %v6219_v26 = vld [vmem:[#allocation5 + $0xc] sm:$0xf]  ;;  %v4165_v31 = vor.u32 %v6222_v21, %v4164_v20 }
  0x23   :  { %3228 = vmatpush.bf16.xpose.msra.mxu2 %v4333_v34  ;;  %v6223_v25 = vld [vmem:[#allocation5 + $0x24] sm:$0xf0]  ;;  %v4174_v27 = vld [vmem:[#allocation5 + $0x28] sm:$0xf0]  ;;  %v4404_v28 = vld [vmem:[#allocation5 + $0x1d0] sm:$0xf] }
  0x24   :  { %3242 = vmatpush.bf16.xpose.msra.mxu3 %v4337_v35  ;;  %v6280_v29 = vld [vmem:[#allocation5 + $0x1ec] sm:$0xf0]  ;;  %v6276_v30 = vld [vmem:[#allocation5 + $0x1d4] sm:$0xf]  ;;  %v4412_v33 = vld [vmem:[#allocation5 + $0x1d8] sm:$0xf]  ;;  %v4169_v35 = vor.u32 %v6218_v22, %v4166_v23  ;;  %v4173_v36 = vor.u32 %v6223_v25, %v4172_v24  ;;  %v4177_v39 = vor.u32 %v6219_v26, %v4174_v27 }
  0x25   :  { %v4406_v32 = vld [vmem:[#allocation5 + $0x1f0] sm:$0xf0]  ;;  %v6281_v34 = vld [vmem:[#allocation5 + $0x1f4] sm:$0xf0]  ;;  %v6277_v37 = vld [vmem:[#allocation5 + $0x1dc] sm:$0xf]  ;;  %v4405_v40 = vor.u32 %v6280_v29, %v4404_v28 }
  0x26   :  { %v4414_v38 = vld [vmem:[#allocation5 + $0x1f8] sm:$0xf0]  ;;  %v4409_v41 = vor.u32 %v6276_v30, %v4406_v32  ;;  %v4413_v42 = vor.u32 %v6281_v34, %v4412_v33  ;;  %v4380_v48 = vld [vmem:[#allocation5 + $0x198] sm:$0xf]  ;;  %v4132_v62 = vld [vmem:[#allocation2] sm:$0xf] }
  0x27   :  { %v4417_v43 = vor.u32 %v6277_v37, %v4414_v38  ;;  %v6273_v49 = vld [vmem:[#allocation5 + $0x1b4] sm:$0xf0]  ;;  %v6269_v50 = vld [vmem:[#allocation5 + $0x19c] sm:$0xf]  ;;  %v6214_v63 = vld [vmem:[#allocation2 + $0x1c] sm:$0xf0] }
  0x28   :  { %v4382_v51 = vld [vmem:[#allocation5 + $0x1b8] sm:$0xf0]  ;;  %v4381_v54 = vor.u32 %v6273_v49, %v4380_v48  ;;  %v4348_v60 = vld [vmem:[#allocation5 + $0x158] sm:$0xf]  ;;  %v4140_v0 = vld [vmem:[#allocation2 + $0x8] sm:$0xf]  ;;  %v6880_v3 = vor.u32 %v6214_v63, %v4132_v62 }
  0x29   :  { %v4385_v55 = vor.u32 %v6269_v50, %v4382_v51  ;;  %v6265_v61 = vld [vmem:[#allocation5 + $0x174] sm:$0xf0]  ;;  %v6261_v1 = vld [vmem:[#allocation5 + $0x15c] sm:$0xf]  ;;  %v4308_v10 = vld [vmem:[#allocation5 + $0x110] sm:$0xf] }
  0x2a   :  { %3201 = vmatpush.bf16.xpose.msra.mxu0 %v4293_v44  ;;  %3215 = vmatpush.bf16.xpose.msra.mxu1 %v4297_v45  ;;  %v4372_v44 = vld [vmem:[#allocation5 + $0x190] sm:$0xf]  ;;  %v4350_v2 = vld [vmem:[#allocation5 + $0x178] sm:$0xf0]  ;;  %v4349_v8 = vor.u32 %v6265_v61, %v4348_v60  ;;  %v6252_v12 = vld [vmem:[#allocation5 + $0x114] sm:$0xf] }
  0x2b   :  { %3229 = vmatpush.bf16.xpose.msra.mxu2 %v4301_v46  ;;  %v6272_v45 = vld [vmem:[#allocation5 + $0x1ac] sm:$0xf0]  ;;  %v6268_v46 = vld [vmem:[#allocation5 + $0x194] sm:$0xf]  ;;  %v4353_v9 = vor.u32 %v6261_v1, %v4350_v2  ;;  %v6210_v14 = vld [vmem:[#allocation2 + $0x4] sm:$0xf] }
  0x2c   :  { %3243 = vmatpush.bf16.xpose.msra.mxu3 %v4305_v47  ;;  %v4374_v47 = vld [vmem:[#allocation5 + $0x1b0] sm:$0xf0]  ;;  %v4373_v52 = vor.u32 %v6272_v45, %v4372_v44  ;;  %v6256_v11 = vld [vmem:[#allocation5 + $0x12c] sm:$0xf0]  ;;  %v4134_v15 = vld [vmem:[#allocation2 + $0x20] sm:$0xf0] }
  0x2d   :  { %v4377_v53 = vor.u32 %v6268_v46, %v4374_v47  ;;  %v4310_v13 = vld [vmem:[#allocation5 + $0x130] sm:$0xf0]  ;;  %v4142_v20 = vld [vmem:[#allocation2 + $0x28] sm:$0xf0]  ;;  %v6253_v21 = vld [vmem:[#allocation5 + $0x11c] sm:$0xf]  ;;  %v4309_v24 = vor.u32 %v6256_v11, %v4308_v10 }
  0x2e   :  { %v4318_v22 = vld [vmem:[#allocation5 + $0x138] sm:$0xf0]  ;;  %v4313_v25 = vor.u32 %v6252_v12, %v4310_v13  ;;  %v4276_v28 = vld [vmem:[#allocation5 + $0xd0] sm:$0xf]  ;;  %v6244_v30 = vld [vmem:[#allocation5 + $0xd4] sm:$0xf] }
  0x2f   :  { %v4321_v27 = vor.u32 %v6253_v21, %v4318_v22  ;;  %v6248_v29 = vld [vmem:[#allocation5 + $0xec] sm:$0xf0]  ;;  %v4284_v32 = vld [vmem:[#allocation5 + $0xd8] sm:$0xf]  ;;  %v6245_v34 = vld [vmem:[#allocation5 + $0xdc] sm:$0xf] }
  0x30   :  { %v6249_v33 = vld [vmem:[#allocation5 + $0xf4] sm:$0xf0]  ;;  %v6237_v46 = vld [vmem:[#allocation5 + $0x9c] sm:$0xf]  ;;  %v6224_v1 = vld [vmem:[#allocation5 + $0x2c] sm:$0xf0] }
  0x31   :  { %v4285_v38 = vor.u32 %v6249_v33, %v4284_v32  ;;  %v4252_v44 = vld [vmem:[#allocation5 + $0x98] sm:$0xf]  ;;  %v4254_v47 = vld [vmem:[#allocation5 + $0xb8] sm:$0xf0]  ;;  %v6220_v2 = vld [vmem:[#allocation5 + $0x14] sm:$0xf] }
  0x32   :  { %3202 = vmatpush.bf16.xpose.msra.mxu0 %v4261_v56  ;;  %3216 = vmatpush.bf16.xpose.msra.mxu1 %v4265_v57  ;;  %v4340_v56 = vld [vmem:[#allocation5 + $0x150] sm:$0xf]  ;;  %v6241_v45 = vld [vmem:[#allocation5 + $0xb4] sm:$0xf0]  ;;  %v4257_v51 = vor.u32 %v6237_v46, %v4254_v47  ;;  %v4644_v10 = vld [vmem:[#allocation5 + $0x3c0] sm:$0xf] }
  0x33   :  { %3230 = vmatpush.bf16.xpose.msra.mxu2 %v4269_v58  ;;  %v6264_v57 = vld [vmem:[#allocation5 + $0x16c] sm:$0xf0]  ;;  %v6260_v58 = vld [vmem:[#allocation5 + $0x154] sm:$0xf]  ;;  %v4253_v50 = vor.u32 %v6241_v45, %v4252_v44  ;;  %v6342_v11 = vld [vmem:[#allocation5 + $0x3dc] sm:$0xf0] }
  0x34   :  { %3244 = vmatpush.bf16.xpose.msra.mxu3 %v4273_v59  ;;  %v4342_v59 = vld [vmem:[#allocation5 + $0x170] sm:$0xf0]  ;;  %v6338_v12 = vld [vmem:[#allocation5 + $0x3c4] sm:$0xf]  ;;  %v4654_v21 = vld [vmem:[#allocation5 + $0x3e8] sm:$0xf0] }
  0x35   :  { %v6212_v32 = vld [vmem:[#allocation2 + $0x14] sm:$0xf]  ;;  %v6335_v44 = vld [vmem:[#allocation5 + $0x3a4] sm:$0xf0]  ;;  %v6331_v46 = vld [vmem:[#allocation5 + $0x38c] sm:$0xf] }
  0x36   :  { %v4150_v33 = vld [vmem:[#allocation2 + $0x30] sm:$0xf0]  ;;  %v4622_v47 = vld [vmem:[#allocation5 + $0x3a8] sm:$0xf0]  ;;  %s6848_s0 = smov [#allocation8]   ;;  %s4116_s30 = sshll.u32 %s6978_s3, 4  ;;  %s4117_s30 = int_to_ptr.hbm [resolvable:$true] %s4116_s30 }
  0x37   :  { %s4114_s2 = sshll.u32 %s6848_s0, 4  ;;  %s6849_s4 = smov 1024   ;;  %s4115_s2 = int_to_ptr.vmem [resolvable:$true] %s4114_s2 }
  0x38   :  { %s6850_s5 = smov 64  }
  0x3a   :  { %3203 = vmatpush.bf16.xpose.msra.mxu0 %v4229_v4  ;;  %3217 = vmatpush.bf16.xpose.msra.mxu1 %v4233_v5  ;;  %v6215_v4 = vld [vmem:[#allocation2 + $0x24] sm:$0xf0]  ;;  %v4341_v5 = vor.u32 %v6264_v57, %v4340_v56  ;;  %v4220_v56 = vld [vmem:[#allocation5 + $0x58] sm:$0xf] }
  0x3b   :  { %3231 = vmatpush.bf16.xpose.msra.mxu2 %v4237_v6  ;;  %v6882_v6 = vor.u32 %v6215_v4, %v4140_v0  ;;  %v6233_v57 = vld [vmem:[#allocation5 + $0x74] sm:$0xf0]  ;;  %v4180_v0 = vld [vmem:[#allocation5 + $0x10] sm:$0xf]  ;;  %v4182_v4 = vld [vmem:[#allocation5 + $0x30] sm:$0xf0] }
  0x3c   :  { %3245 = vmatpush.bf16.xpose.msra.mxu3 %v4241_v7  ;;  %v4345_v7 = vor.u32 %v6260_v58, %v4342_v59  ;;  %v6229_v58 = vld [vmem:[#allocation5 + $0x5c] sm:$0xf]  ;;  %v4221_v62 = vor.u32 %v6233_v57, %v4220_v56  ;;  %v4181_v13 = vor.u32 %v6224_v1, %v4180_v0  ;;  %v4588_v56 = vld [vmem:[#allocation5 + $0x348] sm:$0xf]  ;;  %v4548_v0 = vld [vmem:[#allocation5 + $0x300] sm:$0xf] }
  0x3d   :  { %v4222_v59 = vld [vmem:[#allocation5 + $0x78] sm:$0xf0]  ;;  %v6327_v57 = vld [vmem:[#allocation5 + $0x364] sm:$0xf0]  ;;  %v6318_v1 = vld [vmem:[#allocation5 + $0x31c] sm:$0xf0] }
  0x3e   :  { %v4225_v63 = vor.u32 %v6229_v58, %v4222_v59  ;;  %v6323_v58 = vld [vmem:[#allocation5 + $0x34c] sm:$0xf] }
  0x3f   :  { %v4590_v59 = vld [vmem:[#allocation5 + $0x368] sm:$0xf0] }
  0x42   :  { %3204 = vmatpush.bf16.xpose.msra.mxu0 %v4197_v16  ;;  %3218 = vmatpush.bf16.xpose.msra.mxu1 %v4201_v17  ;;  %v6211_v16 = vld [vmem:[#allocation2 + $0xc] sm:$0xf]  ;;  %v4316_v17 = vld [vmem:[#allocation5 + $0x118] sm:$0xf] }
  0x43   :  { %3232 = vmatpush.bf16.xpose.msra.mxu2 %v4205_v18  ;;  %v6257_v18 = vld [vmem:[#allocation5 + $0x134] sm:$0xf0]  ;;  %v6888_v23 = vor.u32 %v6211_v16, %v4142_v20  ;;  %v6343_v16 = vld [vmem:[#allocation5 + $0x3e4] sm:$0xf0]  ;;  %v6339_v20 = vld [vmem:[#allocation5 + $0x3cc] sm:$0xf] }
  0x44   :  { %3246 = vmatpush.bf16.xpose.msra.mxu3 %v4209_v19  ;;  %v6886_v19 = vor.u32 %v6210_v14, %v4134_v15  ;;  %v4317_v26 = vor.u32 %v6257_v18, %v4316_v17  ;;  %v4646_v14 = vld [vmem:[#allocation5 + $0x3e0] sm:$0xf0]  ;;  %v4652_v15 = vld [vmem:[#allocation5 + $0x3c8] sm:$0xf]  ;;  %v4185_v17 = vor.u32 %v6220_v2, %v4182_v4 }
  0x45   :  { %v6314_v2 = vld [vmem:[#allocation5 + $0x304] sm:$0xf] }
  0x46   :  { %v4550_v4 = vld [vmem:[#allocation5 + $0x320] sm:$0xf0] }
  0x4a   :  { %3205 = vmatpush.bf16.xpose.msra.mxu0 %v4165_v31  ;;  %3219 = vmatpush.bf16.xpose.msra.mxu1 %v4169_v35  ;;  %v4278_v31 = vld [vmem:[#allocation5 + $0xf0] sm:$0xf0]  ;;  %v4286_v35 = vld [vmem:[#allocation5 + $0xf8] sm:$0xf0] }
  0x4b   :  { %3233 = vmatpush.bf16.xpose.msra.mxu2 %v4173_v36  ;;  %v4277_v36 = vor.u32 %v6248_v29, %v4276_v28  ;;  %v4281_v37 = vor.u32 %v6244_v30, %v4278_v31  ;;  %v4148_v28 = vld [vmem:[#allocation2 + $0x10] sm:$0xf]  ;;  %v4156_v30 = vld [vmem:[#allocation2 + $0x18] sm:$0xf] }
  0x4c   :  { %3247 = vmatpush.bf16.xpose.msra.mxu3 %v4177_v39  ;;  %v4289_v39 = vor.u32 %v6245_v34, %v4286_v35  ;;  %v6216_v29 = vld [vmem:[#allocation2 + $0x2c] sm:$0xf0]  ;;  %v6217_v31 = vld [vmem:[#allocation2 + $0x34] sm:$0xf0]  ;;  %v6213_v34 = vld [vmem:[#allocation2 + $0x1c] sm:$0xf] }
  0x4d   :  { %v4158_v35 = vld [vmem:[#allocation2 + $0x38] sm:$0xf0] }
  0x4e   :  { %v6898_v45 = vor.u32 %v6213_v34, %v4158_v35  ;;  %v6299_v34 = vld [vmem:[#allocation5 + $0x28c] sm:$0xf] }
  0x4f   :  { %v4494_v35 = vld [vmem:[#allocation5 + $0x2a8] sm:$0xf0] }
  0x51   :  { %3206 = vmatmul.bf16.vlgmr.msra.gmra.mxu0 %v6880_v3  ;;  %3220 = vmatmul.bf16.vlgmr.msra.gmra.mxu1 %v6886_v19 }
  0x52   :  { %3254 = vmatpush.bf16.xpose.msrb.mxu0 %v4405_v40  ;;  %3268 = vmatpush.bf16.xpose.msrb.mxu1 %v4409_v41  ;;  %v4244_v40 = vld [vmem:[#allocation5 + $0x90] sm:$0xf] }
  0x53   :  { %3282 = vmatpush.bf16.xpose.msrb.mxu2 %v4413_v42  ;;  %3248 = vmatmul.bf16.vlgmr.msra.gmra.mxu3 %v6888_v23  ;;  %v6240_v41 = vld [vmem:[#allocation5 + $0xac] sm:$0xf0]  ;;  %v6236_v42 = vld [vmem:[#allocation5 + $0x94] sm:$0xf] }
  0x54   :  { %3296 = vmatpush.bf16.xpose.msrb.mxu3 %v4417_v43  ;;  %3234 = vmatmul.bf16.vlgmr.msra.gmra.mxu2 %v6882_v6  ;;  %v4246_v43 = vld [vmem:[#allocation5 + $0xb0] sm:$0xf0]  ;;  %v4245_v48 = vor.u32 %v6240_v41, %v4244_v40  ;;  %v6894_v40 = vor.u32 %v6217_v31, %v4156_v30  ;;  %v6896_v41 = vor.u32 %v6212_v32, %v4150_v33  ;;  %v6298_v30 = vld [vmem:[#allocation5 + $0x284] sm:$0xf]  ;;  %v4492_v32 = vld [vmem:[#allocation5 + $0x288] sm:$0xf] }
  0x55   :  { %v4249_v49 = vor.u32 %v6236_v42, %v4246_v43  ;;  %v4614_v42 = vld [vmem:[#allocation5 + $0x3a0] sm:$0xf0]  ;;  %v4620_v43 = vld [vmem:[#allocation5 + $0x388] sm:$0xf] }
  0x56   :  { %v4486_v31 = vld [vmem:[#allocation5 + $0x2a0] sm:$0xf0]  ;;  %v6303_v33 = vld [vmem:[#allocation5 + $0x2a4] sm:$0xf0] }
  0x5a   :  { %3255 = vmatpush.bf16.xpose.msrb.mxu0 %v4373_v52  ;;  %3269 = vmatpush.bf16.xpose.msrb.mxu1 %v4377_v53  ;;  %v4212_v52 = vld [vmem:[#allocation5 + $0x50] sm:$0xf] }
  0x5b   :  { %3283 = vmatpush.bf16.xpose.msrb.mxu2 %v4381_v54  ;;  %v6232_v53 = vld [vmem:[#allocation5 + $0x6c] sm:$0xf0]  ;;  %v6228_v54 = vld [vmem:[#allocation5 + $0x54] sm:$0xf] }
  0x5c   :  { %3297 = vmatpush.bf16.xpose.msrb.mxu3 %v4385_v55  ;;  %v4214_v55 = vld [vmem:[#allocation5 + $0x70] sm:$0xf0]  ;;  %v4213_v60 = vor.u32 %v6232_v53, %v4212_v52  ;;  %v4580_v52 = vld [vmem:[#allocation5 + $0x340] sm:$0xf] }
  0x5d   :  { %v4217_v61 = vor.u32 %v6228_v54, %v4214_v55  ;;  %v6326_v53 = vld [vmem:[#allocation5 + $0x35c] sm:$0xf0]  ;;  %v6322_v54 = vld [vmem:[#allocation5 + $0x344] sm:$0xf] }
  0x5e   :  { %v4582_v55 = vld [vmem:[#allocation5 + $0x360] sm:$0xf0] }
  0x62   :  { %3256 = vmatpush.bf16.xpose.msrb.mxu0 %v4341_v5  ;;  %3270 = vmatpush.bf16.xpose.msrb.mxu1 %v4345_v7  ;;  %v4188_v5 = vld [vmem:[#allocation5 + $0x18] sm:$0xf] }
  0x63   :  { %3284 = vmatpush.bf16.xpose.msrb.mxu2 %v4349_v8  ;;  %v6225_v7 = vld [vmem:[#allocation5 + $0x34] sm:$0xf0]  ;;  %v6221_v8 = vld [vmem:[#allocation5 + $0x1c] sm:$0xf] }
  0x64   :  { %3298 = vmatpush.bf16.xpose.msrb.mxu3 %v4353_v9  ;;  %v4190_v9 = vld [vmem:[#allocation5 + $0x38] sm:$0xf0]  ;;  %v4189_v18 = vor.u32 %v6225_v7, %v4188_v5  ;;  %v4556_v5 = vld [vmem:[#allocation5 + $0x308] sm:$0xf] }
  0x65   :  { %v4193_v22 = vor.u32 %v6221_v8, %v4190_v9  ;;  %v6319_v7 = vld [vmem:[#allocation5 + $0x324] sm:$0xf0]  ;;  %v6315_v8 = vld [vmem:[#allocation5 + $0x30c] sm:$0xf] }
  0x66   :  { %v4558_v9 = vld [vmem:[#allocation5 + $0x328] sm:$0xf0] }
  0x6a   :  { %3257 = vmatpush.bf16.xpose.msrb.mxu0 %v4309_v24  ;;  %3271 = vmatpush.bf16.xpose.msrb.mxu1 %v4313_v25  ;;  %v4645_v24 = vor.u32 %v6342_v11, %v4644_v10  ;;  %v4649_v25 = vor.u32 %v6338_v12, %v4646_v14  ;;  %v4549_v10 = vor.u32 %v6318_v1, %v4548_v0  ;;  %v4516_v14 = vld [vmem:[#allocation5 + $0x2c0] sm:$0xf]  ;;  %v4660_v0 = vld [vmem:[#allocation5 + $0x3d0] sm:$0xf] }
  0x6b   :  { %3285 = vmatpush.bf16.xpose.msrb.mxu2 %v4317_v26  ;;  %v4653_v26 = vor.u32 %v6343_v16, %v4652_v15  ;;  %v4553_v11 = vor.u32 %v6314_v2, %v4550_v4  ;;  %v4557_v12 = vor.u32 %v6319_v7, %v4556_v5  ;;  %v6310_v15 = vld [vmem:[#allocation5 + $0x2dc] sm:$0xf0]  ;;  %v6306_v16 = vld [vmem:[#allocation5 + $0x2c4] sm:$0xf]  ;;  %v6344_v1 = vld [vmem:[#allocation5 + $0x3ec] sm:$0xf0] }
  0x6c   :  { %3299 = vmatpush.bf16.xpose.msrb.mxu3 %v4321_v27  ;;  %v4657_v27 = vor.u32 %v6339_v20, %v4654_v21  ;;  %v6311_v20 = vld [vmem:[#allocation5 + $0x2e4] sm:$0xf0]  ;;  %v6307_v21 = vld [vmem:[#allocation5 + $0x2cc] sm:$0xf]  ;;  %v6340_v2 = vld [vmem:[#allocation5 + $0x3d4] sm:$0xf] }
  0x6d   :  { %v4662_v5 = vld [vmem:[#allocation5 + $0x3f0] sm:$0xf0]  ;;  %v4668_v7 = vld [vmem:[#allocation5 + $0x3d8] sm:$0xf] }
  0x72   :  { %3258 = vmatpush.bf16.xpose.msrb.mxu0 %v4277_v36  ;;  %3272 = vmatpush.bf16.xpose.msrb.mxu1 %v4281_v37  ;;  %v6892_v36 = vor.u32 %v6216_v29, %v4148_v28  ;;  %v4612_v37 = vld [vmem:[#allocation5 + $0x380] sm:$0xf] }
  0x73   :  { %3286 = vmatpush.bf16.xpose.msrb.mxu2 %v4285_v38  ;;  %v6334_v38 = vld [vmem:[#allocation5 + $0x39c] sm:$0xf0] }
  0x74   :  { %3300 = vmatpush.bf16.xpose.msrb.mxu3 %v4289_v39  ;;  %v6330_v39 = vld [vmem:[#allocation5 + $0x384] sm:$0xf]  ;;  %v4484_v28 = vld [vmem:[#allocation5 + $0x280] sm:$0xf] }
  0x75   :  { %v6302_v29 = vld [vmem:[#allocation5 + $0x29c] sm:$0xf0] }
  0x7a   :  { %3259 = vmatpush.bf16.xpose.msrb.mxu0 %v4245_v48  ;;  %3273 = vmatpush.bf16.xpose.msrb.mxu1 %v4249_v49  ;;  %v4613_v48 = vor.u32 %v6334_v38, %v4612_v37  ;;  %v4617_v49 = vor.u32 %v6330_v39, %v4614_v42  ;;  %v4485_v37 = vor.u32 %v6302_v29, %v4484_v28 }
  0x7b   :  { %3287 = vmatpush.bf16.xpose.msrb.mxu2 %v4253_v50  ;;  %v4621_v50 = vor.u32 %v6335_v44, %v4620_v43  ;;  %v4489_v38 = vor.u32 %v6298_v30, %v4486_v31  ;;  %v4493_v39 = vor.u32 %v6303_v33, %v4492_v32  ;;  %v4497_v42 = vor.u32 %v6299_v34, %v4494_v35  ;;  %v4452_v43 = vld [vmem:[#allocation5 + $0x240] sm:$0xf]  ;;  %v4596_v32 = vld [vmem:[#allocation5 + $0x350] sm:$0xf]  ;;  %v6324_v34 = vld [vmem:[#allocation5 + $0x354] sm:$0xf] }
  0x7c   :  { %3301 = vmatpush.bf16.xpose.msrb.mxu3 %v4257_v51  ;;  %v4625_v51 = vor.u32 %v6331_v46, %v4622_v47  ;;  %v6294_v44 = vld [vmem:[#allocation5 + $0x25c] sm:$0xf0]  ;;  %v6290_v46 = vld [vmem:[#allocation5 + $0x244] sm:$0xf]  ;;  %v6328_v33 = vld [vmem:[#allocation5 + $0x36c] sm:$0xf0] }
  0x7d   :  { %v4454_v47 = vld [vmem:[#allocation5 + $0x260] sm:$0xf0]  ;;  %v4598_v35 = vld [vmem:[#allocation5 + $0x370] sm:$0xf0] }
  0x82   :  { %3260 = vmatpush.bf16.xpose.msrb.mxu0 %v4213_v60  ;;  %3274 = vmatpush.bf16.xpose.msrb.mxu1 %v4217_v61  ;;  %v4581_v60 = vor.u32 %v6326_v53, %v4580_v52  ;;  %v4585_v61 = vor.u32 %v6322_v54, %v4582_v55  ;;  %v4453_v52 = vor.u32 %v6294_v44, %v4452_v43 }
  0x83   :  { %3288 = vmatpush.bf16.xpose.msrb.mxu2 %v4221_v62  ;;  %v4589_v62 = vor.u32 %v6327_v57, %v4588_v56  ;;  %v4457_v53 = vor.u32 %v6290_v46, %v4454_v47  ;;  %v4420_v56 = vld [vmem:[#allocation5 + $0x200] sm:$0xf]  ;;  %v4597_v43 = vor.u32 %v6328_v33, %v4596_v32  ;;  %v4601_v44 = vor.u32 %v6324_v34, %v4598_v35 }
  0x84   :  { %3302 = vmatpush.bf16.xpose.msrb.mxu3 %v4225_v63  ;;  %v4593_v63 = vor.u32 %v6323_v58, %v4590_v59  ;;  %v6286_v57 = vld [vmem:[#allocation5 + $0x21c] sm:$0xf0]  ;;  %v6282_v58 = vld [vmem:[#allocation5 + $0x204] sm:$0xf] }
  0x85   :  { %v4422_v59 = vld [vmem:[#allocation5 + $0x220] sm:$0xf0]  ;;  %v4421_v4 = vor.u32 %v6286_v57, %v4420_v56 }
  0x8a   :  { %3261 = vmatpush.bf16.xpose.msrb.mxu0 %v4181_v13  ;;  %3275 = vmatpush.bf16.xpose.msrb.mxu1 %v4185_v17  ;;  %v4561_v13 = vor.u32 %v6315_v8, %v4558_v9  ;;  %v4518_v17 = vld [vmem:[#allocation5 + $0x2e0] sm:$0xf0]  ;;  %v6345_v8 = vld [vmem:[#allocation5 + $0x3f4] sm:$0xf0]  ;;  %v4425_v9 = vor.u32 %v6282_v58, %v4422_v59 }
  0x8b   :  { %3289 = vmatpush.bf16.xpose.msrb.mxu2 %v4189_v18  ;;  %v4524_v18 = vld [vmem:[#allocation5 + $0x2c8] sm:$0xf] }
  0x8c   :  { %3303 = vmatpush.bf16.xpose.msrb.mxu3 %v4193_v22  ;;  %v4526_v22 = vld [vmem:[#allocation5 + $0x2e8] sm:$0xf0] }
  0x91   :  { %3262 = vmatmul.bf16.vlgmr.msrb.gmra.mxu0 %v6892_v36  ;;  %3276 = vmatmul.bf16.vlgmr.msrb.gmra.mxu1 %v6896_v41 }
  0x92   :  { %3310 = vmatpush.bf16.xpose.msra.mxu0 %v4645_v24  ;;  %3324 = vmatpush.bf16.xpose.msra.mxu1 %v4649_v25  ;;  %v4517_v24 = vor.u32 %v6310_v15, %v4516_v14  ;;  %v4521_v25 = vor.u32 %v6306_v16, %v4518_v17  ;;  %v4661_v14 = vor.u32 %v6344_v1, %v4660_v0  ;;  %v4540_v0 = vld [vmem:[#allocation5 + $0x2d8] sm:$0xf] }
  0x93   :  { %3338 = vmatpush.bf16.xpose.msra.mxu2 %v4653_v26  ;;  %3304 = vmatmul.bf16.vlgmr.msrb.gmra.mxu3 %v6898_v45  ;;  %v4525_v26 = vor.u32 %v6311_v20, %v4524_v18  ;;  %v4665_v15 = vor.u32 %v6340_v2, %v4662_v5  ;;  %v4669_v16 = vor.u32 %v6345_v8, %v4668_v7  ;;  %v4628_v18 = vld [vmem:[#allocation5 + $0x390] sm:$0xf]  ;;  %v6313_v1 = vld [vmem:[#allocation5 + $0x2f4] sm:$0xf0]  ;;  %v6309_v2 = vld [vmem:[#allocation5 + $0x2dc] sm:$0xf] }
  0x94   :  { %3352 = vmatpush.bf16.xpose.msra.mxu3 %v4657_v27  ;;  %3290 = vmatmul.bf16.vlgmr.msrb.gmra.mxu2 %v6894_v40  ;;  %v4529_v27 = vor.u32 %v6307_v21, %v4526_v22  ;;  %v6336_v20 = vld [vmem:[#allocation5 + $0x3ac] sm:$0xf0]  ;;  %v6332_v21 = vld [vmem:[#allocation5 + $0x394] sm:$0xf]  ;;  %v4541_v8 = vor.u32 %v6313_v1, %v4540_v0 }
  0x95   :  { %v4630_v22 = vld [vmem:[#allocation5 + $0x3b0] sm:$0xf0]  ;;  %v4629_v28 = vor.u32 %v6336_v20, %v4628_v18 }
  0x96   :  { %v4633_v29 = vor.u32 %v6332_v21, %v4630_v22 }
  0x9a   :  { %3311 = vmatpush.bf16.xpose.msra.mxu0 %v4613_v48  ;;  %3325 = vmatpush.bf16.xpose.msra.mxu1 %v4617_v49  ;;  %v4460_v48 = vld [vmem:[#allocation5 + $0x248] sm:$0xf] }
  0x9b   :  { %3339 = vmatpush.bf16.xpose.msra.mxu2 %v4621_v50  ;;  %v6295_v49 = vld [vmem:[#allocation5 + $0x264] sm:$0xf0]  ;;  %v6291_v50 = vld [vmem:[#allocation5 + $0x24c] sm:$0xf] }
  0x9c   :  { %3353 = vmatpush.bf16.xpose.msra.mxu3 %v4625_v51  ;;  %v4462_v51 = vld [vmem:[#allocation5 + $0x268] sm:$0xf0]  ;;  %v4461_v54 = vor.u32 %v6295_v49, %v4460_v48  ;;  %v4564_v48 = vld [vmem:[#allocation5 + $0x310] sm:$0xf] }
  0x9d   :  { %v4465_v55 = vor.u32 %v6291_v50, %v4462_v51  ;;  %v6320_v49 = vld [vmem:[#allocation5 + $0x32c] sm:$0xf0]  ;;  %v6316_v50 = vld [vmem:[#allocation5 + $0x314] sm:$0xf] }
  0x9e   :  { %v4566_v51 = vld [vmem:[#allocation5 + $0x330] sm:$0xf0]  ;;  %v4565_v56 = vor.u32 %v6320_v49, %v4564_v48  ;;  %v6908_v48 = vld [vmem:[#allocation7] sm:$0xff] }
  0x9f   :  { %v4569_v57 = vor.u32 %v6316_v50, %v4566_v51  ;;  %v4900_v49 = vld [vmem:[#allocation5 + $0x5c0] sm:$0xf]  ;;  %v6402_v51 = vld [vmem:[#allocation5 + $0x5c4] sm:$0xf] }
  0xa0   :  { %v6406_v50 = vld [vmem:[#allocation5 + $0x5dc] sm:$0xf0] }
  0xa1   :  { %v4901_v0 = vor.u32 %v6406_v50, %v4900_v49 }
  0xa2   :  { %3312 = vmatpush.bf16.xpose.msra.mxu0 %v4581_v60  ;;  %3326 = vmatpush.bf16.xpose.msra.mxu1 %v4585_v61  ;;  %v4428_v60 = vld [vmem:[#allocation5 + $0x208] sm:$0xf] }
  0xa3   :  { %3340 = vmatpush.bf16.xpose.msra.mxu2 %v4589_v62  ;;  %v6287_v61 = vld [vmem:[#allocation5 + $0x224] sm:$0xf0]  ;;  %v6283_v62 = vld [vmem:[#allocation5 + $0x20c] sm:$0xf] }
  0xa4   :  { %3354 = vmatpush.bf16.xpose.msra.mxu3 %v4593_v63  ;;  %v4430_v63 = vld [vmem:[#allocation5 + $0x228] sm:$0xf0] }
  0xaa   :  { %3313 = vmatpush.bf16.xpose.msra.mxu0 %v4549_v10  ;;  %3327 = vmatpush.bf16.xpose.msra.mxu1 %v4553_v11  ;;  %v4429_v10 = vor.u32 %v6287_v61, %v4428_v60  ;;  %v6341_v11 = vld [vmem:[#allocation5 + $0x3dc] sm:$0xf]  ;;  %v4532_v60 = vld [vmem:[#allocation5 + $0x2d0] sm:$0xf] }
  0xab   :  { %3341 = vmatpush.bf16.xpose.msra.mxu2 %v4557_v12  ;;  %v4670_v12 = vld [vmem:[#allocation5 + $0x3f8] sm:$0xf0]  ;;  %v6312_v61 = vld [vmem:[#allocation5 + $0x2ec] sm:$0xf0] }
  0xac   :  { %3355 = vmatpush.bf16.xpose.msra.mxu3 %v4561_v13  ;;  %v4433_v13 = vor.u32 %v6283_v62, %v4430_v63  ;;  %v4673_v17 = vor.u32 %v6341_v11, %v4670_v12  ;;  %v6308_v62 = vld [vmem:[#allocation5 + $0x2d4] sm:$0xf]  ;;  %v4533_v5 = vor.u32 %v6312_v61, %v4532_v60  ;;  %v6304_v11 = vld [vmem:[#allocation5 + $0x2ac] sm:$0xf0]  ;;  %v4910_v60 = vld [vmem:[#allocation5 + $0x5e8] sm:$0xf0] }
  0xad   :  { %v4534_v63 = vld [vmem:[#allocation5 + $0x2f0] sm:$0xf0]  ;;  %v582_v61 = vperm.slane %v6908_v48, 0 }
  0xae   :  { %v4537_v7 = vor.u32 %v6308_v62, %v4534_v63  ;;  %v6300_v12 = vld [vmem:[#allocation5 + $0x294] sm:$0xf] }
  0xb2   :  { %3314 = vmatpush.bf16.xpose.msra.mxu0 %v4517_v24  ;;  %3328 = vmatpush.bf16.xpose.msra.mxu1 %v4521_v25  ;;  %v4636_v24 = vld [vmem:[#allocation5 + $0x398] sm:$0xf] }
  0xb3   :  { %3342 = vmatpush.bf16.xpose.msra.mxu2 %v4525_v26  ;;  %v6337_v25 = vld [vmem:[#allocation5 + $0x3b4] sm:$0xf0]  ;;  %v6333_v26 = vld [vmem:[#allocation5 + $0x39c] sm:$0xf] }
  0xb4   :  { %3356 = vmatpush.bf16.xpose.msra.mxu3 %v4529_v27  ;;  %v4638_v27 = vld [vmem:[#allocation5 + $0x3b8] sm:$0xf0]  ;;  %v4637_v30 = vor.u32 %v6337_v25, %v4636_v24  ;;  %v4468_v24 = vld [vmem:[#allocation5 + $0x250] sm:$0xf] }
  0xb5   :  { %v4641_v31 = vor.u32 %v6333_v26, %v4638_v27  ;;  %v6296_v25 = vld [vmem:[#allocation5 + $0x26c] sm:$0xf0]  ;;  %v6292_v26 = vld [vmem:[#allocation5 + $0x254] sm:$0xf] }
  0xb6   :  { %v4470_v27 = vld [vmem:[#allocation5 + $0x270] sm:$0xf0]  ;;  %v4469_v32 = vor.u32 %v6296_v25, %v4468_v24 }
  0xb7   :  { %v4473_v33 = vor.u32 %v6292_v26, %v4470_v27  ;;  %v4836_v27 = vld [vmem:[#allocation5 + $0x540] sm:$0xf] }
  0xba   :  { %3315 = vmatpush.bf16.xpose.msra.mxu0 %v4485_v37  ;;  %3329 = vmatpush.bf16.xpose.msra.mxu1 %v4489_v38  ;;  %v4604_v37 = vld [vmem:[#allocation5 + $0x358] sm:$0xf] }
  0xbb   :  { %3343 = vmatpush.bf16.xpose.msra.mxu2 %v4493_v39  ;;  %v6329_v38 = vld [vmem:[#allocation5 + $0x374] sm:$0xf0]  ;;  %v6325_v39 = vld [vmem:[#allocation5 + $0x35c] sm:$0xf] }
  0xbc   :  { %3357 = vmatpush.bf16.xpose.msra.mxu3 %v4497_v42  ;;  %v4606_v42 = vld [vmem:[#allocation5 + $0x378] sm:$0xf0]  ;;  %v4605_v46 = vor.u32 %v6329_v38, %v4604_v37  ;;  %v4436_v37 = vld [vmem:[#allocation5 + $0x210] sm:$0xf] }
  0xbd   :  { %v4609_v47 = vor.u32 %v6325_v39, %v4606_v42  ;;  %v6288_v38 = vld [vmem:[#allocation5 + $0x22c] sm:$0xf0]  ;;  %v6284_v39 = vld [vmem:[#allocation5 + $0x214] sm:$0xf] }
  0xbe   :  { %v4438_v42 = vld [vmem:[#allocation5 + $0x230] sm:$0xf0] }
  0xc2   :  { %3316 = vmatpush.bf16.xpose.msra.mxu0 %v4453_v52  ;;  %3330 = vmatpush.bf16.xpose.msra.mxu1 %v4457_v53  ;;  %v4572_v52 = vld [vmem:[#allocation5 + $0x318] sm:$0xf] }
  0xc3   :  { %3344 = vmatpush.bf16.xpose.msra.mxu2 %v4461_v54  ;;  %v6321_v53 = vld [vmem:[#allocation5 + $0x334] sm:$0xf0]  ;;  %v6317_v54 = vld [vmem:[#allocation5 + $0x31c] sm:$0xf] }
  0xc4   :  { %3358 = vmatpush.bf16.xpose.msra.mxu3 %v4465_v55  ;;  %v4574_v55 = vld [vmem:[#allocation5 + $0x338] sm:$0xf0]  ;;  %v4573_v58 = vor.u32 %v6321_v53, %v4572_v52  ;;  %v4437_v52 = vor.u32 %v6288_v38, %v4436_v37  ;;  %v4902_v53 = vld [vmem:[#allocation5 + $0x5e0] sm:$0xf0]  ;;  %v6387_v37 = vld [vmem:[#allocation5 + $0x54c] sm:$0xf] }
  0xc5   :  { %v4577_v59 = vor.u32 %v6317_v54, %v4574_v55  ;;  %v4908_v54 = vld [vmem:[#allocation5 + $0x5c8] sm:$0xf]  ;;  %v4905_v1 = vor.u32 %v6402_v51, %v4902_v53  ;;  %v4846_v38 = vld [vmem:[#allocation5 + $0x568] sm:$0xf0]  ;;  %v6382_v53 = vld [vmem:[#allocation5 + $0x51c] sm:$0xf0] }
  0xc6   :  { %v6407_v55 = vld [vmem:[#allocation5 + $0x5e4] sm:$0xf0] }
  0xca   :  { %3317 = vmatpush.bf16.xpose.msra.mxu0 %v4421_v4  ;;  %3331 = vmatpush.bf16.xpose.msra.mxu1 %v4425_v9  ;;  %v4542_v4 = vld [vmem:[#allocation5 + $0x2f8] sm:$0xf0] }
  0xcb   :  { %3345 = vmatpush.bf16.xpose.msra.mxu2 %v4429_v10  ;;  %v4545_v9 = vor.u32 %v6309_v2, %v4542_v4  ;;  %v4500_v10 = vld [vmem:[#allocation5 + $0x290] sm:$0xf]  ;;  %v4909_v2 = vor.u32 %v6407_v55, %v4908_v54  ;;  %v6378_v54 = vld [vmem:[#allocation5 + $0x504] sm:$0xf] }
  0xcc   :  { %3359 = vmatpush.bf16.xpose.msra.mxu3 %v4433_v13  ;;  %v4502_v13 = vld [vmem:[#allocation5 + $0x2b0] sm:$0xf0]  ;;  %v4501_v18 = vor.u32 %v6304_v11, %v4500_v10  ;;  %v6394_v10 = vld [vmem:[#allocation5 + $0x584] sm:$0xf] }
  0xcd   :  { %v4505_v20 = vor.u32 %v6300_v12, %v4502_v13  ;;  %v4870_v11 = vld [vmem:[#allocation5 + $0x5a0] sm:$0xf0]  ;;  %v4876_v12 = vld [vmem:[#allocation5 + $0x588] sm:$0xf] }
  0xce   :  { %v3221_v62 = vpop.f32.mrf.mxu1  ;;  %v6399_v13 = vld [vmem:[#allocation5 + $0x5a4] sm:$0xf0] }
  0xd1   :  { %3318 = vmatmul.bf16.vlgmr.msra.gmra.mxu0 %v6880_v3  ;;  %3332 = vmatmul.bf16.vlgmr.msra.gmra.mxu1 %v6886_v19 }
  0xd2   :  { %3366 = vmatpush.bf16.xpose.msrb.mxu0 %v4661_v14  ;;  %3380 = vmatpush.bf16.xpose.msrb.mxu1 %v4665_v15  ;;  %v4508_v14 = vld [vmem:[#allocation5 + $0x298] sm:$0xf] }
  0xd3   :  { %3394 = vmatpush.bf16.xpose.msrb.mxu2 %v4669_v16  ;;  %3360 = vmatmul.bf16.vlgmr.msra.gmra.mxu3 %v6888_v23  ;;  %v6305_v15 = vld [vmem:[#allocation5 + $0x2b4] sm:$0xf0]  ;;  %v6301_v16 = vld [vmem:[#allocation5 + $0x29c] sm:$0xf] }
  0xd4   :  { %3408 = vmatpush.bf16.xpose.msrb.mxu3 %v4673_v17  ;;  %3346 = vmatmul.bf16.vlgmr.msra.gmra.mxu2 %v6882_v6  ;;  %v4510_v17 = vld [vmem:[#allocation5 + $0x2b8] sm:$0xf0]  ;;  %v4509_v21 = vor.u32 %v6305_v15, %v4508_v14 }
  0xd5   :  { %v4513_v22 = vor.u32 %v6301_v16, %v4510_v17  ;;  %v6395_v16 = vld [vmem:[#allocation5 + $0x58c] sm:$0xf] }
  0xd6   :  { %v3249_v14 = vpop.f32.mrf.mxu3  ;;  %v4878_v17 = vld [vmem:[#allocation5 + $0x5a8] sm:$0xf0]  ;;  %v3223_v24 = vpop.f32.mrf.mxu1 }
  0xd7   :  { %v4881_v25 = vor.u32 %v6395_v16, %v4878_v17  ;;  %v4780_v16 = vld [vmem:[#allocation5 + $0x4c8] sm:$0xf] }
  0xd8   :  { %v6375_v17 = vld [vmem:[#allocation5 + $0x4e4] sm:$0xf0] }
  0xda   :  { %3367 = vmatpush.bf16.xpose.msrb.mxu0 %v4629_v28  ;;  %3381 = vmatpush.bf16.xpose.msrb.mxu1 %v4633_v29  ;;  %v4476_v28 = vld [vmem:[#allocation5 + $0x258] sm:$0xf] }
  0xdb   :  { %3395 = vmatpush.bf16.xpose.msrb.mxu2 %v4637_v30  ;;  %v6297_v29 = vld [vmem:[#allocation5 + $0x274] sm:$0xf0]  ;;  %v6293_v30 = vld [vmem:[#allocation5 + $0x25c] sm:$0xf] }
  0xdc   :  { %3409 = vmatpush.bf16.xpose.msrb.mxu3 %v4641_v31  ;;  %v4478_v31 = vld [vmem:[#allocation5 + $0x278] sm:$0xf0]  ;;  %v4477_v34 = vor.u32 %v6297_v29, %v4476_v28  ;;  %v6390_v28 = vld [vmem:[#allocation5 + $0x55c] sm:$0xf0]  ;;  %v6386_v29 = vld [vmem:[#allocation5 + $0x544] sm:$0xf] }
  0xdd   :  { %v4481_v35 = vor.u32 %v6293_v30, %v4478_v31  ;;  %v4838_v31 = vld [vmem:[#allocation5 + $0x560] sm:$0xf0] }
  0xe2   :  { %3368 = vmatpush.bf16.xpose.msrb.mxu0 %v4597_v43  ;;  %3382 = vmatpush.bf16.xpose.msrb.mxu1 %v4601_v44  ;;  %v4444_v43 = vld [vmem:[#allocation5 + $0x218] sm:$0xf] }
  0xe3   :  { %3396 = vmatpush.bf16.xpose.msrb.mxu2 %v4605_v46  ;;  %v6289_v44 = vld [vmem:[#allocation5 + $0x234] sm:$0xf0]  ;;  %v6285_v46 = vld [vmem:[#allocation5 + $0x21c] sm:$0xf] }
  0xe4   :  { %3410 = vmatpush.bf16.xpose.msrb.mxu3 %v4609_v47  ;;  %v4446_v47 = vld [vmem:[#allocation5 + $0x238] sm:$0xf0] }
  0xe5   :  { %v4449_v63 = vor.u32 %v6285_v46, %v4446_v47  ;;  %v4849_v47 = vor.u32 %v6387_v37, %v4846_v38  ;;  %v6367_v37 = vld [vmem:[#allocation5 + $0x4a4] sm:$0xf0]  ;;  %v6363_v38 = vld [vmem:[#allocation5 + $0x48c] sm:$0xf] }
  0xea   :  { %3369 = vmatpush.bf16.xpose.msrb.mxu0 %v4565_v56  ;;  %3383 = vmatpush.bf16.xpose.msrb.mxu1 %v4569_v57  ;;  %v3207_v56 = vpop.f32.mrf.mxu0  ;;  %v4441_v57 = vor.u32 %v6284_v39, %v4438_v42  ;;  %v4837_v39 = vor.u32 %v6390_v28, %v4836_v27  ;;  %v3251_v42 = vpop.f32.mrf.mxu3 }
  0xeb   :  { %3397 = vmatpush.bf16.xpose.msrb.mxu2 %v4573_v58  ;;  %v4445_v58 = vor.u32 %v6289_v44, %v4444_v43  ;;  %v4841_v43 = vor.u32 %v6386_v29, %v4838_v31  ;;  %v4740_v31 = vld [vmem:[#allocation5 + $0x480] sm:$0xf] }
  0xec   :  { %3411 = vmatpush.bf16.xpose.msrb.mxu3 %v4577_v59  ;;  %v6403_v59 = vld [vmem:[#allocation5 + $0x5cc] sm:$0xf] }
  0xed   :  { %v4913_v4 = vor.u32 %v6403_v59, %v4910_v60  ;;  %v6383_v59 = vld [vmem:[#allocation5 + $0x524] sm:$0xf0]  ;;  %v6379_v60 = vld [vmem:[#allocation5 + $0x50c] sm:$0xf] }
  0xf2   :  { %3370 = vmatpush.bf16.xpose.msrb.mxu0 %v4533_v5  ;;  %3384 = vmatpush.bf16.xpose.msrb.mxu1 %v4537_v7  ;;  %v3208_v5 = vadd.f32 %v3207_v56, %v582_v61  ;;  %v3235_v7 = vpop.f32.mrf.mxu2 }
  0xf3   :  { %3398 = vmatpush.bf16.xpose.msrb.mxu2 %v4541_v8  ;;  %v4868_v8 = vld [vmem:[#allocation5 + $0x580] sm:$0xf] }
  0xf4   :  { %3412 = vmatpush.bf16.xpose.msrb.mxu3 %v4545_v9  ;;  %v6398_v9 = vld [vmem:[#allocation5 + $0x59c] sm:$0xf0]  ;;  %v3222_v15 = vadd.f32 %v3221_v62, %v3208_v5 }
  0xf6   :  { %v3236_v26 = vadd.f32 %v3235_v7, %v3222_v15  ;;  %v4774_v15 = vld [vmem:[#allocation5 + $0x4e0] sm:$0xf0] }
  0xfa   :  { %3371 = vmatpush.bf16.xpose.msrb.mxu0 %v4501_v18  ;;  %3385 = vmatpush.bf16.xpose.msrb.mxu1 %v4505_v20  ;;  %v4869_v18 = vor.u32 %v6398_v9, %v4868_v8  ;;  %v3209_v20 = vpop.f32.mrf.mxu0 }
  0xfb   :  { %3399 = vmatpush.bf16.xpose.msrb.mxu2 %v4509_v21  ;;  %v4873_v21 = vor.u32 %v6394_v10, %v4870_v11  ;;  %v3210_v30 = vadd.f32 %v3209_v20, %v582_v61  ;;  %v4814_v61 = vld [vmem:[#allocation5 + $0x528] sm:$0xf0]  ;;  %v4772_v11 = vld [vmem:[#allocation5 + $0x4c0] sm:$0xf] }
  0xfc   :  { %3413 = vmatpush.bf16.xpose.msrb.mxu3 %v4513_v22  ;;  %v4877_v22 = vor.u32 %v6399_v13, %v4876_v12  ;;  %v4817_v5 = vor.u32 %v6379_v60, %v4814_v61  ;;  %v6374_v13 = vld [vmem:[#allocation5 + $0x4dc] sm:$0xf0]  ;;  %v4782_v20 = vld [vmem:[#allocation5 + $0x4e8] sm:$0xf0] }
  0xfd   :  { %v3224_v46 = vadd.f32 %v3223_v24, %v3210_v30  ;;  %v4676_v60 = vld [vmem:[#allocation5 + $0x400] sm:$0xf] }
  0xfe   :  { %v6350_v61 = vld [vmem:[#allocation5 + $0x41c] sm:$0xf0] }
 0x102   :  { %3372 = vmatpush.bf16.xpose.msrb.mxu0 %v4469_v32  ;;  %3386 = vmatpush.bf16.xpose.msrb.mxu1 %v4473_v33  ;;  %v4844_v32 = vld [vmem:[#allocation5 + $0x548] sm:$0xf] }
 0x103   :  { %3400 = vmatpush.bf16.xpose.msrb.mxu2 %v4477_v34  ;;  %v6391_v33 = vld [vmem:[#allocation5 + $0x564] sm:$0xf0]  ;;  %v3250_v34 = vadd.f32 %v3249_v14, %v3236_v26  ;;  %v6370_v14 = vld [vmem:[#allocation5 + $0x4c4] sm:$0xf]  ;;  %v4781_v26 = vor.u32 %v6375_v17, %v4780_v16  ;;  %v4926_v16 = vld [vmem:[#allocation5 + $0x5f8] sm:$0xf0] }
 0x104   :  { %3414 = vmatpush.bf16.xpose.msrb.mxu3 %v4481_v35  ;;  %v3237_v35 = vpop.f32.mrf.mxu2  ;;  %v4845_v44 = vor.u32 %v6391_v33, %v4844_v32  ;;  %v6366_v32 = vld [vmem:[#allocation5 + $0x49c] sm:$0xf0]  ;;  %v6362_v33 = vld [vmem:[#allocation5 + $0x484] sm:$0xf] }
 0x105   :  { %v3238_v55 = vadd.f32 %v3237_v35, %v3224_v46  ;;  %v4748_v35 = vld [vmem:[#allocation5 + $0x488] sm:$0xf] }
 0x10a   :  { %3373 = vmatpush.bf16.xpose.msrb.mxu0 %v4437_v52  ;;  %3387 = vmatpush.bf16.xpose.msrb.mxu1 %v4441_v57  ;;  %v4804_v52 = vld [vmem:[#allocation5 + $0x500] sm:$0xf]  ;;  %v4806_v57 = vld [vmem:[#allocation5 + $0x520] sm:$0xf0] }
 0x10b   :  { %3401 = vmatpush.bf16.xpose.msrb.mxu2 %v4445_v58  ;;  %v4812_v58 = vld [vmem:[#allocation5 + $0x508] sm:$0xf]  ;;  %v4805_v62 = vor.u32 %v6382_v53, %v4804_v52 }
 0x10c   :  { %3415 = vmatpush.bf16.xpose.msrb.mxu3 %v4449_v63  ;;  %v4716_v52 = vld [vmem:[#allocation5 + $0x448] sm:$0xf] }
 0x10d   :  { %v6359_v53 = vld [vmem:[#allocation5 + $0x464] sm:$0xf0] }
 0x10e   :  { %v3263_v49 = vpop.f32.mrf.mxu0  ;;  %v3277_v51 = vpop.f32.mrf.mxu1 }
 0x10f   :  { %v3264_v50 = vadd.f32 %v3263_v49, %v3250_v34  ;;  %v4742_v34 = vld [vmem:[#allocation5 + $0x4a0] sm:$0xf0]  ;;  %v6358_v49 = vld [vmem:[#allocation5 + $0x45c] sm:$0xf0] }
 0x111   :  { %3374 = vmatmul.bf16.vlgmr.msrb.gmra.mxu0 %v6892_v36  ;;  %3388 = vmatmul.bf16.vlgmr.msrb.gmra.mxu1 %v6896_v41  ;;  %v3278_v56 = vadd.f32 %v3277_v51, %v3264_v50  ;;  %v6354_v50 = vld [vmem:[#allocation5 + $0x444] sm:$0xf] }
 0x112   :  { %3422 = vmatpush.bf16.xpose.msra.mxu0 %v4901_v0  ;;  %3436 = vmatpush.bf16.xpose.msra.mxu1 %v4905_v1  ;;  %v4809_v0 = vor.u32 %v6378_v54, %v4806_v57  ;;  %v4813_v1 = vor.u32 %v6383_v59, %v4812_v58  ;;  %v4710_v51 = vld [vmem:[#allocation5 + $0x460] sm:$0xf0]  ;;  %v6355_v54 = vld [vmem:[#allocation5 + $0x44c] sm:$0xf]  ;;  %v4717_v58 = vor.u32 %v6359_v53, %v4716_v52  ;;  %v4820_v53 = vld [vmem:[#allocation5 + $0x510] sm:$0xf] }
 0x113   :  { %3450 = vmatpush.bf16.xpose.msra.mxu2 %v4909_v2  ;;  %3416 = vmatmul.bf16.vlgmr.msrb.gmra.mxu3 %v6898_v45  ;;  %v3252_v2 = vadd.f32 %v3251_v42, %v3238_v55  ;;  %v4741_v42 = vor.u32 %v6366_v32, %v4740_v31  ;;  %v4718_v55 = vld [vmem:[#allocation5 + $0x468] sm:$0xf0]  ;;  %v4713_v57 = vor.u32 %v6354_v50, %v4710_v51  ;;  %v4894_v31 = vld [vmem:[#allocation5 + $0x5b8] sm:$0xf0] }
 0x114   :  { %3464 = vmatpush.bf16.xpose.msra.mxu3 %v4913_v4  ;;  %3402 = vmatmul.bf16.vlgmr.msrb.gmra.mxu2 %v6894_v40  ;;  %v4721_v59 = vor.u32 %v6355_v54, %v4718_v55  ;;  %v6384_v54 = vld [vmem:[#allocation5 + $0x52c] sm:$0xf0]  ;;  %v6380_v55 = vld [vmem:[#allocation5 + $0x514] sm:$0xf] }
 0x116   :  { %v3265_v7 = vpop.f32.mrf.mxu0  ;;  %v3305_v8 = vpop.f32.mrf.mxu3 }
 0x117   :  { %v3291_v63 = vpop.f32.mrf.mxu2  ;;  %v3266_v9 = vadd.f32 %v3265_v7, %v3252_v2  ;;  %v3279_v12 = vpop.f32.mrf.mxu1  ;;  %v6347_v2 = vld [vmem:[#allocation5 + $0x40c] sm:$0xf]  ;;  %v6408_v7 = vld [vmem:[#allocation5 + $0x5ec] sm:$0xf0] }
 0x118   :  { %v3292_v4 = vadd.f32 %v3291_v63, %v3278_v56  ;;  %v4678_v63 = vld [vmem:[#allocation5 + $0x420] sm:$0xf0] }
 0x11a   :  { %3423 = vmatpush.bf16.xpose.msra.mxu0 %v4869_v18  ;;  %3437 = vmatpush.bf16.xpose.msra.mxu1 %v4873_v21  ;;  %v3306_v10 = vadd.f32 %v3305_v8, %v3292_v4  ;;  %v6371_v18 = vld [vmem:[#allocation5 + $0x4cc] sm:$0xf]  ;;  %v3280_v21 = vadd.f32 %v3279_v12, %v3266_v9  ;;  %v6404_v8 = vld [vmem:[#allocation5 + $0x5d4] sm:$0xf]  ;;  %v4677_v9 = vor.u32 %v6350_v61, %v4676_v60  ;;  %v6409_v12 = vld [vmem:[#allocation5 + $0x5f4] sm:$0xf0] }
 0x11b   :  { %3451 = vmatpush.bf16.xpose.msra.mxu2 %v4877_v22  ;;  %v4773_v22 = vor.u32 %v6374_v13, %v4772_v11  ;;  %v4785_v28 = vor.u32 %v6371_v18, %v4782_v20  ;;  %v4686_v4 = vld [vmem:[#allocation5 + $0x428] sm:$0xf0]  ;;  %v4924_v11 = vld [vmem:[#allocation5 + $0x5d8] sm:$0xf]  ;;  %v4830_v60 = vld [vmem:[#allocation5 + $0x538] sm:$0xf0]  ;;  %v4821_v61 = vor.u32 %v6384_v54, %v4820_v53 }
 0x11c   :  { %3465 = vmatpush.bf16.xpose.msra.mxu3 %v4881_v25  ;;  %4094 = vst [vmem:[#allocation8] sm:$0xff] %v3306_v10  ;;  %v4777_v25 = vor.u32 %v6370_v14, %v4774_v15  ;;  %v4918_v10 = vld [vmem:[#allocation5 + $0x5f0] sm:$0xf0]  ;;  %v6405_v15 = vld [vmem:[#allocation5 + $0x5dc] sm:$0xf]  ;;  %v4689_v17 = vor.u32 %v6347_v2, %v4686_v4 }
 0x11d   :  { %v4921_v20 = vor.u32 %v6404_v8, %v4918_v10  ;;  %v6376_v2 = vld [vmem:[#allocation5 + $0x4ec] sm:$0xf0]  ;;  %v6372_v4 = vld [vmem:[#allocation5 + $0x4d4] sm:$0xf]  ;;  %v6377_v8 = vld [vmem:[#allocation5 + $0x4f4] sm:$0xf0] }
 0x11e   :  { %v3307_v29 = vpop.f32.mrf.mxu3  ;;  %v4798_v10 = vld [vmem:[#allocation5 + $0x4f8] sm:$0xf0]  ;;  %v5156_v54 = vld [vmem:[#allocation5 + $0x7c0] sm:$0xf] }
 0x11f   :  { %v3293_v24 = vpop.f32.mrf.mxu2  ;;  %v4702_v53 = vld [vmem:[#allocation5 + $0x438] sm:$0xf0] }
 0x120   :  { %v3294_v27 = vadd.f32 %v3293_v24, %v3280_v21  ;;  %v4925_v21 = vor.u32 %v6409_v12, %v4924_v11  ;;  %v4884_v24 = vld [vmem:[#allocation5 + $0x590] sm:$0xf] }
 0x122   :  { %3424 = vmatpush.bf16.xpose.msra.mxu0 %v4837_v39  ;;  %3438 = vmatpush.bf16.xpose.msra.mxu1 %v4841_v43  ;;  %v3308_v30 = vadd.f32 %v3307_v29, %v3294_v27  ;;  %v4750_v39 = vld [vmem:[#allocation5 + $0x4a8] sm:$0xf0]  ;;  %v4745_v43 = vor.u32 %v6362_v33, %v4742_v34  ;;  %v4886_v27 = vld [vmem:[#allocation5 + $0x5b0] sm:$0xf0]  ;;  %v6401_v29 = vld [vmem:[#allocation5 + $0x5b4] sm:$0xf0] }
 0x123   :  { %3452 = vmatpush.bf16.xpose.msra.mxu2 %v4845_v44  ;;  %v4749_v44 = vor.u32 %v6367_v37, %v4748_v35  ;;  %v4753_v46 = vor.u32 %v6363_v38, %v4750_v39  ;;  %v4852_v37 = vld [vmem:[#allocation5 + $0x550] sm:$0xf]  ;;  %v6388_v39 = vld [vmem:[#allocation5 + $0x554] sm:$0xf] }
 0x124   :  { %3466 = vmatpush.bf16.xpose.msra.mxu3 %v4849_v47  ;;  %4102 = vst [vmem:[#allocation8 + $0x40] sm:$0xff] %v3308_v30  ;;  %v4708_v47 = vld [vmem:[#allocation5 + $0x440] sm:$0xf]  ;;  %v6397_v30 = vld [vmem:[#allocation5 + $0x59c] sm:$0xf] }
 0x125   :  { %v4709_v56 = vor.u32 %v6358_v49, %v4708_v47  ;;  %v4897_v35 = vor.u32 %v6397_v30, %v4894_v31  ;;  %v6392_v38 = vld [vmem:[#allocation5 + $0x56c] sm:$0xf0]  ;;  %v4862_v47 = vld [vmem:[#allocation5 + $0x578] sm:$0xf0]  ;;  %v6356_v31 = vld [vmem:[#allocation5 + $0x454] sm:$0xf] }
 0x126   :  { %v4853_v49 = vor.u32 %v6392_v38, %v4852_v37  ;;  %v6360_v30 = vld [vmem:[#allocation5 + $0x46c] sm:$0xf0]  ;;  %v4734_v37 = vld [vmem:[#allocation5 + $0x478] sm:$0xf0] }
 0x12a   :  { %3425 = vmatpush.bf16.xpose.msra.mxu0 %v4805_v62  ;;  %3439 = vmatpush.bf16.xpose.msra.mxu1 %v4809_v0  ;;  %v6346_v62 = vld [vmem:[#allocation5 + $0x404] sm:$0xf]  ;;  %v4684_v0 = vld [vmem:[#allocation5 + $0x408] sm:$0xf] }
 0x12b   :  { %3453 = vmatpush.bf16.xpose.msra.mxu2 %v4813_v1  ;;  %v6351_v1 = vld [vmem:[#allocation5 + $0x424] sm:$0xf0]  ;;  %v4681_v13 = vor.u32 %v6346_v62, %v4678_v63 }
 0x12c   :  { %3467 = vmatpush.bf16.xpose.msra.mxu3 %v4817_v5  ;;  %v4916_v5 = vld [vmem:[#allocation5 + $0x5d0] sm:$0xf]  ;;  %v4685_v14 = vor.u32 %v6351_v1, %v4684_v0 }
 0x12d   :  { %v4917_v18 = vor.u32 %v6408_v7, %v4916_v5  ;;  %v4788_v1 = vld [vmem:[#allocation5 + $0x4d0] sm:$0xf]  ;;  %v4790_v5 = vld [vmem:[#allocation5 + $0x4f0] sm:$0xf0]  ;;  %v4796_v7 = vld [vmem:[#allocation5 + $0x4d8] sm:$0xf] }
 0x12e   :  { %v4789_v11 = vor.u32 %v6376_v2, %v4788_v1  ;;  %v4793_v12 = vor.u32 %v6372_v4, %v4790_v5  ;;  %v5166_v1 = vld [vmem:[#allocation5 + $0x7e8] sm:$0xf0]  ;;  %v583_v2 = vperm.slane %v6908_v48, 1  ;;  %v5126_v48 = vld [vmem:[#allocation5 + $0x7a0] sm:$0xf0] }
 0x132   :  { %3426 = vmatpush.bf16.xpose.msra.mxu0 %v4773_v22  ;;  %3440 = vmatpush.bf16.xpose.msra.mxu1 %v4777_v25  ;;  %v4929_v22 = vor.u32 %v6405_v15, %v4926_v16  ;;  %v6400_v25 = vld [vmem:[#allocation5 + $0x5ac] sm:$0xf0] }
 0x133   :  { %3454 = vmatpush.bf16.xpose.msra.mxu2 %v4781_v26  ;;  %v6396_v26 = vld [vmem:[#allocation5 + $0x594] sm:$0xf]  ;;  %v4885_v32 = vor.u32 %v6400_v25, %v4884_v24  ;;  %v4756_v15 = vld [vmem:[#allocation5 + $0x490] sm:$0xf]  ;;  %v4766_v24 = vld [vmem:[#allocation5 + $0x4b8] sm:$0xf0] }
 0x134   :  { %3468 = vmatpush.bf16.xpose.msra.mxu3 %v4785_v28  ;;  %v4892_v28 = vld [vmem:[#allocation5 + $0x598] sm:$0xf]  ;;  %v4889_v33 = vor.u32 %v6396_v26, %v4886_v27  ;;  %v6368_v16 = vld [vmem:[#allocation5 + $0x4ac] sm:$0xf0] }
 0x135   :  { %v4893_v34 = vor.u32 %v6401_v29, %v4892_v28  ;;  %v4757_v25 = vor.u32 %v6368_v16, %v4756_v15  ;;  %v4724_v29 = vld [vmem:[#allocation5 + $0x450] sm:$0xf]  ;;  %v6458_v15 = vld [vmem:[#allocation5 + $0x784] sm:$0xf]  ;;  %v5132_v16 = vld [vmem:[#allocation5 + $0x788] sm:$0xf] }
 0x136   :  { %v4725_v38 = vor.u32 %v6360_v30, %v4724_v29 }
 0x13a   :  { %3427 = vmatpush.bf16.xpose.msra.mxu0 %v4741_v42  ;;  %3441 = vmatpush.bf16.xpose.msra.mxu1 %v4745_v43  ;;  %v4854_v42 = vld [vmem:[#allocation5 + $0x570] sm:$0xf0]  ;;  %v4860_v43 = vld [vmem:[#allocation5 + $0x558] sm:$0xf] }
 0x13b   :  { %3455 = vmatpush.bf16.xpose.msra.mxu2 %v4749_v44  ;;  %v6393_v44 = vld [vmem:[#allocation5 + $0x574] sm:$0xf0]  ;;  %v4857_v50 = vor.u32 %v6388_v39, %v4854_v42 }
 0x13c   :  { %3469 = vmatpush.bf16.xpose.msra.mxu3 %v4753_v46  ;;  %v6389_v46 = vld [vmem:[#allocation5 + $0x55c] sm:$0xf]  ;;  %v4861_v51 = vor.u32 %v6393_v44, %v4860_v43  ;;  %v4692_v44 = vld [vmem:[#allocation5 + $0x410] sm:$0xf] }
 0x13d   :  { %v4865_v52 = vor.u32 %v6389_v46, %v4862_v47  ;;  %v6352_v46 = vld [vmem:[#allocation5 + $0x42c] sm:$0xf0]  ;;  %v6348_v47 = vld [vmem:[#allocation5 + $0x414] sm:$0xf] }
 0x142   :  { %3428 = vmatpush.bf16.xpose.msra.mxu0 %v4709_v56  ;;  %3442 = vmatpush.bf16.xpose.msra.mxu1 %v4713_v57  ;;  %v4822_v56 = vld [vmem:[#allocation5 + $0x530] sm:$0xf0]  ;;  %v4828_v57 = vld [vmem:[#allocation5 + $0x518] sm:$0xf] }
 0x143   :  { %3456 = vmatpush.bf16.xpose.msra.mxu2 %v4717_v58  ;;  %v6385_v58 = vld [vmem:[#allocation5 + $0x534] sm:$0xf0]  ;;  %v4825_v62 = vor.u32 %v6380_v55, %v4822_v56  ;;  %v6470_v55 = vld [vmem:[#allocation5 + $0x7dc] sm:$0xf0]  ;;  %v6466_v56 = vld [vmem:[#allocation5 + $0x7c4] sm:$0xf] }
 0x144   :  { %3470 = vmatpush.bf16.xpose.msra.mxu3 %v4721_v59  ;;  %v6381_v59 = vld [vmem:[#allocation5 + $0x51c] sm:$0xf]  ;;  %v4829_v63 = vor.u32 %v6385_v58, %v4828_v57  ;;  %v4693_v57 = vor.u32 %v6352_v46, %v4692_v44  ;;  %v5158_v58 = vld [vmem:[#allocation5 + $0x7e0] sm:$0xf0]  ;;  %v5102_v44 = vld [vmem:[#allocation5 + $0x768] sm:$0xf0] }
 0x145   :  { %v4833_v0 = vor.u32 %v6381_v59, %v4830_v60  ;;  %v5164_v59 = vld [vmem:[#allocation5 + $0x7c8] sm:$0xf] }
 0x146   :  { %v6471_v60 = vld [vmem:[#allocation5 + $0x7e4] sm:$0xf0] }
 0x14a   :  { %3429 = vmatpush.bf16.xpose.msra.mxu0 %v4677_v9  ;;  %3443 = vmatpush.bf16.xpose.msra.mxu1 %v4681_v13  ;;  %v6373_v9 = vld [vmem:[#allocation5 + $0x4dc] sm:$0xf]  ;;  %v4797_v13 = vor.u32 %v6377_v8, %v4796_v7  ;;  %v5157_v7 = vor.u32 %v6470_v55, %v5156_v54  ;;  %v5161_v8 = vor.u32 %v6466_v56, %v5158_v58  ;;  %v5060_v56 = vld [vmem:[#allocation5 + $0x700] sm:$0xf]  ;;  %v6442_v58 = vld [vmem:[#allocation5 + $0x704] sm:$0xf] }
 0x14b   :  { %3457 = vmatpush.bf16.xpose.msra.mxu2 %v4685_v14  ;;  %v4801_v14 = vor.u32 %v6373_v9, %v4798_v10  ;;  %v5165_v9 = vor.u32 %v6471_v60, %v5164_v59 }
 0x14c   :  { %3471 = vmatpush.bf16.xpose.msra.mxu3 %v4689_v17  ;;  %v6364_v17 = vld [vmem:[#allocation5 + $0x494] sm:$0xf] }
 0x14e   :  { %v3333_v4 = vpop.f32.mrf.mxu1 }
 0x151   :  { %3430 = vmatmul.bf16.vlgmr.msra.gmra.mxu0 %v6880_v3  ;;  %3444 = vmatmul.bf16.vlgmr.msra.gmra.mxu1 %v6886_v19 }
 0x152   :  { %3478 = vmatpush.bf16.xpose.msrb.mxu0 %v4917_v18  ;;  %3492 = vmatpush.bf16.xpose.msrb.mxu1 %v4921_v20  ;;  %v4758_v18 = vld [vmem:[#allocation5 + $0x4b0] sm:$0xf0]  ;;  %v4764_v20 = vld [vmem:[#allocation5 + $0x498] sm:$0xf] }
 0x153   :  { %3506 = vmatpush.bf16.xpose.msrb.mxu2 %v4925_v21  ;;  %3472 = vmatmul.bf16.vlgmr.msra.gmra.mxu3 %v6888_v23  ;;  %v6369_v21 = vld [vmem:[#allocation5 + $0x4b4] sm:$0xf0]  ;;  %v4761_v26 = vor.u32 %v6364_v17, %v4758_v18  ;;  %v6463_v17 = vld [vmem:[#allocation5 + $0x7a4] sm:$0xf0] }
 0x154   :  { %3520 = vmatpush.bf16.xpose.msrb.mxu3 %v4929_v22  ;;  %3458 = vmatmul.bf16.vlgmr.msra.gmra.mxu2 %v6882_v6  ;;  %v6365_v22 = vld [vmem:[#allocation5 + $0x49c] sm:$0xf]  ;;  %v4765_v27 = vor.u32 %v6369_v21, %v4764_v20  ;;  %v6459_v21 = vld [vmem:[#allocation5 + $0x78c] sm:$0xf] }
 0x155   :  { %v4769_v28 = vor.u32 %v6365_v22, %v4766_v24  ;;  %v5134_v22 = vld [vmem:[#allocation5 + $0x7a8] sm:$0xf0] }
 0x156   :  { %v3361_v18 = vpop.f32.mrf.mxu3  ;;  %v5137_v29 = vor.u32 %v6459_v21, %v5134_v22  ;;  %v6439_v21 = vld [vmem:[#allocation5 + $0x6e4] sm:$0xf0]  ;;  %v6435_v22 = vld [vmem:[#allocation5 + $0x6cc] sm:$0xf] }
 0x15a   :  { %3479 = vmatpush.bf16.xpose.msrb.mxu0 %v4885_v32  ;;  %3493 = vmatpush.bf16.xpose.msrb.mxu1 %v4889_v33  ;;  %v4726_v32 = vld [vmem:[#allocation5 + $0x470] sm:$0xf0]  ;;  %v4732_v33 = vld [vmem:[#allocation5 + $0x458] sm:$0xf] }
 0x15b   :  { %3507 = vmatpush.bf16.xpose.msrb.mxu2 %v4893_v34  ;;  %v6361_v34 = vld [vmem:[#allocation5 + $0x474] sm:$0xf0]  ;;  %v4729_v39 = vor.u32 %v6356_v31, %v4726_v32  ;;  %v5092_v31 = vld [vmem:[#allocation5 + $0x740] sm:$0xf] }
 0x15c   :  { %3521 = vmatpush.bf16.xpose.msrb.mxu3 %v4897_v35  ;;  %v6357_v35 = vld [vmem:[#allocation5 + $0x45c] sm:$0xf]  ;;  %v4733_v42 = vor.u32 %v6361_v34, %v4732_v33  ;;  %v6454_v32 = vld [vmem:[#allocation5 + $0x75c] sm:$0xf0]  ;;  %v6450_v33 = vld [vmem:[#allocation5 + $0x744] sm:$0xf] }
 0x15d   :  { %v4737_v43 = vor.u32 %v6357_v35, %v4734_v37  ;;  %v5094_v35 = vld [vmem:[#allocation5 + $0x760] sm:$0xf0]  ;;  %v5100_v37 = vld [vmem:[#allocation5 + $0x748] sm:$0xf]  ;;  %v5093_v46 = vor.u32 %v6454_v32, %v5092_v31 }
 0x162   :  { %3480 = vmatpush.bf16.xpose.msrb.mxu0 %v4853_v49  ;;  %3494 = vmatpush.bf16.xpose.msrb.mxu1 %v4857_v50  ;;  %v4694_v49 = vld [vmem:[#allocation5 + $0x430] sm:$0xf0]  ;;  %v4700_v50 = vld [vmem:[#allocation5 + $0x418] sm:$0xf] }
 0x163   :  { %3508 = vmatpush.bf16.xpose.msrb.mxu2 %v4861_v51  ;;  %v6353_v51 = vld [vmem:[#allocation5 + $0x434] sm:$0xf0] }
 0x164   :  { %3522 = vmatpush.bf16.xpose.msrb.mxu3 %v4865_v52  ;;  %v6349_v52 = vld [vmem:[#allocation5 + $0x41c] sm:$0xf] }
 0x165   :  { %v4705_v5 = vor.u32 %v6349_v52, %v4702_v53 }
 0x16a   :  { %3481 = vmatpush.bf16.xpose.msrb.mxu0 %v4821_v61  ;;  %3495 = vmatpush.bf16.xpose.msrb.mxu1 %v4825_v62  ;;  %v3319_v61 = vpop.f32.mrf.mxu0  ;;  %v4697_v62 = vor.u32 %v6348_v47, %v4694_v49  ;;  %v3363_v47 = vpop.f32.mrf.mxu3  ;;  %v5097_v49 = vor.u32 %v6450_v33, %v5094_v35  ;;  %v6430_v35 = vld [vmem:[#allocation5 + $0x69c] sm:$0xf0] }
 0x16b   :  { %3509 = vmatpush.bf16.xpose.msrb.mxu2 %v4829_v63  ;;  %v4701_v63 = vor.u32 %v6353_v51, %v4700_v50 }
 0x16c   :  { %3523 = vmatpush.bf16.xpose.msrb.mxu3 %v4833_v0  ;;  %v6467_v0 = vld [vmem:[#allocation5 + $0x7cc] sm:$0xf] }
 0x16d   :  { %v5169_v10 = vor.u32 %v6467_v0, %v5166_v1  ;;  %v6443_v0 = vld [vmem:[#allocation5 + $0x70c] sm:$0xf] }
 0x16e   :  { %v5070_v1 = vld [vmem:[#allocation5 + $0x728] sm:$0xf0] }
 0x172   :  { %3482 = vmatpush.bf16.xpose.msrb.mxu0 %v4789_v11  ;;  %3496 = vmatpush.bf16.xpose.msrb.mxu1 %v4793_v12  ;;  %v3320_v11 = vadd.f32 %v3319_v61, %v583_v2  ;;  %v3347_v12 = vpop.f32.mrf.mxu2  ;;  %v5062_v61 = vld [vmem:[#allocation5 + $0x720] sm:$0xf0] }
 0x173   :  { %3510 = vmatpush.bf16.xpose.msrb.mxu2 %v4797_v13  ;;  %v5124_v13 = vld [vmem:[#allocation5 + $0x780] sm:$0xf] }
 0x174   :  { %3524 = vmatpush.bf16.xpose.msrb.mxu3 %v4801_v14  ;;  %v6462_v14 = vld [vmem:[#allocation5 + $0x79c] sm:$0xf0]  ;;  %v3334_v20 = vadd.f32 %v3333_v4, %v3320_v11 }
 0x175   :  { %v5125_v24 = vor.u32 %v6462_v14, %v5124_v13 }
 0x176   :  { %v3348_v30 = vadd.f32 %v3347_v12, %v3334_v20  ;;  %v5036_v20 = vld [vmem:[#allocation5 + $0x6c8] sm:$0xf] }
 0x17a   :  { %3483 = vmatpush.bf16.xpose.msrb.mxu0 %v4757_v25  ;;  %3497 = vmatpush.bf16.xpose.msrb.mxu1 %v4761_v26  ;;  %v3321_v25 = vpop.f32.mrf.mxu0  ;;  %v5129_v26 = vor.u32 %v6458_v15, %v5126_v48  ;;  %v5028_v15 = vld [vmem:[#allocation5 + $0x6c0] sm:$0xf] }
 0x17b   :  { %3511 = vmatpush.bf16.xpose.msrb.mxu2 %v4765_v27  ;;  %v5133_v27 = vor.u32 %v6463_v17, %v5132_v16  ;;  %v3322_v34 = vadd.f32 %v3321_v25, %v583_v2  ;;  %v6438_v16 = vld [vmem:[#allocation5 + $0x6dc] sm:$0xf0]  ;;  %v6434_v17 = vld [vmem:[#allocation5 + $0x6c4] sm:$0xf] }
 0x17c   :  { %3525 = vmatpush.bf16.xpose.msrb.mxu3 %v4769_v28  ;;  %v3335_v28 = vpop.f32.mrf.mxu1 }
 0x17d   :  { %v3336_v51 = vadd.f32 %v3335_v28, %v3322_v34  ;;  %v4996_v34 = vld [vmem:[#allocation5 + $0x680] sm:$0xf] }
 0x182   :  { %3484 = vmatpush.bf16.xpose.msrb.mxu0 %v4725_v38  ;;  %3498 = vmatpush.bf16.xpose.msrb.mxu1 %v4729_v39  ;;  %v6455_v38 = vld [vmem:[#allocation5 + $0x764] sm:$0xf0]  ;;  %v3362_v39 = vadd.f32 %v3361_v18, %v3348_v30  ;;  %v5030_v18 = vld [vmem:[#allocation5 + $0x6e0] sm:$0xf0] }
 0x183   :  { %3512 = vmatpush.bf16.xpose.msrb.mxu2 %v4733_v42  ;;  %v3349_v42 = vpop.f32.mrf.mxu2  ;;  %v5101_v50 = vor.u32 %v6455_v38, %v5100_v37  ;;  %v5033_v28 = vor.u32 %v6434_v17, %v5030_v18  ;;  %v6426_v37 = vld [vmem:[#allocation5 + $0x684] sm:$0xf]  ;;  %v6469_v17 = vld [vmem:[#allocation5 + $0x7dc] sm:$0xf] }
 0x184   :  { %3526 = vmatpush.bf16.xpose.msrb.mxu3 %v4737_v43  ;;  %v6451_v43 = vld [vmem:[#allocation5 + $0x74c] sm:$0xf]  ;;  %v3350_v59 = vadd.f32 %v3349_v42, %v3336_v51  ;;  %v4998_v38 = vld [vmem:[#allocation5 + $0x6a0] sm:$0xf0]  ;;  %v6431_v42 = vld [vmem:[#allocation5 + $0x6a4] sm:$0xf0] }
 0x185   :  { %v5105_v52 = vor.u32 %v6451_v43, %v5102_v44  ;;  %v6427_v43 = vld [vmem:[#allocation5 + $0x68c] sm:$0xf]  ;;  %v4964_v51 = vld [vmem:[#allocation5 + $0x640] sm:$0xf]  ;;  %v5182_v18 = vld [vmem:[#allocation5 + $0x7f8] sm:$0xf0] }
 0x186   :  { %v5006_v44 = vld [vmem:[#allocation5 + $0x6a8] sm:$0xf0] }
 0x18a   :  { %3485 = vmatpush.bf16.xpose.msrb.mxu0 %v4693_v57  ;;  %3499 = vmatpush.bf16.xpose.msrb.mxu1 %v4697_v62  ;;  %v6446_v57 = vld [vmem:[#allocation5 + $0x71c] sm:$0xf0]  ;;  %v5068_v62 = vld [vmem:[#allocation5 + $0x708] sm:$0xf] }
 0x18b   :  { %3513 = vmatpush.bf16.xpose.msrb.mxu2 %v4701_v63  ;;  %v6447_v63 = vld [vmem:[#allocation5 + $0x724] sm:$0xf0]  ;;  %v5061_v2 = vor.u32 %v6446_v57, %v5060_v56  ;;  %v6419_v57 = vld [vmem:[#allocation5 + $0x64c] sm:$0xf] }
 0x18c   :  { %3527 = vmatpush.bf16.xpose.msrb.mxu3 %v4705_v5  ;;  %v5065_v5 = vor.u32 %v6442_v58, %v5062_v61  ;;  %v6423_v56 = vld [vmem:[#allocation5 + $0x664] sm:$0xf0]  ;;  %v4974_v58 = vld [vmem:[#allocation5 + $0x668] sm:$0xf0] }
 0x18e   :  { %v3375_v53 = vpop.f32.mrf.mxu0  ;;  %v3389_v55 = vpop.f32.mrf.mxu1 }
 0x18f   :  { %v3376_v54 = vadd.f32 %v3375_v53, %v3362_v39  ;;  %v5004_v39 = vld [vmem:[#allocation5 + $0x688] sm:$0xf]  ;;  %v6418_v53 = vld [vmem:[#allocation5 + $0x644] sm:$0xf] }
 0x191   :  { %3486 = vmatmul.bf16.vlgmr.msrb.gmra.mxu0 %v6892_v36  ;;  %3500 = vmatmul.bf16.vlgmr.msrb.gmra.mxu1 %v6896_v41  ;;  %v3390_v60 = vadd.f32 %v3389_v55, %v3376_v54  ;;  %v4966_v54 = vld [vmem:[#allocation5 + $0x660] sm:$0xf0]  ;;  %v4972_v55 = vld [vmem:[#allocation5 + $0x648] sm:$0xf] }
 0x192   :  { %3534 = vmatpush.bf16.xpose.msra.mxu0 %v5157_v7  ;;  %3548 = vmatpush.bf16.xpose.msra.mxu1 %v5161_v8  ;;  %v5069_v7 = vor.u32 %v6447_v63, %v5068_v62  ;;  %v3364_v8 = vadd.f32 %v3363_v47, %v3350_v59  ;;  %v5001_v47 = vor.u32 %v6426_v37, %v4998_v38  ;;  %v4932_v63 = vld [vmem:[#allocation5 + $0x600] sm:$0xf] }
 0x193   :  { %3562 = vmatpush.bf16.xpose.msra.mxu2 %v5165_v9  ;;  %3528 = vmatmul.bf16.vlgmr.msrb.gmra.mxu3 %v6898_v45  ;;  %v4973_v61 = vor.u32 %v6423_v56, %v4972_v55  ;;  %v4977_v62 = vor.u32 %v6419_v57, %v4974_v58  ;;  %v5076_v55 = vld [vmem:[#allocation5 + $0x710] sm:$0xf]  ;;  %v6444_v57 = vld [vmem:[#allocation5 + $0x714] sm:$0xf] }
 0x194   :  { %3576 = vmatpush.bf16.xpose.msra.mxu3 %v5169_v10  ;;  %3514 = vmatmul.bf16.vlgmr.msrb.gmra.mxu2 %v6894_v40  ;;  %v5073_v10 = vor.u32 %v6443_v0, %v5070_v1  ;;  %v6414_v0 = vld [vmem:[#allocation5 + $0x61c] sm:$0xf0]  ;;  %v6410_v1 = vld [vmem:[#allocation5 + $0x604] sm:$0xf]  ;;  %v6448_v56 = vld [vmem:[#allocation5 + $0x72c] sm:$0xf0] }
 0x195   :  { %v5078_v58 = vld [vmem:[#allocation5 + $0x730] sm:$0xf0] }
 0x196   :  { %v3377_v11 = vpop.f32.mrf.mxu0  ;;  %v3417_v12 = vpop.f32.mrf.mxu3 }
 0x197   :  { %v3403_v4 = vpop.f32.mrf.mxu2  ;;  %v3378_v13 = vadd.f32 %v3377_v11, %v3364_v8  ;;  %v3391_v48 = vpop.f32.mrf.mxu1  ;;  %v4942_v8 = vld [vmem:[#allocation5 + $0x628] sm:$0xf0]  ;;  %v6468_v11 = vld [vmem:[#allocation5 + $0x7d4] sm:$0xf] }
 0x198   :  { %v3404_v9 = vadd.f32 %v3403_v4, %v3390_v60  ;;  %v4969_v60 = vor.u32 %v6418_v53, %v4966_v54  ;;  %v4940_v4 = vld [vmem:[#allocation5 + $0x608] sm:$0xf] }
 0x199   :  { %v3392_v25 = vadd.f32 %v3391_v48, %v3378_v13  ;;  %v5174_v13 = vld [vmem:[#allocation5 + $0x7f0] sm:$0xf0] }
 0x19a   :  { %3535 = vmatpush.bf16.xpose.msra.mxu0 %v5125_v24  ;;  %3549 = vmatpush.bf16.xpose.msra.mxu1 %v5129_v26  ;;  %v3418_v14 = vadd.f32 %v3417_v12, %v3404_v9  ;;  %v5038_v24 = vld [vmem:[#allocation5 + $0x6e8] sm:$0xf0]  ;;  %v5029_v26 = vor.u32 %v6438_v16, %v5028_v15  ;;  %v5172_v9 = vld [vmem:[#allocation5 + $0x7d0] sm:$0xf]  ;;  %v4933_v12 = vor.u32 %v6414_v0, %v4932_v63  ;;  %v6473_v15 = vld [vmem:[#allocation5 + $0x7f4] sm:$0xf0] }
 0x19b   :  { %3563 = vmatpush.bf16.xpose.msra.mxu2 %v5133_v27  ;;  %v5041_v31 = vor.u32 %v6435_v22, %v5038_v24  ;;  %v5177_v22 = vor.u32 %v6468_v11, %v5174_v13  ;;  %v5077_v63 = vor.u32 %v6448_v56, %v5076_v55  ;;  %v5081_v0 = vor.u32 %v6444_v57, %v5078_v58  ;;  %v6437_v11 = vld [vmem:[#allocation5 + $0x6dc] sm:$0xf]  ;;  %v5412_v55 = vld [vmem:[#allocation5 + $0x9c0] sm:$0xf]  ;;  %v6530_v57 = vld [vmem:[#allocation5 + $0x9c4] sm:$0xf] }
 0x19c   :  { %3577 = vmatpush.bf16.xpose.msra.mxu3 %v5137_v29  ;;  %4095 = vst [vmem:[#allocation8 + $0x8] sm:$0xff] %v3418_v14  ;;  %v5037_v29 = vor.u32 %v6439_v21, %v5036_v20  ;;  %v5180_v14 = vld [vmem:[#allocation5 + $0x7d8] sm:$0xf]  ;;  %v6534_v56 = vld [vmem:[#allocation5 + $0x9dc] sm:$0xf0] }
 0x19d   :  { %v5181_v24 = vor.u32 %v6473_v15, %v5180_v14 }
 0x19e   :  { %v3419_v32 = vpop.f32.mrf.mxu3 }
 0x19f   :  { %v3405_v27 = vpop.f32.mrf.mxu2 }
 0x1a0   :  { %v3406_v30 = vadd.f32 %v3405_v27, %v3392_v25  ;;  %v5185_v25 = vor.u32 %v6469_v17, %v5182_v18  ;;  %v6464_v27 = vld [vmem:[#allocation5 + $0x7ac] sm:$0xf0]  ;;  %v6428_v18 = vld [vmem:[#allocation5 + $0x694] sm:$0xf] }
 0x1a1   :  { %v6432_v17 = vld [vmem:[#allocation5 + $0x6ac] sm:$0xf0] }
 0x1a2   :  { %3536 = vmatpush.bf16.xpose.msra.mxu0 %v5093_v46  ;;  %3550 = vmatpush.bf16.xpose.msra.mxu1 %v5097_v49  ;;  %v3420_v33 = vadd.f32 %v3419_v32, %v3406_v30  ;;  %v4997_v46 = vor.u32 %v6430_v35, %v4996_v34  ;;  %v5005_v49 = vor.u32 %v6431_v42, %v5004_v39  ;;  %v5148_v30 = vld [vmem:[#allocation5 + $0x798] sm:$0xf]  ;;  %v6461_v32 = vld [vmem:[#allocation5 + $0x79c] sm:$0xf]  ;;  %v5108_v39 = vld [vmem:[#allocation5 + $0x750] sm:$0xf] }
 0x1a3   :  { %3564 = vmatpush.bf16.xpose.msra.mxu2 %v5101_v50  ;;  %v5009_v50 = vor.u32 %v6427_v43, %v5006_v44  ;;  %v6456_v42 = vld [vmem:[#allocation5 + $0x76c] sm:$0xf0]  ;;  %v6452_v43 = vld [vmem:[#allocation5 + $0x754] sm:$0xf] }
 0x1a4   :  { %3578 = vmatpush.bf16.xpose.msra.mxu3 %v5105_v52  ;;  %4103 = vst [vmem:[#allocation8 + $0x48] sm:$0xff] %v3420_v33  ;;  %v6422_v52 = vld [vmem:[#allocation5 + $0x65c] sm:$0xf0]  ;;  %v5150_v33 = vld [vmem:[#allocation5 + $0x7b8] sm:$0xf0] }
 0x1a5   :  { %v4965_v59 = vor.u32 %v6422_v52, %v4964_v51  ;;  %v5153_v38 = vor.u32 %v6461_v32, %v5150_v33  ;;  %v5110_v44 = vld [vmem:[#allocation5 + $0x770] sm:$0xf0]  ;;  %v5109_v51 = vor.u32 %v6456_v42, %v5108_v39 }
 0x1a6   :  { %v5113_v52 = vor.u32 %v6452_v43, %v5110_v44  ;;  %v6420_v32 = vld [vmem:[#allocation5 + $0x654] sm:$0xf] }
 0x1a7   :  { %v4982_v33 = vld [vmem:[#allocation5 + $0x670] sm:$0xf0] }
 0x1a8   :  { %v4985_v42 = vor.u32 %v6420_v32, %v4982_v33  ;;  %v5348_v33 = vld [vmem:[#allocation5 + $0x940] sm:$0xf] }
 0x1aa   :  { %3537 = vmatpush.bf16.xpose.msra.mxu0 %v5061_v2  ;;  %3551 = vmatpush.bf16.xpose.msra.mxu1 %v5065_v5  ;;  %v4934_v2 = vld [vmem:[#allocation5 + $0x620] sm:$0xf0]  ;;  %v6415_v5 = vld [vmem:[#allocation5 + $0x624] sm:$0xf0] }
 0x1ab   :  { %3565 = vmatpush.bf16.xpose.msra.mxu2 %v5069_v7  ;;  %v6411_v7 = vld [vmem:[#allocation5 + $0x60c] sm:$0xf]  ;;  %v4937_v48 = vor.u32 %v6410_v1, %v4934_v2  ;;  %v4941_v16 = vor.u32 %v6415_v5, %v4940_v4  ;;  %v5044_v4 = vld [vmem:[#allocation5 + $0x6d0] sm:$0xf] }
 0x1ac   :  { %3579 = vmatpush.bf16.xpose.msra.mxu3 %v5073_v10  ;;  %v6472_v10 = vld [vmem:[#allocation5 + $0x7ec] sm:$0xf0]  ;;  %v4945_v20 = vor.u32 %v6411_v7, %v4942_v8  ;;  %v6436_v7 = vld [vmem:[#allocation5 + $0x6d4] sm:$0xf] }
 0x1ad   :  { %v5173_v21 = vor.u32 %v6472_v10, %v5172_v9  ;;  %v6440_v5 = vld [vmem:[#allocation5 + $0x6ec] sm:$0xf0]  ;;  %v5046_v8 = vld [vmem:[#allocation5 + $0x6f0] sm:$0xf0]  ;;  %v5052_v9 = vld [vmem:[#allocation5 + $0x6d8] sm:$0xf] }
 0x1ae   :  { %v6441_v10 = vld [vmem:[#allocation5 + $0x6f4] sm:$0xf0]  ;;  %v5045_v13 = vor.u32 %v6440_v5, %v5044_v4  ;;  %v5049_v14 = vor.u32 %v6436_v7, %v5046_v8  ;;  %v6928_v4 = vld [vmem:[#allocation7] sm:$0xff] }
 0x1af   :  { %v5053_v15 = vor.u32 %v6441_v10, %v5052_v9  ;;  %v584_v5 = vperm.slane %v6928_v4, 2  ;;  %v5413_v9 = vor.u32 %v6534_v56, %v5412_v55 }
 0x1b2   :  { %3538 = vmatpush.bf16.xpose.msra.mxu0 %v5029_v26  ;;  %3552 = vmatpush.bf16.xpose.msra.mxu1 %v5033_v28  ;;  %v5140_v26 = vld [vmem:[#allocation5 + $0x790] sm:$0xf]  ;;  %v6460_v28 = vld [vmem:[#allocation5 + $0x794] sm:$0xf] }
 0x1b3   :  { %3566 = vmatpush.bf16.xpose.msra.mxu2 %v5037_v29  ;;  %v5142_v29 = vld [vmem:[#allocation5 + $0x7b0] sm:$0xf0]  ;;  %v5141_v34 = vor.u32 %v6464_v27, %v5140_v26 }
 0x1b4   :  { %3580 = vmatpush.bf16.xpose.msra.mxu3 %v5041_v31  ;;  %v6465_v31 = vld [vmem:[#allocation5 + $0x7b4] sm:$0xf0]  ;;  %v5145_v35 = vor.u32 %v6460_v28, %v5142_v29 }
 0x1b5   :  { %v5149_v37 = vor.u32 %v6465_v31, %v5148_v30  ;;  %v4980_v30 = vld [vmem:[#allocation5 + $0x650] sm:$0xf] }
 0x1b6   :  { %v6424_v31 = vld [vmem:[#allocation5 + $0x66c] sm:$0xf0] }
 0x1b7   :  { %v4981_v39 = vor.u32 %v6424_v31, %v4980_v30 }
 0x1ba   :  { %3539 = vmatpush.bf16.xpose.msra.mxu0 %v4997_v46  ;;  %3553 = vmatpush.bf16.xpose.msra.mxu1 %v5001_v47  ;;  %v5116_v46 = vld [vmem:[#allocation5 + $0x758] sm:$0xf] }
 0x1bb   :  { %3567 = vmatpush.bf16.xpose.msra.mxu2 %v5005_v49  ;;  %v6457_v47 = vld [vmem:[#allocation5 + $0x774] sm:$0xf0]  ;;  %v6453_v49 = vld [vmem:[#allocation5 + $0x75c] sm:$0xf] }
 0x1bc   :  { %3581 = vmatpush.bf16.xpose.msra.mxu3 %v5009_v50  ;;  %v5118_v50 = vld [vmem:[#allocation5 + $0x778] sm:$0xf0]  ;;  %v5117_v53 = vor.u32 %v6457_v47, %v5116_v46  ;;  %v4948_v46 = vld [vmem:[#allocation5 + $0x610] sm:$0xf] }
 0x1bd   :  { %v5121_v54 = vor.u32 %v6453_v49, %v5118_v50  ;;  %v6416_v47 = vld [vmem:[#allocation5 + $0x62c] sm:$0xf0]  ;;  %v6412_v49 = vld [vmem:[#allocation5 + $0x614] sm:$0xf] }
 0x1be   :  { %v4950_v50 = vld [vmem:[#allocation5 + $0x630] sm:$0xf0]  ;;  %v4949_v58 = vor.u32 %v6416_v47, %v4948_v46  ;;  %v6515_v46 = vld [vmem:[#allocation5 + $0x94c] sm:$0xf] }
 0x1bf   :  { %v5358_v47 = vld [vmem:[#allocation5 + $0x968] sm:$0xf0] }
 0x1c2   :  { %3540 = vmatpush.bf16.xpose.msra.mxu0 %v4965_v59  ;;  %3554 = vmatpush.bf16.xpose.msra.mxu1 %v4969_v60  ;;  %v5084_v59 = vld [vmem:[#allocation5 + $0x718] sm:$0xf] }
 0x1c3   :  { %3568 = vmatpush.bf16.xpose.msra.mxu2 %v4973_v61  ;;  %v6449_v60 = vld [vmem:[#allocation5 + $0x734] sm:$0xf0]  ;;  %v6445_v61 = vld [vmem:[#allocation5 + $0x71c] sm:$0xf] }
 0x1c4   :  { %3582 = vmatpush.bf16.xpose.msra.mxu3 %v4977_v62  ;;  %v5086_v62 = vld [vmem:[#allocation5 + $0x738] sm:$0xf0]  ;;  %v5085_v1 = vor.u32 %v6449_v60, %v5084_v59  ;;  %v5414_v59 = vld [vmem:[#allocation5 + $0x9e0] sm:$0xf0]  ;;  %v5420_v60 = vld [vmem:[#allocation5 + $0x9c8] sm:$0xf] }
 0x1c5   :  { %v5089_v2 = vor.u32 %v6445_v61, %v5086_v62  ;;  %v6535_v61 = vld [vmem:[#allocation5 + $0x9e4] sm:$0xf0]  ;;  %v5417_v10 = vor.u32 %v6530_v57, %v5414_v59  ;;  %v6510_v59 = vld [vmem:[#allocation5 + $0x91c] sm:$0xf0] }
 0x1ca   :  { %3541 = vmatpush.bf16.xpose.msra.mxu0 %v4933_v12  ;;  %3555 = vmatpush.bf16.xpose.msra.mxu1 %v4937_v48  ;;  %v5054_v12 = vld [vmem:[#allocation5 + $0x6f8] sm:$0xf0] }
 0x1cb   :  { %3569 = vmatpush.bf16.xpose.msra.mxu2 %v4941_v16  ;;  %v5057_v48 = vor.u32 %v6437_v11, %v5054_v12  ;;  %v5012_v16 = vld [vmem:[#allocation5 + $0x690] sm:$0xf]  ;;  %v5421_v11 = vor.u32 %v6535_v61, %v5420_v60  ;;  %v6506_v60 = vld [vmem:[#allocation5 + $0x904] sm:$0xf] }
 0x1cc   :  { %3583 = vmatpush.bf16.xpose.msra.mxu3 %v4945_v20  ;;  %v5014_v20 = vld [vmem:[#allocation5 + $0x6b0] sm:$0xf0]  ;;  %v5013_v26 = vor.u32 %v6432_v17, %v5012_v16  ;;  %v6522_v16 = vld [vmem:[#allocation5 + $0x984] sm:$0xf] }
 0x1cd   :  { %v5017_v27 = vor.u32 %v6428_v18, %v5014_v20  ;;  %v5382_v17 = vld [vmem:[#allocation5 + $0x9a0] sm:$0xf0]  ;;  %v5388_v18 = vld [vmem:[#allocation5 + $0x988] sm:$0xf] }
 0x1ce   :  { %v3431_v62 = vpop.f32.mrf.mxu0  ;;  %v3445_v7 = vpop.f32.mrf.mxu1  ;;  %v6527_v20 = vld [vmem:[#allocation5 + $0x9a4] sm:$0xf0] }
 0x1d1   :  { %3542 = vmatmul.bf16.vlgmr.msra.gmra.mxu0 %v6880_v3  ;;  %3556 = vmatmul.bf16.vlgmr.msra.gmra.mxu1 %v6886_v19 }
 0x1d2   :  { %3590 = vmatpush.bf16.xpose.msrb.mxu0 %v5173_v21  ;;  %3604 = vmatpush.bf16.xpose.msrb.mxu1 %v5177_v22  ;;  %v5020_v21 = vld [vmem:[#allocation5 + $0x698] sm:$0xf] }
 0x1d3   :  { %3618 = vmatpush.bf16.xpose.msrb.mxu2 %v5181_v24  ;;  %3584 = vmatmul.bf16.vlgmr.msra.gmra.mxu3 %v6888_v23  ;;  %v6433_v22 = vld [vmem:[#allocation5 + $0x6b4] sm:$0xf0]  ;;  %v6429_v24 = vld [vmem:[#allocation5 + $0x69c] sm:$0xf] }
 0x1d4   :  { %3632 = vmatpush.bf16.xpose.msrb.mxu3 %v5185_v25  ;;  %3570 = vmatmul.bf16.vlgmr.msra.gmra.mxu2 %v6882_v6  ;;  %v5022_v25 = vld [vmem:[#allocation5 + $0x6b8] sm:$0xf0]  ;;  %v5021_v28 = vor.u32 %v6433_v22, %v5020_v21 }
 0x1d5   :  { %v5025_v29 = vor.u32 %v6429_v24, %v5022_v25  ;;  %v6523_v24 = vld [vmem:[#allocation5 + $0x98c] sm:$0xf] }
 0x1d6   :  { %v3473_v21 = vpop.f32.mrf.mxu3  ;;  %v5390_v25 = vld [vmem:[#allocation5 + $0x9a8] sm:$0xf0]  ;;  %v3447_v30 = vpop.f32.mrf.mxu1 }
 0x1d7   :  { %v5393_v31 = vor.u32 %v6523_v24, %v5390_v25  ;;  %v5292_v24 = vld [vmem:[#allocation5 + $0x8c8] sm:$0xf] }
 0x1d8   :  { %v6503_v25 = vld [vmem:[#allocation5 + $0x8e4] sm:$0xf0] }
 0x1da   :  { %3591 = vmatpush.bf16.xpose.msrb.mxu0 %v5141_v34  ;;  %3605 = vmatpush.bf16.xpose.msrb.mxu1 %v5145_v35  ;;  %v4988_v34 = vld [vmem:[#allocation5 + $0x658] sm:$0xf] }
 0x1db   :  { %3619 = vmatpush.bf16.xpose.msrb.mxu2 %v5149_v37  ;;  %v6425_v35 = vld [vmem:[#allocation5 + $0x674] sm:$0xf0]  ;;  %v6421_v37 = vld [vmem:[#allocation5 + $0x65c] sm:$0xf] }
 0x1dc   :  { %3633 = vmatpush.bf16.xpose.msrb.mxu3 %v5153_v38  ;;  %v4990_v38 = vld [vmem:[#allocation5 + $0x678] sm:$0xf0]  ;;  %v4989_v43 = vor.u32 %v6425_v35, %v4988_v34  ;;  %v6518_v34 = vld [vmem:[#allocation5 + $0x95c] sm:$0xf0]  ;;  %v6514_v35 = vld [vmem:[#allocation5 + $0x944] sm:$0xf] }
 0x1dd   :  { %v4993_v44 = vor.u32 %v6421_v37, %v4990_v38  ;;  %v5350_v38 = vld [vmem:[#allocation5 + $0x960] sm:$0xf0] }
 0x1e2   :  { %3592 = vmatpush.bf16.xpose.msrb.mxu0 %v5109_v51  ;;  %3606 = vmatpush.bf16.xpose.msrb.mxu1 %v5113_v52  ;;  %v4956_v51 = vld [vmem:[#allocation5 + $0x618] sm:$0xf] }
 0x1e3   :  { %3620 = vmatpush.bf16.xpose.msrb.mxu2 %v5117_v53  ;;  %v6417_v52 = vld [vmem:[#allocation5 + $0x634] sm:$0xf0]  ;;  %v6413_v53 = vld [vmem:[#allocation5 + $0x61c] sm:$0xf] }
 0x1e4   :  { %3634 = vmatpush.bf16.xpose.msrb.mxu3 %v5121_v54  ;;  %v4958_v54 = vld [vmem:[#allocation5 + $0x638] sm:$0xf0] }
 0x1e5   :  { %v4961_v8 = vor.u32 %v6413_v53, %v4958_v54  ;;  %v5361_v54 = vor.u32 %v6515_v46, %v5358_v47  ;;  %v6495_v46 = vld [vmem:[#allocation5 + $0x8a4] sm:$0xf0]  ;;  %v6491_v47 = vld [vmem:[#allocation5 + $0x88c] sm:$0xf] }
 0x1ea   :  { %3593 = vmatpush.bf16.xpose.msrb.mxu0 %v5077_v63  ;;  %3607 = vmatpush.bf16.xpose.msrb.mxu1 %v5081_v0  ;;  %v4953_v63 = vor.u32 %v6412_v49, %v4950_v50  ;;  %v4957_v0 = vor.u32 %v6417_v52, %v4956_v51  ;;  %v5349_v49 = vor.u32 %v6518_v34, %v5348_v33  ;;  %v3475_v50 = vpop.f32.mrf.mxu3 }
 0x1eb   :  { %3621 = vmatpush.bf16.xpose.msrb.mxu2 %v5085_v1  ;;  %v6531_v1 = vld [vmem:[#allocation5 + $0x9cc] sm:$0xf]  ;;  %v5353_v51 = vor.u32 %v6514_v35, %v5350_v38  ;;  %v5252_v38 = vld [vmem:[#allocation5 + $0x880] sm:$0xf] }
 0x1ec   :  { %3635 = vmatpush.bf16.xpose.msrb.mxu3 %v5089_v2  ;;  %v5422_v2 = vld [vmem:[#allocation5 + $0x9e8] sm:$0xf0] }
 0x1ed   :  { %v5425_v12 = vor.u32 %v6531_v1, %v5422_v2  ;;  %v6511_v1 = vld [vmem:[#allocation5 + $0x924] sm:$0xf0]  ;;  %v6507_v2 = vld [vmem:[#allocation5 + $0x90c] sm:$0xf] }
 0x1f2   :  { %3594 = vmatpush.bf16.xpose.msrb.mxu0 %v5045_v13  ;;  %3608 = vmatpush.bf16.xpose.msrb.mxu1 %v5049_v14  ;;  %v3432_v13 = vadd.f32 %v3431_v62, %v584_v5  ;;  %v3459_v14 = vpop.f32.mrf.mxu2 }
 0x1f3   :  { %3622 = vmatpush.bf16.xpose.msrb.mxu2 %v5053_v15  ;;  %v5380_v15 = vld [vmem:[#allocation5 + $0x980] sm:$0xf] }
 0x1f4   :  { %3636 = vmatpush.bf16.xpose.msrb.mxu3 %v5057_v48  ;;  %v6526_v48 = vld [vmem:[#allocation5 + $0x99c] sm:$0xf0]  ;;  %v3446_v22 = vadd.f32 %v3445_v7, %v3432_v13 }
 0x1f6   :  { %v3460_v32 = vadd.f32 %v3459_v14, %v3446_v22  ;;  %v5286_v22 = vld [vmem:[#allocation5 + $0x8e0] sm:$0xf0] }
 0x1fa   :  { %3595 = vmatpush.bf16.xpose.msrb.mxu0 %v5013_v26  ;;  %3609 = vmatpush.bf16.xpose.msrb.mxu1 %v5017_v27  ;;  %v5381_v26 = vor.u32 %v6526_v48, %v5380_v15  ;;  %v3433_v27 = vpop.f32.mrf.mxu0 }
 0x1fb   :  { %3623 = vmatpush.bf16.xpose.msrb.mxu2 %v5021_v28  ;;  %v5385_v28 = vor.u32 %v6522_v16, %v5382_v17  ;;  %v3434_v37 = vadd.f32 %v3433_v27, %v584_v5  ;;  %v5326_v5 = vld [vmem:[#allocation5 + $0x928] sm:$0xf0]  ;;  %v5284_v17 = vld [vmem:[#allocation5 + $0x8c0] sm:$0xf] }
 0x1fc   :  { %3637 = vmatpush.bf16.xpose.msrb.mxu3 %v5025_v29  ;;  %v5389_v29 = vor.u32 %v6527_v20, %v5388_v18  ;;  %v5329_v13 = vor.u32 %v6507_v2, %v5326_v5  ;;  %v6502_v20 = vld [vmem:[#allocation5 + $0x8dc] sm:$0xf0]  ;;  %v5294_v27 = vld [vmem:[#allocation5 + $0x8e8] sm:$0xf0] }
 0x1fd   :  { %v3448_v53 = vadd.f32 %v3447_v30, %v3434_v37  ;;  %v5188_v2 = vld [vmem:[#allocation5 + $0x800] sm:$0xf] }
 0x1fe   :  { %v6478_v5 = vld [vmem:[#allocation5 + $0x81c] sm:$0xf0] }
 0x202   :  { %3596 = vmatpush.bf16.xpose.msrb.mxu0 %v4981_v39  ;;  %3610 = vmatpush.bf16.xpose.msrb.mxu1 %v4985_v42  ;;  %v5356_v39 = vld [vmem:[#allocation5 + $0x948] sm:$0xf] }
 0x203   :  { %3624 = vmatpush.bf16.xpose.msrb.mxu2 %v4989_v43  ;;  %v6519_v42 = vld [vmem:[#allocation5 + $0x964] sm:$0xf0]  ;;  %v3474_v43 = vadd.f32 %v3473_v21, %v3460_v32  ;;  %v6498_v21 = vld [vmem:[#allocation5 + $0x8c4] sm:$0xf]  ;;  %v5293_v32 = vor.u32 %v6503_v25, %v5292_v24  ;;  %v5438_v24 = vld [vmem:[#allocation5 + $0x9f8] sm:$0xf0] }
 0x204   :  { %3638 = vmatpush.bf16.xpose.msrb.mxu3 %v4993_v44  ;;  %v3461_v44 = vpop.f32.mrf.mxu2  ;;  %v5357_v52 = vor.u32 %v6519_v42, %v5356_v39  ;;  %v6494_v39 = vld [vmem:[#allocation5 + $0x89c] sm:$0xf0]  ;;  %v6490_v42 = vld [vmem:[#allocation5 + $0x884] sm:$0xf] }
 0x205   :  { %v3462_v61 = vadd.f32 %v3461_v44, %v3448_v53  ;;  %v5260_v44 = vld [vmem:[#allocation5 + $0x888] sm:$0xf] }
 0x20a   :  { %3597 = vmatpush.bf16.xpose.msrb.mxu0 %v4949_v58  ;;  %3611 = vmatpush.bf16.xpose.msrb.mxu1 %v4953_v63  ;;  %v5316_v58 = vld [vmem:[#allocation5 + $0x900] sm:$0xf]  ;;  %v5318_v63 = vld [vmem:[#allocation5 + $0x920] sm:$0xf0] }
 0x20b   :  { %3625 = vmatpush.bf16.xpose.msrb.mxu2 %v4957_v0  ;;  %v5324_v0 = vld [vmem:[#allocation5 + $0x908] sm:$0xf]  ;;  %v5317_v7 = vor.u32 %v6510_v59, %v5316_v58 }
 0x20c   :  { %3639 = vmatpush.bf16.xpose.msrb.mxu3 %v4961_v8  ;;  %v5228_v58 = vld [vmem:[#allocation5 + $0x848] sm:$0xf] }
 0x20d   :  { %v6487_v59 = vld [vmem:[#allocation5 + $0x864] sm:$0xf0] }
 0x20e   :  { %v3487_v55 = vpop.f32.mrf.mxu0  ;;  %v3501_v57 = vpop.f32.mrf.mxu1 }
 0x20f   :  { %v3488_v56 = vadd.f32 %v3487_v55, %v3474_v43  ;;  %v5254_v43 = vld [vmem:[#allocation5 + $0x8a0] sm:$0xf0]  ;;  %v6486_v55 = vld [vmem:[#allocation5 + $0x85c] sm:$0xf0] }
 0x211   :  { %3598 = vmatmul.bf16.vlgmr.msrb.gmra.mxu0 %v6892_v36  ;;  %3612 = vmatmul.bf16.vlgmr.msrb.gmra.mxu1 %v6896_v41  ;;  %v3502_v62 = vadd.f32 %v3501_v57, %v3488_v56  ;;  %v6482_v56 = vld [vmem:[#allocation5 + $0x844] sm:$0xf] }
 0x212   :  { %3646 = vmatpush.bf16.xpose.msra.mxu0 %v5413_v9  ;;  %3660 = vmatpush.bf16.xpose.msra.mxu1 %v5417_v10  ;;  %v5321_v9 = vor.u32 %v6506_v60, %v5318_v63  ;;  %v5325_v10 = vor.u32 %v6511_v1, %v5324_v0  ;;  %v5222_v57 = vld [vmem:[#allocation5 + $0x860] sm:$0xf0]  ;;  %v6483_v60 = vld [vmem:[#allocation5 + $0x84c] sm:$0xf]  ;;  %v5229_v0 = vor.u32 %v6487_v59, %v5228_v58  ;;  %v5332_v59 = vld [vmem:[#allocation5 + $0x910] sm:$0xf] }
 0x213   :  { %3674 = vmatpush.bf16.xpose.msra.mxu2 %v5421_v11  ;;  %3640 = vmatmul.bf16.vlgmr.msrb.gmra.mxu3 %v6898_v45  ;;  %v3476_v11 = vadd.f32 %v3475_v50, %v3462_v61  ;;  %v5253_v50 = vor.u32 %v6494_v39, %v5252_v38  ;;  %v5230_v61 = vld [vmem:[#allocation5 + $0x868] sm:$0xf0]  ;;  %v5225_v63 = vor.u32 %v6482_v56, %v5222_v57  ;;  %v5406_v38 = vld [vmem:[#allocation5 + $0x9b8] sm:$0xf0] }
 0x214   :  { %3688 = vmatpush.bf16.xpose.msra.mxu3 %v5425_v12  ;;  %3626 = vmatmul.bf16.vlgmr.msrb.gmra.mxu2 %v6894_v40  ;;  %v5233_v1 = vor.u32 %v6483_v60, %v5230_v61  ;;  %v6512_v60 = vld [vmem:[#allocation5 + $0x92c] sm:$0xf0]  ;;  %v6508_v61 = vld [vmem:[#allocation5 + $0x914] sm:$0xf] }
 0x216   :  { %v3489_v14 = vpop.f32.mrf.mxu0  ;;  %v3529_v15 = vpop.f32.mrf.mxu3 }
 0x217   :  { %v3515_v8 = vpop.f32.mrf.mxu2  ;;  %v3490_v48 = vadd.f32 %v3489_v14, %v3476_v11  ;;  %v3503_v18 = vpop.f32.mrf.mxu1  ;;  %v6475_v11 = vld [vmem:[#allocation5 + $0x80c] sm:$0xf]  ;;  %v6536_v14 = vld [vmem:[#allocation5 + $0x9ec] sm:$0xf0] }
 0x218   :  { %v3516_v12 = vadd.f32 %v3515_v8, %v3502_v62  ;;  %v5190_v8 = vld [vmem:[#allocation5 + $0x820] sm:$0xf0] }
 0x21a   :  { %3647 = vmatpush.bf16.xpose.msra.mxu0 %v5381_v26  ;;  %3661 = vmatpush.bf16.xpose.msra.mxu1 %v5385_v28  ;;  %v3530_v16 = vadd.f32 %v3529_v15, %v3516_v12  ;;  %v6499_v26 = vld [vmem:[#allocation5 + $0x8cc] sm:$0xf]  ;;  %v3504_v28 = vadd.f32 %v3503_v18, %v3490_v48  ;;  %v6532_v15 = vld [vmem:[#allocation5 + $0x9d4] sm:$0xf]  ;;  %v5189_v48 = vor.u32 %v6478_v5, %v5188_v2  ;;  %v6537_v18 = vld [vmem:[#allocation5 + $0x9f4] sm:$0xf0] }
 0x21b   :  { %3675 = vmatpush.bf16.xpose.msra.mxu2 %v5389_v29  ;;  %v5285_v29 = vor.u32 %v6502_v20, %v5284_v17  ;;  %v5297_v34 = vor.u32 %v6499_v26, %v5294_v27  ;;  %v5198_v12 = vld [vmem:[#allocation5 + $0x828] sm:$0xf0]  ;;  %v5436_v17 = vld [vmem:[#allocation5 + $0x9d8] sm:$0xf]  ;;  %v5342_v2 = vld [vmem:[#allocation5 + $0x938] sm:$0xf0]  ;;  %v5333_v5 = vor.u32 %v6512_v60, %v5332_v59 }
 0x21c   :  { %3689 = vmatpush.bf16.xpose.msra.mxu3 %v5393_v31  ;;  %4096 = vst [vmem:[#allocation8 + $0x10] sm:$0xff] %v3530_v16  ;;  %v5289_v31 = vor.u32 %v6498_v21, %v5286_v22  ;;  %v5430_v16 = vld [vmem:[#allocation5 + $0x9f0] sm:$0xf0]  ;;  %v6533_v22 = vld [vmem:[#allocation5 + $0x9dc] sm:$0xf]  ;;  %v5201_v25 = vor.u32 %v6475_v11, %v5198_v12 }
 0x21d   :  { %v5433_v27 = vor.u32 %v6532_v15, %v5430_v16  ;;  %v6504_v11 = vld [vmem:[#allocation5 + $0x8ec] sm:$0xf0]  ;;  %v6500_v12 = vld [vmem:[#allocation5 + $0x8d4] sm:$0xf]  ;;  %v6505_v15 = vld [vmem:[#allocation5 + $0x8f4] sm:$0xf0] }
 0x21e   :  { %v3531_v35 = vpop.f32.mrf.mxu3  ;;  %v5310_v16 = vld [vmem:[#allocation5 + $0x8f8] sm:$0xf0]  ;;  %v5668_v60 = vld [vmem:[#allocation5 + $0xbc0] sm:$0xf] }
 0x21f   :  { %v3517_v30 = vpop.f32.mrf.mxu2  ;;  %v5214_v59 = vld [vmem:[#allocation5 + $0x838] sm:$0xf0] }
 0x220   :  { %v3518_v33 = vadd.f32 %v3517_v30, %v3504_v28  ;;  %v5437_v28 = vor.u32 %v6537_v18, %v5436_v17  ;;  %v5396_v30 = vld [vmem:[#allocation5 + $0x990] sm:$0xf] }
 0x222   :  { %3648 = vmatpush.bf16.xpose.msra.mxu0 %v5349_v49  ;;  %3662 = vmatpush.bf16.xpose.msra.mxu1 %v5353_v51  ;;  %v3532_v37 = vadd.f32 %v3531_v35, %v3518_v33  ;;  %v5262_v49 = vld [vmem:[#allocation5 + $0x8a8] sm:$0xf0]  ;;  %v5257_v51 = vor.u32 %v6490_v42, %v5254_v43  ;;  %v5398_v33 = vld [vmem:[#allocation5 + $0x9b0] sm:$0xf0]  ;;  %v6529_v35 = vld [vmem:[#allocation5 + $0x9b4] sm:$0xf0] }
 0x223   :  { %3676 = vmatpush.bf16.xpose.msra.mxu2 %v5357_v52  ;;  %v5261_v52 = vor.u32 %v6495_v46, %v5260_v44  ;;  %v5265_v53 = vor.u32 %v6491_v47, %v5262_v49  ;;  %v5364_v46 = vld [vmem:[#allocation5 + $0x950] sm:$0xf]  ;;  %v6516_v49 = vld [vmem:[#allocation5 + $0x954] sm:$0xf] }
 0x224   :  { %3690 = vmatpush.bf16.xpose.msra.mxu3 %v5361_v54  ;;  %4104 = vst [vmem:[#allocation8 + $0x50] sm:$0xff] %v3532_v37  ;;  %v5220_v54 = vld [vmem:[#allocation5 + $0x840] sm:$0xf]  ;;  %v6525_v37 = vld [vmem:[#allocation5 + $0x99c] sm:$0xf] }
 0x225   :  { %v5221_v62 = vor.u32 %v6486_v55, %v5220_v54  ;;  %v5409_v44 = vor.u32 %v6525_v37, %v5406_v38  ;;  %v6520_v47 = vld [vmem:[#allocation5 + $0x96c] sm:$0xf0]  ;;  %v5374_v54 = vld [vmem:[#allocation5 + $0x978] sm:$0xf0]  ;;  %v6484_v38 = vld [vmem:[#allocation5 + $0x854] sm:$0xf] }
 0x226   :  { %v5365_v55 = vor.u32 %v6520_v47, %v5364_v46  ;;  %v6488_v37 = vld [vmem:[#allocation5 + $0x86c] sm:$0xf0]  ;;  %v5246_v46 = vld [vmem:[#allocation5 + $0x878] sm:$0xf0] }
 0x22a   :  { %3649 = vmatpush.bf16.xpose.msra.mxu0 %v5317_v7  ;;  %3663 = vmatpush.bf16.xpose.msra.mxu1 %v5321_v9  ;;  %v6474_v7 = vld [vmem:[#allocation5 + $0x804] sm:$0xf]  ;;  %v5196_v9 = vld [vmem:[#allocation5 + $0x808] sm:$0xf] }
 0x22b   :  { %3677 = vmatpush.bf16.xpose.msra.mxu2 %v5325_v10  ;;  %v6479_v10 = vld [vmem:[#allocation5 + $0x824] sm:$0xf0]  ;;  %v5193_v20 = vor.u32 %v6474_v7, %v5190_v8 }
 0x22c   :  { %3691 = vmatpush.bf16.xpose.msra.mxu3 %v5329_v13  ;;  %v5428_v13 = vld [vmem:[#allocation5 + $0x9d0] sm:$0xf]  ;;  %v5197_v21 = vor.u32 %v6479_v10, %v5196_v9 }
 0x22d   :  { %v5429_v26 = vor.u32 %v6536_v14, %v5428_v13  ;;  %v5300_v10 = vld [vmem:[#allocation5 + $0x8d0] sm:$0xf]  ;;  %v5302_v13 = vld [vmem:[#allocation5 + $0x8f0] sm:$0xf0]  ;;  %v5308_v14 = vld [vmem:[#allocation5 + $0x8d8] sm:$0xf] }
 0x22e   :  { %v5301_v17 = vor.u32 %v6504_v11, %v5300_v10  ;;  %v5305_v18 = vor.u32 %v6500_v12, %v5302_v13  ;;  %v5678_v10 = vld [vmem:[#allocation5 + $0xbe8] sm:$0xf0]  ;;  %v585_v11 = vperm.slane %v6928_v4, 3  ;;  %v5638_v4 = vld [vmem:[#allocation5 + $0xba0] sm:$0xf0] }
 0x232   :  { %3650 = vmatpush.bf16.xpose.msra.mxu0 %v5285_v29  ;;  %3664 = vmatpush.bf16.xpose.msra.mxu1 %v5289_v31  ;;  %v5441_v29 = vor.u32 %v6533_v22, %v5438_v24  ;;  %v6528_v31 = vld [vmem:[#allocation5 + $0x9ac] sm:$0xf0] }
 0x233   :  { %3678 = vmatpush.bf16.xpose.msra.mxu2 %v5293_v32  ;;  %v6524_v32 = vld [vmem:[#allocation5 + $0x994] sm:$0xf]  ;;  %v5397_v39 = vor.u32 %v6528_v31, %v5396_v30  ;;  %v5268_v22 = vld [vmem:[#allocation5 + $0x890] sm:$0xf]  ;;  %v5278_v30 = vld [vmem:[#allocation5 + $0x8b8] sm:$0xf0] }
 0x234   :  { %3692 = vmatpush.bf16.xpose.msra.mxu3 %v5297_v34  ;;  %v5404_v34 = vld [vmem:[#allocation5 + $0x998] sm:$0xf]  ;;  %v5401_v42 = vor.u32 %v6524_v32, %v5398_v33  ;;  %v6496_v24 = vld [vmem:[#allocation5 + $0x8ac] sm:$0xf0] }
 0x235   :  { %v5405_v43 = vor.u32 %v6529_v35, %v5404_v34  ;;  %v5269_v31 = vor.u32 %v6496_v24, %v5268_v22  ;;  %v5236_v35 = vld [vmem:[#allocation5 + $0x850] sm:$0xf]  ;;  %v6586_v22 = vld [vmem:[#allocation5 + $0xb84] sm:$0xf]  ;;  %v5644_v24 = vld [vmem:[#allocation5 + $0xb88] sm:$0xf] }
 0x236   :  { %v5237_v47 = vor.u32 %v6488_v37, %v5236_v35 }
 0x23a   :  { %3651 = vmatpush.bf16.xpose.msra.mxu0 %v5253_v50  ;;  %3665 = vmatpush.bf16.xpose.msra.mxu1 %v5257_v51  ;;  %v5366_v50 = vld [vmem:[#allocation5 + $0x970] sm:$0xf0]  ;;  %v5372_v51 = vld [vmem:[#allocation5 + $0x958] sm:$0xf] }
 0x23b   :  { %3679 = vmatpush.bf16.xpose.msra.mxu2 %v5261_v52  ;;  %v6521_v52 = vld [vmem:[#allocation5 + $0x974] sm:$0xf0]  ;;  %v5369_v56 = vor.u32 %v6516_v49, %v5366_v50 }
 0x23c   :  { %3693 = vmatpush.bf16.xpose.msra.mxu3 %v5265_v53  ;;  %v6517_v53 = vld [vmem:[#allocation5 + $0x95c] sm:$0xf]  ;;  %v5373_v57 = vor.u32 %v6521_v52, %v5372_v51  ;;  %v5204_v52 = vld [vmem:[#allocation5 + $0x810] sm:$0xf] }
 0x23d   :  { %v5377_v58 = vor.u32 %v6517_v53, %v5374_v54  ;;  %v6480_v53 = vld [vmem:[#allocation5 + $0x82c] sm:$0xf0]  ;;  %v6476_v54 = vld [vmem:[#allocation5 + $0x814] sm:$0xf] }
 0x242   :  { %3652 = vmatpush.bf16.xpose.msra.mxu0 %v5221_v62  ;;  %3666 = vmatpush.bf16.xpose.msra.mxu1 %v5225_v63  ;;  %v5334_v62 = vld [vmem:[#allocation5 + $0x930] sm:$0xf0]  ;;  %v5340_v63 = vld [vmem:[#allocation5 + $0x918] sm:$0xf] }
 0x243   :  { %3680 = vmatpush.bf16.xpose.msra.mxu2 %v5229_v0  ;;  %v6513_v0 = vld [vmem:[#allocation5 + $0x934] sm:$0xf0]  ;;  %v5337_v7 = vor.u32 %v6508_v61, %v5334_v62  ;;  %v6598_v61 = vld [vmem:[#allocation5 + $0xbdc] sm:$0xf0]  ;;  %v6594_v62 = vld [vmem:[#allocation5 + $0xbc4] sm:$0xf] }
 0x244   :  { %3694 = vmatpush.bf16.xpose.msra.mxu3 %v5233_v1  ;;  %v6509_v1 = vld [vmem:[#allocation5 + $0x91c] sm:$0xf]  ;;  %v5341_v8 = vor.u32 %v6513_v0, %v5340_v63  ;;  %v5205_v63 = vor.u32 %v6480_v53, %v5204_v52  ;;  %v5670_v0 = vld [vmem:[#allocation5 + $0xbe0] sm:$0xf0]  ;;  %v5614_v52 = vld [vmem:[#allocation5 + $0xb68] sm:$0xf0] }
 0x245   :  { %v5345_v9 = vor.u32 %v6509_v1, %v5342_v2  ;;  %v5676_v1 = vld [vmem:[#allocation5 + $0xbc8] sm:$0xf] }
 0x246   :  { %v6599_v2 = vld [vmem:[#allocation5 + $0xbe4] sm:$0xf0] }
 0x24a   :  { %3653 = vmatpush.bf16.xpose.msra.mxu0 %v5189_v48  ;;  %3667 = vmatpush.bf16.xpose.msra.mxu1 %v5193_v20  ;;  %v6501_v48 = vld [vmem:[#allocation5 + $0x8dc] sm:$0xf]  ;;  %v5309_v20 = vor.u32 %v6505_v15, %v5308_v14  ;;  %v5669_v14 = vor.u32 %v6598_v61, %v5668_v60  ;;  %v5673_v15 = vor.u32 %v6594_v62, %v5670_v0  ;;  %v5572_v62 = vld [vmem:[#allocation5 + $0xb00] sm:$0xf]  ;;  %v6570_v0 = vld [vmem:[#allocation5 + $0xb04] sm:$0xf] }
 0x24b   :  { %3681 = vmatpush.bf16.xpose.msra.mxu2 %v5197_v21  ;;  %v5313_v21 = vor.u32 %v6501_v48, %v5310_v16  ;;  %v5677_v48 = vor.u32 %v6599_v2, %v5676_v1 }
 0x24c   :  { %3695 = vmatpush.bf16.xpose.msra.mxu3 %v5201_v25  ;;  %v6492_v25 = vld [vmem:[#allocation5 + $0x894] sm:$0xf] }
 0x24e   :  { %v3557_v12 = vpop.f32.mrf.mxu1 }
 0x251   :  { %3654 = vmatmul.bf16.vlgmr.msra.gmra.mxu0 %v6880_v3  ;;  %3668 = vmatmul.bf16.vlgmr.msra.gmra.mxu1 %v6886_v19 }
 0x252   :  { %3702 = vmatpush.bf16.xpose.msrb.mxu0 %v5429_v26  ;;  %3716 = vmatpush.bf16.xpose.msrb.mxu1 %v5433_v27  ;;  %v5270_v26 = vld [vmem:[#allocation5 + $0x8b0] sm:$0xf0]  ;;  %v5276_v27 = vld [vmem:[#allocation5 + $0x898] sm:$0xf] }
 0x253   :  { %3730 = vmatpush.bf16.xpose.msrb.mxu2 %v5437_v28  ;;  %3696 = vmatmul.bf16.vlgmr.msra.gmra.mxu3 %v6888_v23  ;;  %v6497_v28 = vld [vmem:[#allocation5 + $0x8b4] sm:$0xf0]  ;;  %v5273_v32 = vor.u32 %v6492_v25, %v5270_v26  ;;  %v6591_v25 = vld [vmem:[#allocation5 + $0xba4] sm:$0xf0] }
 0x254   :  { %3744 = vmatpush.bf16.xpose.msrb.mxu3 %v5441_v29  ;;  %3682 = vmatmul.bf16.vlgmr.msra.gmra.mxu2 %v6882_v6  ;;  %v6493_v29 = vld [vmem:[#allocation5 + $0x89c] sm:$0xf]  ;;  %v5277_v33 = vor.u32 %v6497_v28, %v5276_v27  ;;  %v6587_v28 = vld [vmem:[#allocation5 + $0xb8c] sm:$0xf] }
 0x255   :  { %v5281_v34 = vor.u32 %v6493_v29, %v5278_v30  ;;  %v5646_v29 = vld [vmem:[#allocation5 + $0xba8] sm:$0xf0] }
 0x256   :  { %v3585_v26 = vpop.f32.mrf.mxu3  ;;  %v5649_v35 = vor.u32 %v6587_v28, %v5646_v29  ;;  %v6567_v28 = vld [vmem:[#allocation5 + $0xae4] sm:$0xf0]  ;;  %v6563_v29 = vld [vmem:[#allocation5 + $0xacc] sm:$0xf] }
 0x25a   :  { %3703 = vmatpush.bf16.xpose.msrb.mxu0 %v5397_v39  ;;  %3717 = vmatpush.bf16.xpose.msrb.mxu1 %v5401_v42  ;;  %v5238_v39 = vld [vmem:[#allocation5 + $0x870] sm:$0xf0]  ;;  %v5244_v42 = vld [vmem:[#allocation5 + $0x858] sm:$0xf] }
 0x25b   :  { %3731 = vmatpush.bf16.xpose.msrb.mxu2 %v5405_v43  ;;  %v6489_v43 = vld [vmem:[#allocation5 + $0x874] sm:$0xf0]  ;;  %v5241_v49 = vor.u32 %v6484_v38, %v5238_v39  ;;  %v5604_v38 = vld [vmem:[#allocation5 + $0xb40] sm:$0xf] }
 0x25c   :  { %3745 = vmatpush.bf16.xpose.msrb.mxu3 %v5409_v44  ;;  %v6485_v44 = vld [vmem:[#allocation5 + $0x85c] sm:$0xf]  ;;  %v5245_v50 = vor.u32 %v6489_v43, %v5244_v42  ;;  %v6582_v39 = vld [vmem:[#allocation5 + $0xb5c] sm:$0xf0]  ;;  %v6578_v42 = vld [vmem:[#allocation5 + $0xb44] sm:$0xf] }
 0x25d   :  { %v5249_v51 = vor.u32 %v6485_v44, %v5246_v46  ;;  %v5606_v44 = vld [vmem:[#allocation5 + $0xb60] sm:$0xf0]  ;;  %v5612_v46 = vld [vmem:[#allocation5 + $0xb48] sm:$0xf]  ;;  %v5605_v53 = vor.u32 %v6582_v39, %v5604_v38 }
 0x262   :  { %3704 = vmatpush.bf16.xpose.msrb.mxu0 %v5365_v55  ;;  %3718 = vmatpush.bf16.xpose.msrb.mxu1 %v5369_v56  ;;  %v5206_v55 = vld [vmem:[#allocation5 + $0x830] sm:$0xf0]  ;;  %v5212_v56 = vld [vmem:[#allocation5 + $0x818] sm:$0xf] }
 0x263   :  { %3732 = vmatpush.bf16.xpose.msrb.mxu2 %v5373_v57  ;;  %v6481_v57 = vld [vmem:[#allocation5 + $0x834] sm:$0xf0] }
 0x264   :  { %3746 = vmatpush.bf16.xpose.msrb.mxu3 %v5377_v58  ;;  %v6477_v58 = vld [vmem:[#allocation5 + $0x81c] sm:$0xf] }
 0x265   :  { %v5217_v13 = vor.u32 %v6477_v58, %v5214_v59 }
 0x26a   :  { %3705 = vmatpush.bf16.xpose.msrb.mxu0 %v5333_v5  ;;  %3719 = vmatpush.bf16.xpose.msrb.mxu1 %v5337_v7  ;;  %v3543_v5 = vpop.f32.mrf.mxu0  ;;  %v5209_v7 = vor.u32 %v6476_v54, %v5206_v55  ;;  %v3587_v54 = vpop.f32.mrf.mxu3  ;;  %v5609_v55 = vor.u32 %v6578_v42, %v5606_v44  ;;  %v6558_v44 = vld [vmem:[#allocation5 + $0xa9c] sm:$0xf0] }
 0x26b   :  { %3733 = vmatpush.bf16.xpose.msrb.mxu2 %v5341_v8  ;;  %v5213_v8 = vor.u32 %v6481_v57, %v5212_v56 }
 0x26c   :  { %3747 = vmatpush.bf16.xpose.msrb.mxu3 %v5345_v9  ;;  %v6595_v9 = vld [vmem:[#allocation5 + $0xbcc] sm:$0xf] }
 0x26d   :  { %v5681_v16 = vor.u32 %v6595_v9, %v5678_v10  ;;  %v6571_v9 = vld [vmem:[#allocation5 + $0xb0c] sm:$0xf] }
 0x26e   :  { %v5582_v10 = vld [vmem:[#allocation5 + $0xb28] sm:$0xf0] }
 0x272   :  { %3706 = vmatpush.bf16.xpose.msrb.mxu0 %v5301_v17  ;;  %3720 = vmatpush.bf16.xpose.msrb.mxu1 %v5305_v18  ;;  %v3544_v17 = vadd.f32 %v3543_v5, %v585_v11  ;;  %v3571_v18 = vpop.f32.mrf.mxu2  ;;  %v5574_v5 = vld [vmem:[#allocation5 + $0xb20] sm:$0xf0] }
 0x273   :  { %3734 = vmatpush.bf16.xpose.msrb.mxu2 %v5309_v20  ;;  %v5636_v20 = vld [vmem:[#allocation5 + $0xb80] sm:$0xf] }
 0x274   :  { %3748 = vmatpush.bf16.xpose.msrb.mxu3 %v5313_v21  ;;  %v6590_v21 = vld [vmem:[#allocation5 + $0xb9c] sm:$0xf0]  ;;  %v3558_v27 = vadd.f32 %v3557_v12, %v3544_v17 }
 0x275   :  { %v5637_v30 = vor.u32 %v6590_v21, %v5636_v20 }
 0x276   :  { %v3572_v37 = vadd.f32 %v3571_v18, %v3558_v27  ;;  %v5548_v27 = vld [vmem:[#allocation5 + $0xac8] sm:$0xf] }
 0x27a   :  { %3707 = vmatpush.bf16.xpose.msrb.mxu0 %v5269_v31  ;;  %3721 = vmatpush.bf16.xpose.msrb.mxu1 %v5273_v32  ;;  %v3545_v31 = vpop.f32.mrf.mxu0  ;;  %v5641_v32 = vor.u32 %v6586_v22, %v5638_v4  ;;  %v5540_v22 = vld [vmem:[#allocation5 + $0xac0] sm:$0xf] }
 0x27b   :  { %3735 = vmatpush.bf16.xpose.msrb.mxu2 %v5277_v33  ;;  %v5645_v33 = vor.u32 %v6591_v25, %v5644_v24  ;;  %v3546_v43 = vadd.f32 %v3545_v31, %v585_v11  ;;  %v6566_v24 = vld [vmem:[#allocation5 + $0xadc] sm:$0xf0]  ;;  %v6562_v25 = vld [vmem:[#allocation5 + $0xac4] sm:$0xf] }
 0x27c   :  { %3749 = vmatpush.bf16.xpose.msrb.mxu3 %v5281_v34  ;;  %v3559_v34 = vpop.f32.mrf.mxu1 }
 0x27d   :  { %v3560_v57 = vadd.f32 %v3559_v34, %v3546_v43  ;;  %v5508_v43 = vld [vmem:[#allocation5 + $0xa80] sm:$0xf] }
 0x282   :  { %3708 = vmatpush.bf16.xpose.msrb.mxu0 %v5237_v47  ;;  %3722 = vmatpush.bf16.xpose.msrb.mxu1 %v5241_v49  ;;  %v6583_v47 = vld [vmem:[#allocation5 + $0xb64] sm:$0xf0]  ;;  %v3586_v49 = vadd.f32 %v3585_v26, %v3572_v37  ;;  %v5542_v26 = vld [vmem:[#allocation5 + $0xae0] sm:$0xf0] }
 0x283   :  { %3736 = vmatpush.bf16.xpose.msrb.mxu2 %v5245_v50  ;;  %v3573_v50 = vpop.f32.mrf.mxu2  ;;  %v5613_v56 = vor.u32 %v6583_v47, %v5612_v46  ;;  %v5545_v34 = vor.u32 %v6562_v25, %v5542_v26  ;;  %v6554_v46 = vld [vmem:[#allocation5 + $0xa84] sm:$0xf]  ;;  %v6597_v25 = vld [vmem:[#allocation5 + $0xbdc] sm:$0xf] }
 0x284   :  { %3750 = vmatpush.bf16.xpose.msrb.mxu3 %v5249_v51  ;;  %v6579_v51 = vld [vmem:[#allocation5 + $0xb4c] sm:$0xf]  ;;  %v3574_v1 = vadd.f32 %v3573_v50, %v3560_v57  ;;  %v5510_v47 = vld [vmem:[#allocation5 + $0xaa0] sm:$0xf0]  ;;  %v6559_v50 = vld [vmem:[#allocation5 + $0xaa4] sm:$0xf0] }
 0x285   :  { %v5617_v58 = vor.u32 %v6579_v51, %v5614_v52  ;;  %v6555_v51 = vld [vmem:[#allocation5 + $0xa8c] sm:$0xf]  ;;  %v5476_v57 = vld [vmem:[#allocation5 + $0xa40] sm:$0xf]  ;;  %v5694_v26 = vld [vmem:[#allocation5 + $0xbf8] sm:$0xf0] }
 0x286   :  { %v5518_v52 = vld [vmem:[#allocation5 + $0xaa8] sm:$0xf0] }
 0x28a   :  { %3709 = vmatpush.bf16.xpose.msrb.mxu0 %v5205_v63  ;;  %3723 = vmatpush.bf16.xpose.msrb.mxu1 %v5209_v7  ;;  %v6574_v63 = vld [vmem:[#allocation5 + $0xb1c] sm:$0xf0]  ;;  %v5580_v7 = vld [vmem:[#allocation5 + $0xb08] sm:$0xf] }
 0x28b   :  { %3737 = vmatpush.bf16.xpose.msrb.mxu2 %v5213_v8  ;;  %v6575_v8 = vld [vmem:[#allocation5 + $0xb24] sm:$0xf0]  ;;  %v5573_v11 = vor.u32 %v6574_v63, %v5572_v62  ;;  %v6547_v63 = vld [vmem:[#allocation5 + $0xa4c] sm:$0xf] }
 0x28c   :  { %3751 = vmatpush.bf16.xpose.msrb.mxu3 %v5217_v13  ;;  %v5577_v13 = vor.u32 %v6570_v0, %v5574_v5  ;;  %v6551_v62 = vld [vmem:[#allocation5 + $0xa64] sm:$0xf0]  ;;  %v5486_v0 = vld [vmem:[#allocation5 + $0xa68] sm:$0xf0] }
 0x28e   :  { %v3599_v59 = vpop.f32.mrf.mxu0  ;;  %v3613_v61 = vpop.f32.mrf.mxu1 }
 0x28f   :  { %v3600_v60 = vadd.f32 %v3599_v59, %v3586_v49  ;;  %v5516_v49 = vld [vmem:[#allocation5 + $0xa88] sm:$0xf]  ;;  %v6546_v59 = vld [vmem:[#allocation5 + $0xa44] sm:$0xf] }
 0x291   :  { %3710 = vmatmul.bf16.vlgmr.msrb.gmra.mxu0 %v6892_v36  ;;  %3724 = vmatmul.bf16.vlgmr.msrb.gmra.mxu1 %v6896_v41  ;;  %v3614_v2 = vadd.f32 %v3613_v61, %v3600_v60  ;;  %v5478_v60 = vld [vmem:[#allocation5 + $0xa60] sm:$0xf0]  ;;  %v5484_v61 = vld [vmem:[#allocation5 + $0xa48] sm:$0xf] }
 0x292   :  { %3758 = vmatpush.bf16.xpose.msra.mxu0 %v5669_v14  ;;  %3772 = vmatpush.bf16.xpose.msra.mxu1 %v5673_v15  ;;  %v5581_v14 = vor.u32 %v6575_v8, %v5580_v7  ;;  %v3588_v15 = vadd.f32 %v3587_v54, %v3574_v1  ;;  %v5513_v54 = vor.u32 %v6554_v46, %v5510_v47  ;;  %v5444_v8 = vld [vmem:[#allocation5 + $0xa00] sm:$0xf] }
 0x293   :  { %3786 = vmatpush.bf16.xpose.msra.mxu2 %v5677_v48  ;;  %3752 = vmatmul.bf16.vlgmr.msrb.gmra.mxu3 %v6898_v45  ;;  %v5485_v5 = vor.u32 %v6551_v62, %v5484_v61  ;;  %v5489_v7 = vor.u32 %v6547_v63, %v5486_v0  ;;  %v5588_v61 = vld [vmem:[#allocation5 + $0xb10] sm:$0xf]  ;;  %v6572_v63 = vld [vmem:[#allocation5 + $0xb14] sm:$0xf] }
 0x294   :  { %3800 = vmatpush.bf16.xpose.msra.mxu3 %v5681_v16  ;;  %3738 = vmatmul.bf16.vlgmr.msrb.gmra.mxu2 %v6894_v40  ;;  %v5585_v16 = vor.u32 %v6571_v9, %v5582_v10  ;;  %v6542_v9 = vld [vmem:[#allocation5 + $0xa1c] sm:$0xf0]  ;;  %v6538_v10 = vld [vmem:[#allocation5 + $0xa04] sm:$0xf]  ;;  %v6576_v62 = vld [vmem:[#allocation5 + $0xb2c] sm:$0xf0] }
 0x295   :  { %v5590_v0 = vld [vmem:[#allocation5 + $0xb30] sm:$0xf0] }
 0x296   :  { %v3601_v17 = vpop.f32.mrf.mxu0  ;;  %v3641_v18 = vpop.f32.mrf.mxu3 }
 0x297   :  { %v3627_v12 = vpop.f32.mrf.mxu2  ;;  %v3602_v20 = vadd.f32 %v3601_v17, %v3588_v15  ;;  %v3615_v4 = vpop.f32.mrf.mxu1  ;;  %v5454_v15 = vld [vmem:[#allocation5 + $0xa28] sm:$0xf0]  ;;  %v6596_v17 = vld [vmem:[#allocation5 + $0xbd4] sm:$0xf] }
 0x298   :  { %v3628_v48 = vadd.f32 %v3627_v12, %v3614_v2  ;;  %v5481_v2 = vor.u32 %v6546_v59, %v5478_v60  ;;  %v5452_v12 = vld [vmem:[#allocation5 + $0xa08] sm:$0xf] }
 0x299   :  { %v3616_v31 = vadd.f32 %v3615_v4, %v3602_v20  ;;  %v5686_v20 = vld [vmem:[#allocation5 + $0xbf0] sm:$0xf0] }
 0x29a   :  { %3759 = vmatpush.bf16.xpose.msra.mxu0 %v5637_v30  ;;  %3773 = vmatpush.bf16.xpose.msra.mxu1 %v5641_v32  ;;  %v3642_v21 = vadd.f32 %v3641_v18, %v3628_v48  ;;  %v5550_v30 = vld [vmem:[#allocation5 + $0xae8] sm:$0xf0]  ;;  %v5541_v32 = vor.u32 %v6566_v24, %v5540_v22  ;;  %v5684_v48 = vld [vmem:[#allocation5 + $0xbd0] sm:$0xf]  ;;  %v5445_v18 = vor.u32 %v6542_v9, %v5444_v8  ;;  %v6601_v22 = vld [vmem:[#allocation5 + $0xbf4] sm:$0xf0] }
 0x29b   :  { %3787 = vmatpush.bf16.xpose.msra.mxu2 %v5645_v33  ;;  %v5553_v38 = vor.u32 %v6563_v29, %v5550_v30  ;;  %v5689_v29 = vor.u32 %v6596_v17, %v5686_v20  ;;  %v5589_v8 = vor.u32 %v6576_v62, %v5588_v61  ;;  %v5593_v9 = vor.u32 %v6572_v63, %v5590_v0  ;;  %v6565_v17 = vld [vmem:[#allocation5 + $0xadc] sm:$0xf]  ;;  %v5924_v61 = vld [vmem:[#allocation5 + $0xdc0] sm:$0xf]  ;;  %v6658_v63 = vld [vmem:[#allocation5 + $0xdc4] sm:$0xf] }
 0x29c   :  { %3801 = vmatpush.bf16.xpose.msra.mxu3 %v5649_v35  ;;  %4097 = vst [vmem:[#allocation8 + $0x18] sm:$0xff] %v3642_v21  ;;  %v5549_v35 = vor.u32 %v6567_v28, %v5548_v27  ;;  %v5692_v21 = vld [vmem:[#allocation5 + $0xbd8] sm:$0xf]  ;;  %v6662_v62 = vld [vmem:[#allocation5 + $0xddc] sm:$0xf0] }
 0x29d   :  { %v5693_v30 = vor.u32 %v6601_v22, %v5692_v21 }
 0x29e   :  { %v3643_v39 = vpop.f32.mrf.mxu3 }
 0x29f   :  { %v3629_v33 = vpop.f32.mrf.mxu2 }
 0x2a0   :  { %v3630_v37 = vadd.f32 %v3629_v33, %v3616_v31  ;;  %v5697_v31 = vor.u32 %v6597_v25, %v5694_v26  ;;  %v6592_v33 = vld [vmem:[#allocation5 + $0xbac] sm:$0xf0]  ;;  %v6556_v26 = vld [vmem:[#allocation5 + $0xa94] sm:$0xf] }
 0x2a1   :  { %v6560_v25 = vld [vmem:[#allocation5 + $0xaac] sm:$0xf0] }
 0x2a2   :  { %3760 = vmatpush.bf16.xpose.msra.mxu0 %v5605_v53  ;;  %3774 = vmatpush.bf16.xpose.msra.mxu1 %v5609_v55  ;;  %v3644_v42 = vadd.f32 %v3643_v39, %v3630_v37  ;;  %v5509_v53 = vor.u32 %v6558_v44, %v5508_v43  ;;  %v5517_v55 = vor.u32 %v6559_v50, %v5516_v49  ;;  %v5660_v37 = vld [vmem:[#allocation5 + $0xb98] sm:$0xf]  ;;  %v6589_v39 = vld [vmem:[#allocation5 + $0xb9c] sm:$0xf]  ;;  %v5620_v49 = vld [vmem:[#allocation5 + $0xb50] sm:$0xf] }
 0x2a3   :  { %3788 = vmatpush.bf16.xpose.msra.mxu2 %v5613_v56  ;;  %v5521_v56 = vor.u32 %v6555_v51, %v5518_v52  ;;  %v6584_v50 = vld [vmem:[#allocation5 + $0xb6c] sm:$0xf0]  ;;  %v6580_v51 = vld [vmem:[#allocation5 + $0xb54] sm:$0xf] }
 0x2a4   :  { %3802 = vmatpush.bf16.xpose.msra.mxu3 %v5617_v58  ;;  %4105 = vst [vmem:[#allocation8 + $0x58] sm:$0xff] %v3644_v42  ;;  %v6550_v58 = vld [vmem:[#allocation5 + $0xa5c] sm:$0xf0]  ;;  %v5662_v42 = vld [vmem:[#allocation5 + $0xbb8] sm:$0xf0] }
 0x2a5   :  { %v5477_v1 = vor.u32 %v6550_v58, %v5476_v57  ;;  %v5665_v47 = vor.u32 %v6589_v39, %v5662_v42  ;;  %v5622_v52 = vld [vmem:[#allocation5 + $0xb70] sm:$0xf0]  ;;  %v5621_v57 = vor.u32 %v6584_v50, %v5620_v49 }
 0x2a6   :  { %v5625_v58 = vor.u32 %v6580_v51, %v5622_v52  ;;  %v6548_v39 = vld [vmem:[#allocation5 + $0xa54] sm:$0xf] }
 0x2a7   :  { %v5494_v42 = vld [vmem:[#allocation5 + $0xa70] sm:$0xf0] }
 0x2a8   :  { %v5497_v50 = vor.u32 %v6548_v39, %v5494_v42  ;;  %v5860_v42 = vld [vmem:[#allocation5 + $0xd40] sm:$0xf] }
 0x2aa   :  { %3761 = vmatpush.bf16.xpose.msra.mxu0 %v5573_v11  ;;  %3775 = vmatpush.bf16.xpose.msra.mxu1 %v5577_v13  ;;  %v5446_v11 = vld [vmem:[#allocation5 + $0xa20] sm:$0xf0]  ;;  %v6543_v13 = vld [vmem:[#allocation5 + $0xa24] sm:$0xf0] }
 0x2ab   :  { %3789 = vmatpush.bf16.xpose.msra.mxu2 %v5581_v14  ;;  %v6539_v14 = vld [vmem:[#allocation5 + $0xa0c] sm:$0xf]  ;;  %v5449_v4 = vor.u32 %v6538_v10, %v5446_v11  ;;  %v5453_v24 = vor.u32 %v6543_v13, %v5452_v12  ;;  %v5556_v12 = vld [vmem:[#allocation5 + $0xad0] sm:$0xf] }
 0x2ac   :  { %3803 = vmatpush.bf16.xpose.msra.mxu3 %v5585_v16  ;;  %v6600_v16 = vld [vmem:[#allocation5 + $0xbec] sm:$0xf0]  ;;  %v5457_v27 = vor.u32 %v6539_v14, %v5454_v15  ;;  %v6564_v14 = vld [vmem:[#allocation5 + $0xad4] sm:$0xf] }
 0x2ad   :  { %v5685_v28 = vor.u32 %v6600_v16, %v5684_v48  ;;  %v6568_v13 = vld [vmem:[#allocation5 + $0xaec] sm:$0xf0]  ;;  %v5558_v15 = vld [vmem:[#allocation5 + $0xaf0] sm:$0xf0]  ;;  %v5564_v48 = vld [vmem:[#allocation5 + $0xad8] sm:$0xf] }
 0x2ae   :  { %v6569_v16 = vld [vmem:[#allocation5 + $0xaf4] sm:$0xf0]  ;;  %v5557_v20 = vor.u32 %v6568_v13, %v5556_v12  ;;  %v5561_v21 = vor.u32 %v6564_v14, %v5558_v15  ;;  %v6948_v12 = vld [vmem:[#allocation7] sm:$0xff] }
 0x2af   :  { %v5565_v22 = vor.u32 %v6569_v16, %v5564_v48  ;;  %v586_v13 = vperm.slane %v6948_v12, 4  ;;  %v5925_v48 = vor.u32 %v6662_v62, %v5924_v61 }
 0x2b2   :  { %3762 = vmatpush.bf16.xpose.msra.mxu0 %v5541_v32  ;;  %3776 = vmatpush.bf16.xpose.msra.mxu1 %v5545_v34  ;;  %v5652_v32 = vld [vmem:[#allocation5 + $0xb90] sm:$0xf]  ;;  %v6588_v34 = vld [vmem:[#allocation5 + $0xb94] sm:$0xf] }
 0x2b3   :  { %3790 = vmatpush.bf16.xpose.msra.mxu2 %v5549_v35  ;;  %v5654_v35 = vld [vmem:[#allocation5 + $0xbb0] sm:$0xf0]  ;;  %v5653_v43 = vor.u32 %v6592_v33, %v5652_v32 }
 0x2b4   :  { %3804 = vmatpush.bf16.xpose.msra.mxu3 %v5553_v38  ;;  %v6593_v38 = vld [vmem:[#allocation5 + $0xbb4] sm:$0xf0]  ;;  %v5657_v44 = vor.u32 %v6588_v34, %v5654_v35 }
 0x2b5   :  { %v5661_v46 = vor.u32 %v6593_v38, %v5660_v37  ;;  %v5492_v37 = vld [vmem:[#allocation5 + $0xa50] sm:$0xf] }
 0x2b6   :  { %v6552_v38 = vld [vmem:[#allocation5 + $0xa6c] sm:$0xf0] }
 0x2b7   :  { %v5493_v49 = vor.u32 %v6552_v38, %v5492_v37 }
 0x2ba   :  { %3763 = vmatpush.bf16.xpose.msra.mxu0 %v5509_v53  ;;  %3777 = vmatpush.bf16.xpose.msra.mxu1 %v5513_v54  ;;  %v5628_v53 = vld [vmem:[#allocation5 + $0xb58] sm:$0xf] }
 0x2bb   :  { %3791 = vmatpush.bf16.xpose.msra.mxu2 %v5517_v55  ;;  %v6585_v54 = vld [vmem:[#allocation5 + $0xb74] sm:$0xf0]  ;;  %v6581_v55 = vld [vmem:[#allocation5 + $0xb5c] sm:$0xf] }
 0x2bc   :  { %3805 = vmatpush.bf16.xpose.msra.mxu3 %v5521_v56  ;;  %v5630_v56 = vld [vmem:[#allocation5 + $0xb78] sm:$0xf0]  ;;  %v5629_v59 = vor.u32 %v6585_v54, %v5628_v53  ;;  %v5460_v53 = vld [vmem:[#allocation5 + $0xa10] sm:$0xf] }
 0x2bd   :  { %v5633_v60 = vor.u32 %v6581_v55, %v5630_v56  ;;  %v6544_v54 = vld [vmem:[#allocation5 + $0xa2c] sm:$0xf0]  ;;  %v6540_v55 = vld [vmem:[#allocation5 + $0xa14] sm:$0xf] }
 0x2be   :  { %v5462_v56 = vld [vmem:[#allocation5 + $0xa30] sm:$0xf0]  ;;  %v5461_v0 = vor.u32 %v6544_v54, %v5460_v53  ;;  %v6643_v53 = vld [vmem:[#allocation5 + $0xd4c] sm:$0xf] }
 0x2bf   :  { %v5870_v54 = vld [vmem:[#allocation5 + $0xd68] sm:$0xf0] }
 0x2c2   :  { %3764 = vmatpush.bf16.xpose.msra.mxu0 %v5477_v1  ;;  %3778 = vmatpush.bf16.xpose.msra.mxu1 %v5481_v2  ;;  %v5596_v1 = vld [vmem:[#allocation5 + $0xb18] sm:$0xf] }
 0x2c3   :  { %3792 = vmatpush.bf16.xpose.msra.mxu2 %v5485_v5  ;;  %v6577_v2 = vld [vmem:[#allocation5 + $0xb34] sm:$0xf0]  ;;  %v6573_v5 = vld [vmem:[#allocation5 + $0xb1c] sm:$0xf] }
 0x2c4   :  { %3806 = vmatpush.bf16.xpose.msra.mxu3 %v5489_v7  ;;  %v5598_v7 = vld [vmem:[#allocation5 + $0xb38] sm:$0xf0]  ;;  %v5597_v10 = vor.u32 %v6577_v2, %v5596_v1  ;;  %v5926_v1 = vld [vmem:[#allocation5 + $0xde0] sm:$0xf0]  ;;  %v5932_v2 = vld [vmem:[#allocation5 + $0xdc8] sm:$0xf] }
 0x2c5   :  { %v5601_v11 = vor.u32 %v6573_v5, %v5598_v7  ;;  %v6663_v5 = vld [vmem:[#allocation5 + $0xde4] sm:$0xf0]  ;;  %v5929_v16 = vor.u32 %v6658_v63, %v5926_v1  ;;  %v6638_v1 = vld [vmem:[#allocation5 + $0xd1c] sm:$0xf0] }
 0x2ca   :  { %3765 = vmatpush.bf16.xpose.msra.mxu0 %v5445_v18  ;;  %3779 = vmatpush.bf16.xpose.msra.mxu1 %v5449_v4  ;;  %v5566_v18 = vld [vmem:[#allocation5 + $0xaf8] sm:$0xf0] }
 0x2cb   :  { %3793 = vmatpush.bf16.xpose.msra.mxu2 %v5453_v24  ;;  %v5569_v4 = vor.u32 %v6565_v17, %v5566_v18  ;;  %v5524_v24 = vld [vmem:[#allocation5 + $0xa90] sm:$0xf]  ;;  %v5933_v17 = vor.u32 %v6663_v5, %v5932_v2  ;;  %v6634_v2 = vld [vmem:[#allocation5 + $0xd04] sm:$0xf] }
 0x2cc   :  { %3807 = vmatpush.bf16.xpose.msra.mxu3 %v5457_v27  ;;  %v5526_v27 = vld [vmem:[#allocation5 + $0xab0] sm:$0xf0]  ;;  %v5525_v32 = vor.u32 %v6560_v25, %v5524_v24  ;;  %v6650_v24 = vld [vmem:[#allocation5 + $0xd84] sm:$0xf] }
 0x2cd   :  { %v5529_v33 = vor.u32 %v6556_v26, %v5526_v27  ;;  %v5894_v25 = vld [vmem:[#allocation5 + $0xda0] sm:$0xf0]  ;;  %v5900_v26 = vld [vmem:[#allocation5 + $0xd88] sm:$0xf] }
 0x2ce   :  { %v3655_v7 = vpop.f32.mrf.mxu0  ;;  %v3669_v14 = vpop.f32.mrf.mxu1  ;;  %v6655_v27 = vld [vmem:[#allocation5 + $0xda4] sm:$0xf0] }
 0x2d1   :  { %3766 = vmatmul.bf16.vlgmr.msra.gmra.mxu0 %v6880_v3  ;;  %3780 = vmatmul.bf16.vlgmr.msra.gmra.mxu1 %v6886_v19 }
 0x2d2   :  { %3814 = vmatpush.bf16.xpose.msrb.mxu0 %v5685_v28  ;;  %3828 = vmatpush.bf16.xpose.msrb.mxu1 %v5689_v29  ;;  %v5532_v28 = vld [vmem:[#allocation5 + $0xa98] sm:$0xf] }
 0x2d3   :  { %3842 = vmatpush.bf16.xpose.msrb.mxu2 %v5693_v30  ;;  %3808 = vmatmul.bf16.vlgmr.msra.gmra.mxu3 %v6888_v23  ;;  %v6561_v29 = vld [vmem:[#allocation5 + $0xab4] sm:$0xf0]  ;;  %v6557_v30 = vld [vmem:[#allocation5 + $0xa9c] sm:$0xf] }
 0x2d4   :  { %3856 = vmatpush.bf16.xpose.msrb.mxu3 %v5697_v31  ;;  %3794 = vmatmul.bf16.vlgmr.msra.gmra.mxu2 %v6882_v6  ;;  %v5534_v31 = vld [vmem:[#allocation5 + $0xab8] sm:$0xf0]  ;;  %v5533_v34 = vor.u32 %v6561_v29, %v5532_v28 }
 0x2d5   :  { %v5537_v35 = vor.u32 %v6557_v30, %v5534_v31  ;;  %v6651_v30 = vld [vmem:[#allocation5 + $0xd8c] sm:$0xf] }
 0x2d6   :  { %v3697_v28 = vpop.f32.mrf.mxu3  ;;  %v5902_v31 = vld [vmem:[#allocation5 + $0xda8] sm:$0xf0]  ;;  %v3671_v37 = vpop.f32.mrf.mxu1 }
 0x2d7   :  { %v5905_v38 = vor.u32 %v6651_v30, %v5902_v31  ;;  %v5804_v30 = vld [vmem:[#allocation5 + $0xcc8] sm:$0xf] }
 0x2d8   :  { %v6631_v31 = vld [vmem:[#allocation5 + $0xce4] sm:$0xf0] }
 0x2da   :  { %3815 = vmatpush.bf16.xpose.msrb.mxu0 %v5653_v43  ;;  %3829 = vmatpush.bf16.xpose.msrb.mxu1 %v5657_v44  ;;  %v5500_v43 = vld [vmem:[#allocation5 + $0xa58] sm:$0xf] }
 0x2db   :  { %3843 = vmatpush.bf16.xpose.msrb.mxu2 %v5661_v46  ;;  %v6553_v44 = vld [vmem:[#allocation5 + $0xa74] sm:$0xf0]  ;;  %v6549_v46 = vld [vmem:[#allocation5 + $0xa5c] sm:$0xf] }
 0x2dc   :  { %3857 = vmatpush.bf16.xpose.msrb.mxu3 %v5665_v47  ;;  %v5502_v47 = vld [vmem:[#allocation5 + $0xa78] sm:$0xf0]  ;;  %v5501_v51 = vor.u32 %v6553_v44, %v5500_v43  ;;  %v6646_v43 = vld [vmem:[#allocation5 + $0xd5c] sm:$0xf0]  ;;  %v6642_v44 = vld [vmem:[#allocation5 + $0xd44] sm:$0xf] }
 0x2dd   :  { %v5505_v52 = vor.u32 %v6549_v46, %v5502_v47  ;;  %v5862_v47 = vld [vmem:[#allocation5 + $0xd60] sm:$0xf0] }
 0x2e2   :  { %3816 = vmatpush.bf16.xpose.msrb.mxu0 %v5621_v57  ;;  %3830 = vmatpush.bf16.xpose.msrb.mxu1 %v5625_v58  ;;  %v5468_v57 = vld [vmem:[#allocation5 + $0xa18] sm:$0xf] }
 0x2e3   :  { %3844 = vmatpush.bf16.xpose.msrb.mxu2 %v5629_v59  ;;  %v6545_v58 = vld [vmem:[#allocation5 + $0xa34] sm:$0xf0]  ;;  %v6541_v59 = vld [vmem:[#allocation5 + $0xa1c] sm:$0xf] }
 0x2e4   :  { %3858 = vmatpush.bf16.xpose.msrb.mxu3 %v5633_v60  ;;  %v5470_v60 = vld [vmem:[#allocation5 + $0xa38] sm:$0xf0] }
 0x2e5   :  { %v5473_v15 = vor.u32 %v6541_v59, %v5470_v60  ;;  %v5873_v60 = vor.u32 %v6643_v53, %v5870_v54  ;;  %v6623_v53 = vld [vmem:[#allocation5 + $0xca4] sm:$0xf0]  ;;  %v6619_v54 = vld [vmem:[#allocation5 + $0xc8c] sm:$0xf] }
 0x2ea   :  { %3817 = vmatpush.bf16.xpose.msrb.mxu0 %v5589_v8  ;;  %3831 = vmatpush.bf16.xpose.msrb.mxu1 %v5593_v9  ;;  %v5465_v8 = vor.u32 %v6540_v55, %v5462_v56  ;;  %v5469_v9 = vor.u32 %v6545_v58, %v5468_v57  ;;  %v5861_v55 = vor.u32 %v6646_v43, %v5860_v42  ;;  %v3699_v56 = vpop.f32.mrf.mxu3 }
 0x2eb   :  { %3845 = vmatpush.bf16.xpose.msrb.mxu2 %v5597_v10  ;;  %v6659_v10 = vld [vmem:[#allocation5 + $0xdcc] sm:$0xf]  ;;  %v5865_v57 = vor.u32 %v6642_v44, %v5862_v47  ;;  %v5764_v47 = vld [vmem:[#allocation5 + $0xc80] sm:$0xf] }
 0x2ec   :  { %3859 = vmatpush.bf16.xpose.msrb.mxu3 %v5601_v11  ;;  %v5934_v11 = vld [vmem:[#allocation5 + $0xde8] sm:$0xf0] }
 0x2ed   :  { %v5937_v18 = vor.u32 %v6659_v10, %v5934_v11  ;;  %v6639_v10 = vld [vmem:[#allocation5 + $0xd24] sm:$0xf0]  ;;  %v6635_v11 = vld [vmem:[#allocation5 + $0xd0c] sm:$0xf] }
 0x2f2   :  { %3818 = vmatpush.bf16.xpose.msrb.mxu0 %v5557_v20  ;;  %3832 = vmatpush.bf16.xpose.msrb.mxu1 %v5561_v21  ;;  %v3656_v20 = vadd.f32 %v3655_v7, %v586_v13  ;;  %v3683_v21 = vpop.f32.mrf.mxu2 }
 0x2f3   :  { %3846 = vmatpush.bf16.xpose.msrb.mxu2 %v5565_v22  ;;  %v5892_v22 = vld [vmem:[#allocation5 + $0xd80] sm:$0xf] }
 0x2f4   :  { %3860 = vmatpush.bf16.xpose.msrb.mxu3 %v5569_v4  ;;  %v6654_v4 = vld [vmem:[#allocation5 + $0xd9c] sm:$0xf0]  ;;  %v3670_v29 = vadd.f32 %v3669_v14, %v3656_v20 }
 0x2f6   :  { %v3684_v39 = vadd.f32 %v3683_v21, %v3670_v29  ;;  %v5798_v29 = vld [vmem:[#allocation5 + $0xce0] sm:$0xf0] }
 0x2fa   :  { %3819 = vmatpush.bf16.xpose.msrb.mxu0 %v5525_v32  ;;  %3833 = vmatpush.bf16.xpose.msrb.mxu1 %v5529_v33  ;;  %v5893_v32 = vor.u32 %v6654_v4, %v5892_v22  ;;  %v3657_v33 = vpop.f32.mrf.mxu0 }
 0x2fb   :  { %3847 = vmatpush.bf16.xpose.msrb.mxu2 %v5533_v34  ;;  %v5897_v34 = vor.u32 %v6650_v24, %v5894_v25  ;;  %v3658_v46 = vadd.f32 %v3657_v33, %v586_v13  ;;  %v5838_v13 = vld [vmem:[#allocation5 + $0xd28] sm:$0xf0]  ;;  %v5796_v25 = vld [vmem:[#allocation5 + $0xcc0] sm:$0xf] }
 0x2fc   :  { %3861 = vmatpush.bf16.xpose.msrb.mxu3 %v5537_v35  ;;  %v5901_v35 = vor.u32 %v6655_v27, %v5900_v26  ;;  %v5841_v20 = vor.u32 %v6635_v11, %v5838_v13  ;;  %v6630_v27 = vld [vmem:[#allocation5 + $0xcdc] sm:$0xf0]  ;;  %v5806_v33 = vld [vmem:[#allocation5 + $0xce8] sm:$0xf0] }
 0x2fd   :  { %v3672_v59 = vadd.f32 %v3671_v37, %v3658_v46  ;;  %v5700_v11 = vld [vmem:[#allocation5 + $0xc00] sm:$0xf] }
 0x2fe   :  { %v6606_v13 = vld [vmem:[#allocation5 + $0xc1c] sm:$0xf0] }
 0x302   :  { %3820 = vmatpush.bf16.xpose.msrb.mxu0 %v5493_v49  ;;  %3834 = vmatpush.bf16.xpose.msrb.mxu1 %v5497_v50  ;;  %v5868_v49 = vld [vmem:[#allocation5 + $0xd48] sm:$0xf] }
 0x303   :  { %3848 = vmatpush.bf16.xpose.msrb.mxu2 %v5501_v51  ;;  %v6647_v50 = vld [vmem:[#allocation5 + $0xd64] sm:$0xf0]  ;;  %v3698_v51 = vadd.f32 %v3697_v28, %v3684_v39  ;;  %v6626_v28 = vld [vmem:[#allocation5 + $0xcc4] sm:$0xf]  ;;  %v5805_v39 = vor.u32 %v6631_v31, %v5804_v30  ;;  %v5950_v30 = vld [vmem:[#allocation5 + $0xdf8] sm:$0xf0] }
 0x304   :  { %3862 = vmatpush.bf16.xpose.msrb.mxu3 %v5505_v52  ;;  %v3685_v52 = vpop.f32.mrf.mxu2  ;;  %v5869_v58 = vor.u32 %v6647_v50, %v5868_v49  ;;  %v6622_v49 = vld [vmem:[#allocation5 + $0xc9c] sm:$0xf0]  ;;  %v6618_v50 = vld [vmem:[#allocation5 + $0xc84] sm:$0xf] }
 0x305   :  { %v3686_v5 = vadd.f32 %v3685_v52, %v3672_v59  ;;  %v5772_v52 = vld [vmem:[#allocation5 + $0xc88] sm:$0xf] }
 0x30a   :  { %3821 = vmatpush.bf16.xpose.msrb.mxu0 %v5461_v0  ;;  %3835 = vmatpush.bf16.xpose.msrb.mxu1 %v5465_v8  ;;  %v5828_v0 = vld [vmem:[#allocation5 + $0xd00] sm:$0xf]  ;;  %v5830_v8 = vld [vmem:[#allocation5 + $0xd20] sm:$0xf0] }
 0x30b   :  { %3849 = vmatpush.bf16.xpose.msrb.mxu2 %v5469_v9  ;;  %v5836_v9 = vld [vmem:[#allocation5 + $0xd08] sm:$0xf]  ;;  %v5829_v14 = vor.u32 %v6638_v1, %v5828_v0 }
 0x30c   :  { %3863 = vmatpush.bf16.xpose.msrb.mxu3 %v5473_v15  ;;  %v5740_v0 = vld [vmem:[#allocation5 + $0xc48] sm:$0xf] }
 0x30d   :  { %v6615_v1 = vld [vmem:[#allocation5 + $0xc64] sm:$0xf0] }
 0x30e   :  { %v3711_v61 = vpop.f32.mrf.mxu0  ;;  %v3725_v63 = vpop.f32.mrf.mxu1 }
 0x30f   :  { %v3712_v62 = vadd.f32 %v3711_v61, %v3698_v51  ;;  %v5766_v51 = vld [vmem:[#allocation5 + $0xca0] sm:$0xf0]  ;;  %v6614_v61 = vld [vmem:[#allocation5 + $0xc5c] sm:$0xf0] }
 0x311   :  { %3822 = vmatmul.bf16.vlgmr.msrb.gmra.mxu0 %v6892_v36  ;;  %3836 = vmatmul.bf16.vlgmr.msrb.gmra.mxu1 %v6896_v41  ;;  %v3726_v7 = vadd.f32 %v3725_v63, %v3712_v62  ;;  %v6610_v62 = vld [vmem:[#allocation5 + $0xc44] sm:$0xf] }
 0x312   :  { %3870 = vmatpush.bf16.xpose.msra.mxu0 %v5925_v48  ;;  %3884 = vmatpush.bf16.xpose.msra.mxu1 %v5929_v16  ;;  %v5833_v48 = vor.u32 %v6634_v2, %v5830_v8  ;;  %v5837_v16 = vor.u32 %v6639_v10, %v5836_v9  ;;  %v5734_v63 = vld [vmem:[#allocation5 + $0xc60] sm:$0xf0]  ;;  %v6611_v2 = vld [vmem:[#allocation5 + $0xc4c] sm:$0xf]  ;;  %v5741_v9 = vor.u32 %v6615_v1, %v5740_v0  ;;  %v5844_v1 = vld [vmem:[#allocation5 + $0xd10] sm:$0xf] }
 0x313   :  { %3898 = vmatpush.bf16.xpose.msra.mxu2 %v5933_v17  ;;  %3864 = vmatmul.bf16.vlgmr.msrb.gmra.mxu3 %v6898_v45  ;;  %v3700_v17 = vadd.f32 %v3699_v56, %v3686_v5  ;;  %v5765_v56 = vor.u32 %v6622_v49, %v5764_v47  ;;  %v5742_v5 = vld [vmem:[#allocation5 + $0xc68] sm:$0xf0]  ;;  %v5737_v8 = vor.u32 %v6610_v62, %v5734_v63  ;;  %v5918_v47 = vld [vmem:[#allocation5 + $0xdb8] sm:$0xf0] }
 0x314   :  { %3912 = vmatpush.bf16.xpose.msra.mxu3 %v5937_v18  ;;  %3850 = vmatmul.bf16.vlgmr.msrb.gmra.mxu2 %v6894_v40  ;;  %v5745_v10 = vor.u32 %v6611_v2, %v5742_v5  ;;  %v6640_v2 = vld [vmem:[#allocation5 + $0xd2c] sm:$0xf0]  ;;  %v6636_v5 = vld [vmem:[#allocation5 + $0xd14] sm:$0xf] }
 0x316   :  { %v3713_v21 = vpop.f32.mrf.mxu0  ;;  %v3753_v22 = vpop.f32.mrf.mxu3 }
 0x317   :  { %v3739_v15 = vpop.f32.mrf.mxu2  ;;  %v3714_v4 = vadd.f32 %v3713_v21, %v3700_v17  ;;  %v3727_v26 = vpop.f32.mrf.mxu1  ;;  %v6603_v17 = vld [vmem:[#allocation5 + $0xc0c] sm:$0xf]  ;;  %v6664_v21 = vld [vmem:[#allocation5 + $0xdec] sm:$0xf0] }
 0x318   :  { %v3740_v18 = vadd.f32 %v3739_v15, %v3726_v7  ;;  %v5702_v15 = vld [vmem:[#allocation5 + $0xc20] sm:$0xf0] }
 0x31a   :  { %3871 = vmatpush.bf16.xpose.msra.mxu0 %v5893_v32  ;;  %3885 = vmatpush.bf16.xpose.msra.mxu1 %v5897_v34  ;;  %v3754_v24 = vadd.f32 %v3753_v22, %v3740_v18  ;;  %v6627_v32 = vld [vmem:[#allocation5 + $0xccc] sm:$0xf]  ;;  %v3728_v34 = vadd.f32 %v3727_v26, %v3714_v4  ;;  %v6660_v22 = vld [vmem:[#allocation5 + $0xdd4] sm:$0xf]  ;;  %v5701_v4 = vor.u32 %v6606_v13, %v5700_v11  ;;  %v6665_v26 = vld [vmem:[#allocation5 + $0xdf4] sm:$0xf0] }
 0x31b   :  { %3899 = vmatpush.bf16.xpose.msra.mxu2 %v5901_v35  ;;  %v5797_v35 = vor.u32 %v6630_v27, %v5796_v25  ;;  %v5809_v43 = vor.u32 %v6627_v32, %v5806_v33  ;;  %v5710_v18 = vld [vmem:[#allocation5 + $0xc28] sm:$0xf0]  ;;  %v5948_v25 = vld [vmem:[#allocation5 + $0xdd8] sm:$0xf]  ;;  %v5854_v11 = vld [vmem:[#allocation5 + $0xd38] sm:$0xf0]  ;;  %v5845_v13 = vor.u32 %v6640_v2, %v5844_v1 }
 0x31c   :  { %3913 = vmatpush.bf16.xpose.msra.mxu3 %v5905_v38  ;;  %4098 = vst [vmem:[#allocation8 + $0x20] sm:$0xff] %v3754_v24  ;;  %v5801_v38 = vor.u32 %v6626_v28, %v5798_v29  ;;  %v5942_v24 = vld [vmem:[#allocation5 + $0xdf0] sm:$0xf0]  ;;  %v6661_v29 = vld [vmem:[#allocation5 + $0xddc] sm:$0xf]  ;;  %v5713_v31 = vor.u32 %v6603_v17, %v5710_v18 }
 0x31d   :  { %v5945_v33 = vor.u32 %v6660_v22, %v5942_v24  ;;  %v6632_v17 = vld [vmem:[#allocation5 + $0xcec] sm:$0xf0]  ;;  %v6628_v18 = vld [vmem:[#allocation5 + $0xcd4] sm:$0xf]  ;;  %v6633_v22 = vld [vmem:[#allocation5 + $0xcf4] sm:$0xf0] }
 0x31e   :  { %v3755_v44 = vpop.f32.mrf.mxu3  ;;  %v5822_v24 = vld [vmem:[#allocation5 + $0xcf8] sm:$0xf0]  ;;  %v6180_v2 = vld [vmem:[#allocation5 + $0xfc0] sm:$0xf] }
 0x31f   :  { %v3741_v37 = vpop.f32.mrf.mxu2  ;;  %v5726_v1 = vld [vmem:[#allocation5 + $0xc38] sm:$0xf0] }
 0x320   :  { %v3742_v42 = vadd.f32 %v3741_v37, %v3728_v34  ;;  %v5949_v34 = vor.u32 %v6665_v26, %v5948_v25  ;;  %v5908_v37 = vld [vmem:[#allocation5 + $0xd90] sm:$0xf] }
 0x322   :  { %3872 = vmatpush.bf16.xpose.msra.mxu0 %v5861_v55  ;;  %3886 = vmatpush.bf16.xpose.msra.mxu1 %v5865_v57  ;;  %v3756_v46 = vadd.f32 %v3755_v44, %v3742_v42  ;;  %v5774_v55 = vld [vmem:[#allocation5 + $0xca8] sm:$0xf0]  ;;  %v5769_v57 = vor.u32 %v6618_v50, %v5766_v51  ;;  %v5910_v42 = vld [vmem:[#allocation5 + $0xdb0] sm:$0xf0]  ;;  %v6657_v44 = vld [vmem:[#allocation5 + $0xdb4] sm:$0xf0] }
 0x323   :  { %3900 = vmatpush.bf16.xpose.msra.mxu2 %v5869_v58  ;;  %v5773_v58 = vor.u32 %v6623_v53, %v5772_v52  ;;  %v5777_v59 = vor.u32 %v6619_v54, %v5774_v55  ;;  %v5876_v53 = vld [vmem:[#allocation5 + $0xd50] sm:$0xf]  ;;  %v6644_v55 = vld [vmem:[#allocation5 + $0xd54] sm:$0xf] }
 0x324   :  { %3914 = vmatpush.bf16.xpose.msra.mxu3 %v5873_v60  ;;  %4106 = vst [vmem:[#allocation8 + $0x60] sm:$0xff] %v3756_v46  ;;  %v5732_v60 = vld [vmem:[#allocation5 + $0xc40] sm:$0xf]  ;;  %v6653_v46 = vld [vmem:[#allocation5 + $0xd9c] sm:$0xf] }
 0x325   :  { %v5733_v7 = vor.u32 %v6614_v61, %v5732_v60  ;;  %v5921_v52 = vor.u32 %v6653_v46, %v5918_v47  ;;  %v6648_v54 = vld [vmem:[#allocation5 + $0xd6c] sm:$0xf0]  ;;  %v5886_v60 = vld [vmem:[#allocation5 + $0xd78] sm:$0xf0]  ;;  %v6612_v47 = vld [vmem:[#allocation5 + $0xc54] sm:$0xf] }
 0x326   :  { %v5877_v61 = vor.u32 %v6648_v54, %v5876_v53  ;;  %v6616_v46 = vld [vmem:[#allocation5 + $0xc6c] sm:$0xf0]  ;;  %v5758_v53 = vld [vmem:[#allocation5 + $0xc78] sm:$0xf0] }
 0x32a   :  { %3873 = vmatpush.bf16.xpose.msra.mxu0 %v5829_v14  ;;  %3887 = vmatpush.bf16.xpose.msra.mxu1 %v5833_v48  ;;  %v6602_v14 = vld [vmem:[#allocation5 + $0xc04] sm:$0xf]  ;;  %v5708_v48 = vld [vmem:[#allocation5 + $0xc08] sm:$0xf] }
 0x32b   :  { %3901 = vmatpush.bf16.xpose.msra.mxu2 %v5837_v16  ;;  %v6607_v16 = vld [vmem:[#allocation5 + $0xc24] sm:$0xf0]  ;;  %v5705_v27 = vor.u32 %v6602_v14, %v5702_v15 }
 0x32c   :  { %3915 = vmatpush.bf16.xpose.msra.mxu3 %v5841_v20  ;;  %v5940_v20 = vld [vmem:[#allocation5 + $0xdd0] sm:$0xf]  ;;  %v5709_v28 = vor.u32 %v6607_v16, %v5708_v48 }
 0x32d   :  { %v5941_v32 = vor.u32 %v6664_v21, %v5940_v20  ;;  %v5812_v16 = vld [vmem:[#allocation5 + $0xcd0] sm:$0xf]  ;;  %v5814_v20 = vld [vmem:[#allocation5 + $0xcf0] sm:$0xf0]  ;;  %v5820_v21 = vld [vmem:[#allocation5 + $0xcd8] sm:$0xf] }
 0x32e   :  { %v5813_v25 = vor.u32 %v6632_v17, %v5812_v16  ;;  %v5817_v26 = vor.u32 %v6628_v18, %v5814_v20  ;;  %v6190_v16 = vld [vmem:[#allocation5 + $0xfe8] sm:$0xf0]  ;;  %v587_v17 = vperm.slane %v6948_v12, 5  ;;  %v6150_v12 = vld [vmem:[#allocation5 + $0xfa0] sm:$0xf0] }
 0x332   :  { %3874 = vmatpush.bf16.xpose.msra.mxu0 %v5797_v35  ;;  %3888 = vmatpush.bf16.xpose.msra.mxu1 %v5801_v38  ;;  %v5953_v35 = vor.u32 %v6661_v29, %v5950_v30  ;;  %v6656_v38 = vld [vmem:[#allocation5 + $0xdac] sm:$0xf0] }
 0x333   :  { %3902 = vmatpush.bf16.xpose.msra.mxu2 %v5805_v39  ;;  %v6652_v39 = vld [vmem:[#allocation5 + $0xd94] sm:$0xf]  ;;  %v5909_v49 = vor.u32 %v6656_v38, %v5908_v37  ;;  %v5780_v29 = vld [vmem:[#allocation5 + $0xc90] sm:$0xf]  ;;  %v5790_v37 = vld [vmem:[#allocation5 + $0xcb8] sm:$0xf0] }
 0x334   :  { %3916 = vmatpush.bf16.xpose.msra.mxu3 %v5809_v43  ;;  %v5916_v43 = vld [vmem:[#allocation5 + $0xd98] sm:$0xf]  ;;  %v5913_v50 = vor.u32 %v6652_v39, %v5910_v42  ;;  %v6624_v30 = vld [vmem:[#allocation5 + $0xcac] sm:$0xf0] }
 0x335   :  { %v5917_v51 = vor.u32 %v6657_v44, %v5916_v43  ;;  %v5781_v38 = vor.u32 %v6624_v30, %v5780_v29  ;;  %v5748_v44 = vld [vmem:[#allocation5 + $0xc50] sm:$0xf]  ;;  %v6714_v29 = vld [vmem:[#allocation5 + $0xf84] sm:$0xf]  ;;  %v6156_v30 = vld [vmem:[#allocation5 + $0xf88] sm:$0xf] }
 0x336   :  { %v5749_v54 = vor.u32 %v6616_v46, %v5748_v44 }
 0x33a   :  { %3875 = vmatpush.bf16.xpose.msra.mxu0 %v5765_v56  ;;  %3889 = vmatpush.bf16.xpose.msra.mxu1 %v5769_v57  ;;  %v5878_v56 = vld [vmem:[#allocation5 + $0xd70] sm:$0xf0]  ;;  %v5884_v57 = vld [vmem:[#allocation5 + $0xd58] sm:$0xf] }
 0x33b   :  { %3903 = vmatpush.bf16.xpose.msra.mxu2 %v5773_v58  ;;  %v6649_v58 = vld [vmem:[#allocation5 + $0xd74] sm:$0xf0]  ;;  %v5881_v62 = vor.u32 %v6644_v55, %v5878_v56 }
 0x33c   :  { %3917 = vmatpush.bf16.xpose.msra.mxu3 %v5777_v59  ;;  %v6645_v59 = vld [vmem:[#allocation5 + $0xd5c] sm:$0xf]  ;;  %v5885_v63 = vor.u32 %v6649_v58, %v5884_v57  ;;  %v5716_v58 = vld [vmem:[#allocation5 + $0xc10] sm:$0xf] }
 0x33d   :  { %v5889_v0 = vor.u32 %v6645_v59, %v5886_v60  ;;  %v6608_v59 = vld [vmem:[#allocation5 + $0xc2c] sm:$0xf0]  ;;  %v6604_v60 = vld [vmem:[#allocation5 + $0xc14] sm:$0xf] }
 0x342   :  { %3876 = vmatpush.bf16.xpose.msra.mxu0 %v5733_v7  ;;  %3890 = vmatpush.bf16.xpose.msra.mxu1 %v5737_v8  ;;  %v5846_v7 = vld [vmem:[#allocation5 + $0xd30] sm:$0xf0]  ;;  %v5852_v8 = vld [vmem:[#allocation5 + $0xd18] sm:$0xf] }
 0x343   :  { %3904 = vmatpush.bf16.xpose.msra.mxu2 %v5741_v9  ;;  %v6641_v9 = vld [vmem:[#allocation5 + $0xd34] sm:$0xf0]  ;;  %v5849_v14 = vor.u32 %v6636_v5, %v5846_v7  ;;  %v6726_v5 = vld [vmem:[#allocation5 + $0xfdc] sm:$0xf0]  ;;  %v6722_v7 = vld [vmem:[#allocation5 + $0xfc4] sm:$0xf] }
 0x344   :  { %3918 = vmatpush.bf16.xpose.msra.mxu3 %v5745_v10  ;;  %v6637_v10 = vld [vmem:[#allocation5 + $0xd1c] sm:$0xf]  ;;  %v5853_v15 = vor.u32 %v6641_v9, %v5852_v8  ;;  %v5717_v8 = vor.u32 %v6608_v59, %v5716_v58  ;;  %v6182_v9 = vld [vmem:[#allocation5 + $0xfe0] sm:$0xf0]  ;;  %v6126_v58 = vld [vmem:[#allocation5 + $0xf68] sm:$0xf0] }
 0x345   :  { %v5857_v48 = vor.u32 %v6637_v10, %v5854_v11  ;;  %v6188_v10 = vld [vmem:[#allocation5 + $0xfc8] sm:$0xf] }
 0x346   :  { %v6727_v11 = vld [vmem:[#allocation5 + $0xfe4] sm:$0xf0] }
 0x34a   :  { %3877 = vmatpush.bf16.xpose.msra.mxu0 %v5701_v4  ;;  %3891 = vmatpush.bf16.xpose.msra.mxu1 %v5705_v27  ;;  %v6629_v4 = vld [vmem:[#allocation5 + $0xcdc] sm:$0xf]  ;;  %v5821_v27 = vor.u32 %v6633_v22, %v5820_v21  ;;  %v6181_v21 = vor.u32 %v6726_v5, %v6180_v2  ;;  %v6185_v22 = vor.u32 %v6722_v7, %v6182_v9  ;;  %v6084_v7 = vld [vmem:[#allocation5 + $0xf00] sm:$0xf]  ;;  %v6698_v9 = vld [vmem:[#allocation5 + $0xf04] sm:$0xf] }
 0x34b   :  { %3905 = vmatpush.bf16.xpose.msra.mxu2 %v5709_v28  ;;  %v5825_v28 = vor.u32 %v6629_v4, %v5822_v24  ;;  %v6189_v4 = vor.u32 %v6727_v11, %v6188_v10 }
 0x34c   :  { %3919 = vmatpush.bf16.xpose.msra.mxu3 %v5713_v31  ;;  %v6620_v31 = vld [vmem:[#allocation5 + $0xc94] sm:$0xf] }
 0x34e   :  { %v3781_v18 = vpop.f32.mrf.mxu1 }
 0x351   :  { %3878 = vmatmul.bf16.vlgmr.msra.gmra.mxu0 %v6880_v3  ;;  %3892 = vmatmul.bf16.vlgmr.msra.gmra.mxu1 %v6886_v19 }
 0x352   :  { %3926 = vmatpush.bf16.xpose.msrb.mxu0 %v5941_v32  ;;  %3940 = vmatpush.bf16.xpose.msrb.mxu1 %v5945_v33  ;;  %v5782_v32 = vld [vmem:[#allocation5 + $0xcb0] sm:$0xf0]  ;;  %v5788_v33 = vld [vmem:[#allocation5 + $0xc98] sm:$0xf] }
 0x353   :  { %3954 = vmatpush.bf16.xpose.msrb.mxu2 %v5949_v34  ;;  %3920 = vmatmul.bf16.vlgmr.msra.gmra.mxu3 %v6888_v23  ;;  %v6625_v34 = vld [vmem:[#allocation5 + $0xcb4] sm:$0xf0]  ;;  %v5785_v39 = vor.u32 %v6620_v31, %v5782_v32  ;;  %v6719_v31 = vld [vmem:[#allocation5 + $0xfa4] sm:$0xf0] }
 0x354   :  { %3968 = vmatpush.bf16.xpose.msrb.mxu3 %v5953_v35  ;;  %3906 = vmatmul.bf16.vlgmr.msra.gmra.mxu2 %v6882_v6  ;;  %v6621_v35 = vld [vmem:[#allocation5 + $0xc9c] sm:$0xf]  ;;  %v5789_v42 = vor.u32 %v6625_v34, %v5788_v33  ;;  %v6715_v34 = vld [vmem:[#allocation5 + $0xf8c] sm:$0xf] }
 0x355   :  { %v5793_v43 = vor.u32 %v6621_v35, %v5790_v37  ;;  %v6158_v35 = vld [vmem:[#allocation5 + $0xfa8] sm:$0xf0] }
 0x356   :  { %v3809_v32 = vpop.f32.mrf.mxu3  ;;  %v6161_v44 = vor.u32 %v6715_v34, %v6158_v35  ;;  %v6695_v34 = vld [vmem:[#allocation5 + $0xee4] sm:$0xf0]  ;;  %v6691_v35 = vld [vmem:[#allocation5 + $0xecc] sm:$0xf] }
 0x35a   :  { %3927 = vmatpush.bf16.xpose.msrb.mxu0 %v5909_v49  ;;  %3941 = vmatpush.bf16.xpose.msrb.mxu1 %v5913_v50  ;;  %v5750_v49 = vld [vmem:[#allocation5 + $0xc70] sm:$0xf0]  ;;  %v5756_v50 = vld [vmem:[#allocation5 + $0xc58] sm:$0xf] }
 0x35b   :  { %3955 = vmatpush.bf16.xpose.msrb.mxu2 %v5917_v51  ;;  %v6617_v51 = vld [vmem:[#allocation5 + $0xc74] sm:$0xf0]  ;;  %v5753_v55 = vor.u32 %v6612_v47, %v5750_v49  ;;  %v6116_v47 = vld [vmem:[#allocation5 + $0xf40] sm:$0xf] }
 0x35c   :  { %3969 = vmatpush.bf16.xpose.msrb.mxu3 %v5921_v52  ;;  %v6613_v52 = vld [vmem:[#allocation5 + $0xc5c] sm:$0xf]  ;;  %v5757_v56 = vor.u32 %v6617_v51, %v5756_v50  ;;  %v6710_v49 = vld [vmem:[#allocation5 + $0xf5c] sm:$0xf0]  ;;  %v6706_v50 = vld [vmem:[#allocation5 + $0xf44] sm:$0xf] }
 0x35d   :  { %v5761_v57 = vor.u32 %v6613_v52, %v5758_v53  ;;  %v6118_v52 = vld [vmem:[#allocation5 + $0xf60] sm:$0xf0]  ;;  %v6124_v53 = vld [vmem:[#allocation5 + $0xf48] sm:$0xf]  ;;  %v6117_v59 = vor.u32 %v6710_v49, %v6116_v47 }
 0x362   :  { %3928 = vmatpush.bf16.xpose.msrb.mxu0 %v5877_v61  ;;  %3942 = vmatpush.bf16.xpose.msrb.mxu1 %v5881_v62  ;;  %v5718_v61 = vld [vmem:[#allocation5 + $0xc30] sm:$0xf0]  ;;  %v5724_v62 = vld [vmem:[#allocation5 + $0xc18] sm:$0xf] }
 0x363   :  { %3956 = vmatpush.bf16.xpose.msrb.mxu2 %v5885_v63  ;;  %v6609_v63 = vld [vmem:[#allocation5 + $0xc34] sm:$0xf0] }
 0x364   :  { %3970 = vmatpush.bf16.xpose.msrb.mxu3 %v5889_v0  ;;  %v6605_v0 = vld [vmem:[#allocation5 + $0xc1c] sm:$0xf] }
 0x365   :  { %v5729_v20 = vor.u32 %v6605_v0, %v5726_v1 }
 0x36a   :  { %3929 = vmatpush.bf16.xpose.msrb.mxu0 %v5845_v13  ;;  %3943 = vmatpush.bf16.xpose.msrb.mxu1 %v5849_v14  ;;  %v3767_v13 = vpop.f32.mrf.mxu0  ;;  %v5721_v14 = vor.u32 %v6604_v60, %v5718_v61  ;;  %v3811_v60 = vpop.f32.mrf.mxu3  ;;  %v6121_v61 = vor.u32 %v6706_v50, %v6118_v52  ;;  %v6686_v52 = vld [vmem:[#allocation5 + $0xe9c] sm:$0xf0] }
 0x36b   :  { %3957 = vmatpush.bf16.xpose.msrb.mxu2 %v5853_v15  ;;  %v5725_v15 = vor.u32 %v6609_v63, %v5724_v62 }
 0x36c   :  { %3971 = vmatpush.bf16.xpose.msrb.mxu3 %v5857_v48  ;;  %v6723_v48 = vld [vmem:[#allocation5 + $0xfcc] sm:$0xf] }
 0x36d   :  { %v6193_v24 = vor.u32 %v6723_v48, %v6190_v16  ;;  %v6699_v48 = vld [vmem:[#allocation5 + $0xf0c] sm:$0xf] }
 0x36e   :  { %v6094_v16 = vld [vmem:[#allocation5 + $0xf28] sm:$0xf0] }
 0x372   :  { %3930 = vmatpush.bf16.xpose.msrb.mxu0 %v5813_v25  ;;  %3944 = vmatpush.bf16.xpose.msrb.mxu1 %v5817_v26  ;;  %v3768_v25 = vadd.f32 %v3767_v13, %v587_v17  ;;  %v3795_v26 = vpop.f32.mrf.mxu2  ;;  %v6086_v13 = vld [vmem:[#allocation5 + $0xf20] sm:$0xf0] }
 0x373   :  { %3958 = vmatpush.bf16.xpose.msrb.mxu2 %v5821_v27  ;;  %v6148_v27 = vld [vmem:[#allocation5 + $0xf80] sm:$0xf] }
 0x374   :  { %3972 = vmatpush.bf16.xpose.msrb.mxu3 %v5825_v28  ;;  %v6718_v28 = vld [vmem:[#allocation5 + $0xf9c] sm:$0xf0]  ;;  %v3782_v33 = vadd.f32 %v3781_v18, %v3768_v25 }
 0x375   :  { %v6149_v37 = vor.u32 %v6718_v28, %v6148_v27 }
 0x376   :  { %v3796_v46 = vadd.f32 %v3795_v26, %v3782_v33  ;;  %v6060_v33 = vld [vmem:[#allocation5 + $0xec8] sm:$0xf] }
 0x37a   :  { %3931 = vmatpush.bf16.xpose.msrb.mxu0 %v5781_v38  ;;  %3945 = vmatpush.bf16.xpose.msrb.mxu1 %v5785_v39  ;;  %v3769_v38 = vpop.f32.mrf.mxu0  ;;  %v6153_v39 = vor.u32 %v6714_v29, %v6150_v12  ;;  %v6052_v29 = vld [vmem:[#allocation5 + $0xec0] sm:$0xf] }
 0x37b   :  { %3959 = vmatpush.bf16.xpose.msrb.mxu2 %v5789_v42  ;;  %v6157_v42 = vor.u32 %v6719_v31, %v6156_v30  ;;  %v3770_v51 = vadd.f32 %v3769_v38, %v587_v17  ;;  %v6694_v30 = vld [vmem:[#allocation5 + $0xedc] sm:$0xf0]  ;;  %v6690_v31 = vld [vmem:[#allocation5 + $0xec4] sm:$0xf] }
 0x37c   :  { %3973 = vmatpush.bf16.xpose.msrb.mxu3 %v5793_v43  ;;  %v3783_v43 = vpop.f32.mrf.mxu1 }
 0x37d   :  { %v3784_v63 = vadd.f32 %v3783_v43, %v3770_v51  ;;  %v6020_v51 = vld [vmem:[#allocation5 + $0xe80] sm:$0xf] }
 0x382   :  { %3932 = vmatpush.bf16.xpose.msrb.mxu0 %v5749_v54  ;;  %3946 = vmatpush.bf16.xpose.msrb.mxu1 %v5753_v55  ;;  %v6711_v54 = vld [vmem:[#allocation5 + $0xf64] sm:$0xf0]  ;;  %v3810_v55 = vadd.f32 %v3809_v32, %v3796_v46  ;;  %v6054_v32 = vld [vmem:[#allocation5 + $0xee0] sm:$0xf0] }
 0x383   :  { %3960 = vmatpush.bf16.xpose.msrb.mxu2 %v5757_v56  ;;  %v3797_v56 = vpop.f32.mrf.mxu2  ;;  %v6125_v62 = vor.u32 %v6711_v54, %v6124_v53  ;;  %v6057_v43 = vor.u32 %v6690_v31, %v6054_v32  ;;  %v6682_v53 = vld [vmem:[#allocation5 + $0xe84] sm:$0xf]  ;;  %v6725_v31 = vld [vmem:[#allocation5 + $0xfdc] sm:$0xf] }
 0x384   :  { %3974 = vmatpush.bf16.xpose.msrb.mxu3 %v5761_v57  ;;  %v6707_v57 = vld [vmem:[#allocation5 + $0xf4c] sm:$0xf]  ;;  %v3798_v10 = vadd.f32 %v3797_v56, %v3784_v63  ;;  %v6022_v54 = vld [vmem:[#allocation5 + $0xea0] sm:$0xf0]  ;;  %v6687_v56 = vld [vmem:[#allocation5 + $0xea4] sm:$0xf0] }
 0x385   :  { %v6129_v0 = vor.u32 %v6707_v57, %v6126_v58  ;;  %v6683_v57 = vld [vmem:[#allocation5 + $0xe8c] sm:$0xf]  ;;  %v5988_v63 = vld [vmem:[#allocation5 + $0xe40] sm:$0xf]  ;;  %v6206_v32 = vld [vmem:[#allocation5 + $0xff8] sm:$0xf0] }
 0x386   :  { %v6030_v58 = vld [vmem:[#allocation5 + $0xea8] sm:$0xf0] }
 0x38a   :  { %3933 = vmatpush.bf16.xpose.msrb.mxu0 %v5717_v8  ;;  %3947 = vmatpush.bf16.xpose.msrb.mxu1 %v5721_v14  ;;  %v6702_v8 = vld [vmem:[#allocation5 + $0xf1c] sm:$0xf0]  ;;  %v6092_v14 = vld [vmem:[#allocation5 + $0xf08] sm:$0xf] }
 0x38b   :  { %3961 = vmatpush.bf16.xpose.msrb.mxu2 %v5725_v15  ;;  %v6703_v15 = vld [vmem:[#allocation5 + $0xf24] sm:$0xf0]  ;;  %v6085_v17 = vor.u32 %v6702_v8, %v6084_v7  ;;  %v6675_v8 = vld [vmem:[#allocation5 + $0xe4c] sm:$0xf] }
 0x38c   :  { %3975 = vmatpush.bf16.xpose.msrb.mxu3 %v5729_v20  ;;  %v6089_v20 = vor.u32 %v6698_v9, %v6086_v13  ;;  %v6679_v7 = vld [vmem:[#allocation5 + $0xe64] sm:$0xf0]  ;;  %v5998_v9 = vld [vmem:[#allocation5 + $0xe68] sm:$0xf0] }
 0x38e   :  { %v3823_v1 = vpop.f32.mrf.mxu0  ;;  %v3837_v5 = vpop.f32.mrf.mxu1 }
 0x38f   :  { %v3824_v2 = vadd.f32 %v3823_v1, %v3810_v55  ;;  %v6028_v55 = vld [vmem:[#allocation5 + $0xe88] sm:$0xf]  ;;  %v6674_v1 = vld [vmem:[#allocation5 + $0xe44] sm:$0xf] }
 0x391   :  { %3934 = vmatmul.bf16.vlgmr.msrb.gmra.mxu0 %v6892_v36  ;;  %3948 = vmatmul.bf16.vlgmr.msrb.gmra.mxu1 %v6896_v41  ;;  %v3838_v11 = vadd.f32 %v3837_v5, %v3824_v2  ;;  %v5990_v2 = vld [vmem:[#allocation5 + $0xe60] sm:$0xf0]  ;;  %v5996_v5 = vld [vmem:[#allocation5 + $0xe48] sm:$0xf] }
 0x392   :  { %3982 = vmatpush.bf16.xpose.msra.mxu0 %v6181_v21  ;;  %3996 = vmatpush.bf16.xpose.msra.mxu1 %v6185_v22  ;;  %v6093_v21 = vor.u32 %v6703_v15, %v6092_v14  ;;  %v3812_v22 = vadd.f32 %v3811_v60, %v3798_v10  ;;  %v6025_v60 = vor.u32 %v6682_v53, %v6022_v54  ;;  %v5956_v15 = vld [vmem:[#allocation5 + $0xe00] sm:$0xf] }
 0x393   :  { %4010 = vmatpush.bf16.xpose.msra.mxu2 %v6189_v4  ;;  %3976 = vmatmul.bf16.vlgmr.msrb.gmra.mxu3 %v6898_v45  ;;  %v5997_v13 = vor.u32 %v6679_v7, %v5996_v5  ;;  %v6001_v14 = vor.u32 %v6675_v8, %v5998_v9  ;;  %v6108_v5 = vld [vmem:[#allocation5 + $0xf18] sm:$0xf]  ;;  %v6701_v8 = vld [vmem:[#allocation5 + $0xf1c] sm:$0xf] }
 0x394   :  { %4024 = vmatpush.bf16.xpose.msra.mxu3 %v6193_v24  ;;  %3962 = vmatmul.bf16.vlgmr.msrb.gmra.mxu2 %v6894_v40  ;;  %v6097_v24 = vor.u32 %v6699_v48, %v6094_v16  ;;  %v6670_v48 = vld [vmem:[#allocation5 + $0xe1c] sm:$0xf0]  ;;  %v6666_v16 = vld [vmem:[#allocation5 + $0xe04] sm:$0xf]  ;;  %v6705_v7 = vld [vmem:[#allocation5 + $0xf34] sm:$0xf0] }
 0x395   :  { %v6110_v9 = vld [vmem:[#allocation5 + $0xf38] sm:$0xf0] }
 0x396   :  { %v3825_v25 = vpop.f32.mrf.mxu0  ;;  %v3865_v26 = vpop.f32.mrf.mxu3 }
 0x397   :  { %v3851_v18 = vpop.f32.mrf.mxu2  ;;  %v3826_v27 = vadd.f32 %v3825_v25, %v3812_v22  ;;  %v3839_v12 = vpop.f32.mrf.mxu1  ;;  %v5966_v22 = vld [vmem:[#allocation5 + $0xe28] sm:$0xf0]  ;;  %v6724_v25 = vld [vmem:[#allocation5 + $0xfd4] sm:$0xf] }
 0x398   :  { %v3852_v4 = vadd.f32 %v3851_v18, %v3838_v11  ;;  %v5993_v11 = vor.u32 %v6674_v1, %v5990_v2  ;;  %v5964_v18 = vld [vmem:[#allocation5 + $0xe08] sm:$0xf]  ;;  %v6700_v1 = vld [vmem:[#allocation5 + $0xf14] sm:$0xf] }
 0x399   :  { %v3840_v38 = vadd.f32 %v3839_v12, %v3826_v27  ;;  %v6198_v27 = vld [vmem:[#allocation5 + $0xff0] sm:$0xf0] }
 0x39a   :  { %3983 = vmatpush.bf16.xpose.msra.mxu0 %v6149_v37  ;;  %3997 = vmatpush.bf16.xpose.msra.mxu1 %v6153_v39  ;;  %v3866_v28 = vadd.f32 %v3865_v26, %v3852_v4  ;;  %v6062_v37 = vld [vmem:[#allocation5 + $0xee8] sm:$0xf0]  ;;  %v6053_v39 = vor.u32 %v6694_v30, %v6052_v29  ;;  %v6196_v4 = vld [vmem:[#allocation5 + $0xfd0] sm:$0xf]  ;;  %v5957_v26 = vor.u32 %v6670_v48, %v5956_v15  ;;  %v6729_v29 = vld [vmem:[#allocation5 + $0xff4] sm:$0xf0] }
 0x39b   :  { %4011 = vmatpush.bf16.xpose.msra.mxu2 %v6157_v42  ;;  %v6065_v47 = vor.u32 %v6691_v35, %v6062_v37  ;;  %v6201_v35 = vor.u32 %v6724_v25, %v6198_v27  ;;  %v6102_v2 = vld [vmem:[#allocation5 + $0xf30] sm:$0xf0]  ;;  %v6068_v15 = vld [vmem:[#allocation5 + $0xed0] sm:$0xf] }
 0x39c   :  { %4025 = vmatpush.bf16.xpose.msra.mxu3 %v6161_v44  ;;  %4099 = vst [vmem:[#allocation8 + $0x28] sm:$0xff] %v3866_v28  ;;  %v6061_v44 = vor.u32 %v6695_v34, %v6060_v33  ;;  %v6204_v28 = vld [vmem:[#allocation5 + $0xfd8] sm:$0xf]  ;;  %v6696_v48 = vld [vmem:[#allocation5 + $0xeec] sm:$0xf0] }
 0x39d   :  { %v6205_v37 = vor.u32 %v6729_v29, %v6204_v28  ;;  %v6036_v27 = vld [vmem:[#allocation5 + $0xe90] sm:$0xf]  ;;  %v6684_v29 = vld [vmem:[#allocation5 + $0xe94] sm:$0xf] }
 0x39e   :  { %v3867_v49 = vpop.f32.mrf.mxu3  ;;  %v6688_v28 = vld [vmem:[#allocation5 + $0xeac] sm:$0xf0] }
 0x39f   :  { %v3853_v42 = vpop.f32.mrf.mxu2 }
 0x3a0   :  { %v3854_v46 = vadd.f32 %v3853_v42, %v3840_v38  ;;  %v6209_v38 = vor.u32 %v6725_v31, %v6206_v32  ;;  %v6720_v42 = vld [vmem:[#allocation5 + $0xfac] sm:$0xf0]  ;;  %v6689_v31 = vld [vmem:[#allocation5 + $0xeb4] sm:$0xf0]  ;;  %v6685_v32 = vld [vmem:[#allocation5 + $0xe9c] sm:$0xf] }
 0x3a2   :  { %3984 = vmatpush.bf16.xpose.msra.mxu0 %v6117_v59  ;;  %3998 = vmatpush.bf16.xpose.msra.mxu1 %v6121_v61  ;;  %v3868_v50 = vadd.f32 %v3867_v49, %v3854_v46  ;;  %v6021_v59 = vor.u32 %v6686_v52, %v6020_v51  ;;  %v6029_v61 = vor.u32 %v6687_v56, %v6028_v55  ;;  %v6172_v46 = vld [vmem:[#allocation5 + $0xf98] sm:$0xf]  ;;  %v6717_v49 = vld [vmem:[#allocation5 + $0xf9c] sm:$0xf]  ;;  %v6132_v55 = vld [vmem:[#allocation5 + $0xf50] sm:$0xf] }
 0x3a3   :  { %4012 = vmatpush.bf16.xpose.msra.mxu2 %v6125_v62  ;;  %v6033_v62 = vor.u32 %v6683_v57, %v6030_v58  ;;  %v6712_v56 = vld [vmem:[#allocation5 + $0xf6c] sm:$0xf0]  ;;  %v6708_v57 = vld [vmem:[#allocation5 + $0xf54] sm:$0xf] }
 0x3a4   :  { %4026 = vmatpush.bf16.xpose.msra.mxu3 %v6129_v0  ;;  %4107 = vst [vmem:[#allocation8 + $0x68] sm:$0xff] %v3868_v50  ;;  %v6678_v0 = vld [vmem:[#allocation5 + $0xe5c] sm:$0xf0]  ;;  %v6174_v50 = vld [vmem:[#allocation5 + $0xfb8] sm:$0xf0] }
 0x3a5   :  { %v5989_v10 = vor.u32 %v6678_v0, %v5988_v63  ;;  %v6177_v54 = vor.u32 %v6717_v49, %v6174_v50  ;;  %v6134_v58 = vld [vmem:[#allocation5 + $0xf70] sm:$0xf0]  ;;  %v6677_v49 = vld [vmem:[#allocation5 + $0xe5c] sm:$0xf] }
 0x3a6   :  { %v6137_v63 = vor.u32 %v6708_v57, %v6134_v58  ;;  %v6014_v50 = vld [vmem:[#allocation5 + $0xe78] sm:$0xf0]  ;;  %v6668_v57 = vld [vmem:[#allocation5 + $0xe14] sm:$0xf] }
 0x3a7   :  { %v5974_v58 = vld [vmem:[#allocation5 + $0xe30] sm:$0xf0] }
 0x3aa   :  { %3985 = vmatpush.bf16.xpose.msra.mxu0 %v6085_v17  ;;  %3999 = vmatpush.bf16.xpose.msra.mxu1 %v6089_v20  ;;  %v5958_v17 = vld [vmem:[#allocation5 + $0xe20] sm:$0xf0]  ;;  %v6671_v20 = vld [vmem:[#allocation5 + $0xe24] sm:$0xf0] }
 0x3ab   :  { %4013 = vmatpush.bf16.xpose.msra.mxu2 %v6093_v21  ;;  %v6667_v21 = vld [vmem:[#allocation5 + $0xe0c] sm:$0xf]  ;;  %v5961_v12 = vor.u32 %v6666_v16, %v5958_v17  ;;  %v5965_v30 = vor.u32 %v6671_v20, %v5964_v18  ;;  %v6692_v16 = vld [vmem:[#allocation5 + $0xed4] sm:$0xf]  ;;  %v6076_v18 = vld [vmem:[#allocation5 + $0xed8] sm:$0xf] }
 0x3ac   :  { %4027 = vmatpush.bf16.xpose.msra.mxu3 %v6097_v24  ;;  %v6728_v24 = vld [vmem:[#allocation5 + $0xfec] sm:$0xf0]  ;;  %v5969_v33 = vor.u32 %v6667_v21, %v5966_v22  ;;  %v6070_v17 = vld [vmem:[#allocation5 + $0xef0] sm:$0xf0]  ;;  %v6697_v20 = vld [vmem:[#allocation5 + $0xef4] sm:$0xf0] }
 0x3ad   :  { %v6197_v34 = vor.u32 %v6728_v24, %v6196_v4  ;;  %v6693_v21 = vld [vmem:[#allocation5 + $0xedc] sm:$0xf]  ;;  %v6069_v4 = vor.u32 %v6696_v48, %v6068_v15  ;;  %v6073_v24 = vor.u32 %v6692_v16, %v6070_v17  ;;  %v6077_v25 = vor.u32 %v6697_v20, %v6076_v18 }
 0x3ae   :  { %v6078_v22 = vld [vmem:[#allocation5 + $0xef8] sm:$0xf0] }
 0x3b2   :  { %3986 = vmatpush.bf16.xpose.msra.mxu0 %v6053_v39  ;;  %4000 = vmatpush.bf16.xpose.msra.mxu1 %v6057_v43  ;;  %v6164_v39 = vld [vmem:[#allocation5 + $0xf90] sm:$0xf]  ;;  %v6716_v43 = vld [vmem:[#allocation5 + $0xf94] sm:$0xf] }
 0x3b3   :  { %4014 = vmatpush.bf16.xpose.msra.mxu2 %v6061_v44  ;;  %v6166_v44 = vld [vmem:[#allocation5 + $0xfb0] sm:$0xf0]  ;;  %v6165_v51 = vor.u32 %v6720_v42, %v6164_v39  ;;  %v6004_v39 = vld [vmem:[#allocation5 + $0xe50] sm:$0xf] }
 0x3b4   :  { %4028 = vmatpush.bf16.xpose.msra.mxu3 %v6065_v47  ;;  %v6721_v47 = vld [vmem:[#allocation5 + $0xfb4] sm:$0xf0]  ;;  %v6169_v52 = vor.u32 %v6716_v43, %v6166_v44  ;;  %v6680_v42 = vld [vmem:[#allocation5 + $0xe6c] sm:$0xf0]  ;;  %v6676_v43 = vld [vmem:[#allocation5 + $0xe54] sm:$0xf] }
 0x3b5   :  { %v6173_v53 = vor.u32 %v6721_v47, %v6172_v46  ;;  %v6006_v44 = vld [vmem:[#allocation5 + $0xe70] sm:$0xf0]  ;;  %v6012_v46 = vld [vmem:[#allocation5 + $0xe58] sm:$0xf] }
 0x3b6   :  { %v6681_v47 = vld [vmem:[#allocation5 + $0xe74] sm:$0xf0] }
 0x3ba   :  { %3987 = vmatpush.bf16.xpose.msra.mxu0 %v6021_v59  ;;  %4001 = vmatpush.bf16.xpose.msra.mxu1 %v6025_v60  ;;  %v6140_v59 = vld [vmem:[#allocation5 + $0xf58] sm:$0xf] }
 0x3bb   :  { %4015 = vmatpush.bf16.xpose.msra.mxu2 %v6029_v61  ;;  %v6713_v60 = vld [vmem:[#allocation5 + $0xf74] sm:$0xf0]  ;;  %v6709_v61 = vld [vmem:[#allocation5 + $0xf5c] sm:$0xf] }
 0x3bc   :  { %4029 = vmatpush.bf16.xpose.msra.mxu3 %v6033_v62  ;;  %v6142_v62 = vld [vmem:[#allocation5 + $0xf78] sm:$0xf0]  ;;  %v6141_v0 = vor.u32 %v6713_v60, %v6140_v59  ;;  %v5980_v59 = vld [vmem:[#allocation5 + $0xe18] sm:$0xf] }
 0x3bd   :  { %v6673_v60 = vld [vmem:[#allocation5 + $0xe34] sm:$0xf0] }
 0x3c2   :  { %3988 = vmatpush.bf16.xpose.msra.mxu0 %v5989_v10  ;;  %4002 = vmatpush.bf16.xpose.msra.mxu1 %v5993_v11  ;;  %v6105_v11 = vor.u32 %v6700_v1, %v6102_v2 }
 0x3c3   :  { %4016 = vmatpush.bf16.xpose.msra.mxu2 %v5997_v13  ;;  %v6109_v13 = vor.u32 %v6705_v7, %v6108_v5 }
 0x3c4   :  { %4030 = vmatpush.bf16.xpose.msra.mxu3 %v6001_v14  ;;  %v6113_v14 = vor.u32 %v6701_v8, %v6110_v9 }
 0x3ca   :  { %3989 = vmatpush.bf16.xpose.msra.mxu0 %v5957_v26  ;;  %4003 = vmatpush.bf16.xpose.msra.mxu1 %v5961_v12  ;;  %v6081_v26 = vor.u32 %v6693_v21, %v6078_v22  ;;  %v6038_v12 = vld [vmem:[#allocation5 + $0xeb0] sm:$0xf0] }
 0x3cb   :  { %4017 = vmatpush.bf16.xpose.msra.mxu2 %v5965_v30  ;;  %v6044_v30 = vld [vmem:[#allocation5 + $0xe98] sm:$0xf] }
 0x3cc   :  { %4031 = vmatpush.bf16.xpose.msra.mxu3 %v5969_v33  ;;  %v6046_v33 = vld [vmem:[#allocation5 + $0xeb8] sm:$0xf0] }
 0x3ce   :  { %v3893_v1 = vpop.f32.mrf.mxu1 }
 0x3d1   :  { %3990 = vmatmul.bf16.vlgmr.msra.gmra.mxu0 %v6880_v3  ;;  %4004 = vmatmul.bf16.vlgmr.msra.gmra.mxu1 %v6886_v19  ;;  %v6133_v3 = vor.u32 %v6712_v56, %v6132_v55  ;;  %v6100_v19 = vld [vmem:[#allocation5 + $0xf10] sm:$0xf] }
 0x3d2   :  { %4038 = vmatpush.bf16.xpose.msrb.mxu0 %v6197_v34  ;;  %4052 = vmatpush.bf16.xpose.msrb.mxu1 %v6201_v35  ;;  %v6037_v34 = vor.u32 %v6688_v28, %v6036_v27  ;;  %v6041_v35 = vor.u32 %v6684_v29, %v6038_v12  ;;  %v5972_v55 = vld [vmem:[#allocation5 + $0xe10] sm:$0xf] }
 0x3d3   :  { %4066 = vmatpush.bf16.xpose.msrb.mxu2 %v6205_v37  ;;  %4032 = vmatmul.bf16.vlgmr.msra.gmra.mxu3 %v6888_v23  ;;  %v6704_v23 = vld [vmem:[#allocation5 + $0xf2c] sm:$0xf0]  ;;  %v6045_v37 = vor.u32 %v6689_v31, %v6044_v30 }
 0x3d4   :  { %4080 = vmatpush.bf16.xpose.msrb.mxu3 %v6209_v38  ;;  %4018 = vmatmul.bf16.vlgmr.msra.gmra.mxu2 %v6882_v6  ;;  %v6145_v6 = vor.u32 %v6709_v61, %v6142_v62  ;;  %v6101_v10 = vor.u32 %v6704_v23, %v6100_v19  ;;  %v6049_v38 = vor.u32 %v6685_v32, %v6046_v33  ;;  %v6672_v56 = vld [vmem:[#allocation5 + $0xe2c] sm:$0xf0]  ;;  %v6669_v61 = vld [vmem:[#allocation5 + $0xe1c] sm:$0xf]  ;;  %v6740_v19 = vld [vmem:[#allocation7] sm:$0xff] }
 0x3d5   :  { %v5982_v62 = vld [vmem:[#allocation5 + $0xe38] sm:$0xf0]  ;;  %v588_v23 = vperm.slane %v6740_v19, 6  ;;  %v589_v33 = vperm.slane %v6740_v19, 7 }
 0x3d6   :  { %v5985_v2 = vor.u32 %v6669_v61, %v5982_v62  ;;  %v3921_v8 = vpop.f32.mrf.mxu3 }
 0x3d7   :  { %v3907_v7 = vpop.f32.mrf.mxu2 }
 0x3da   :  { %4039 = vmatpush.bf16.xpose.msrb.mxu0 %v6165_v51  ;;  %4053 = vmatpush.bf16.xpose.msrb.mxu1 %v6169_v52  ;;  %v6005_v51 = vor.u32 %v6680_v42, %v6004_v39  ;;  %v6009_v52 = vor.u32 %v6676_v43, %v6006_v44 }
 0x3db   :  { %4067 = vmatpush.bf16.xpose.msrb.mxu2 %v6173_v53  ;;  %v6013_v53 = vor.u32 %v6681_v47, %v6012_v46 }
 0x3dc   :  { %4081 = vmatpush.bf16.xpose.msrb.mxu3 %v6177_v54  ;;  %v6017_v54 = vor.u32 %v6677_v49, %v6014_v50 }
 0x3de   :  { %v3923_v16 = vpop.f32.mrf.mxu3 }
 0x3df   :  { %v3909_v48 = vpop.f32.mrf.mxu2 }
 0x3e2   :  { %4040 = vmatpush.bf16.xpose.msrb.mxu0 %v6133_v3  ;;  %4054 = vmatpush.bf16.xpose.msrb.mxu1 %v6137_v63  ;;  %v5973_v3 = vor.u32 %v6672_v56, %v5972_v55  ;;  %v3879_v63 = vpop.f32.mrf.mxu0 }
 0x3e3   :  { %4068 = vmatpush.bf16.xpose.msrb.mxu2 %v6141_v0  ;;  %v5977_v0 = vor.u32 %v6668_v57, %v5974_v58  ;;  %v3880_v5 = vadd.f32 %v3879_v63, %v588_v23 }
 0x3e4   :  { %4082 = vmatpush.bf16.xpose.msrb.mxu3 %v6145_v6  ;;  %v5981_v6 = vor.u32 %v6673_v60, %v5980_v59 }
 0x3e5   :  { %v3894_v9 = vadd.f32 %v3893_v1, %v3880_v5 }
 0x3ea   :  { %4041 = vmatpush.bf16.xpose.msrb.mxu0 %v6101_v10  ;;  %4055 = vmatpush.bf16.xpose.msrb.mxu1 %v6105_v11  ;;  %v3881_v10 = vpop.f32.mrf.mxu0  ;;  %v3895_v11 = vpop.f32.mrf.mxu1 }
 0x3eb   :  { %4069 = vmatpush.bf16.xpose.msrb.mxu2 %v6109_v13  ;;  %v3908_v13 = vadd.f32 %v3907_v7, %v3894_v9 }
 0x3ec   :  { %4083 = vmatpush.bf16.xpose.msrb.mxu3 %v6113_v14  ;;  %v3882_v14 = vadd.f32 %v3881_v10, %v588_v23 }
 0x3ed   :  { %v3922_v15 = vadd.f32 %v3921_v8, %v3908_v13 }
 0x3ee   :  { %v3896_v17 = vadd.f32 %v3895_v11, %v3882_v14 }
 0x3f0   :  { %v3910_v22 = vadd.f32 %v3909_v48, %v3896_v17 }
 0x3f2   :  { %4042 = vmatpush.bf16.xpose.msrb.mxu0 %v6069_v4  ;;  %4056 = vmatpush.bf16.xpose.msrb.mxu1 %v6073_v24 }
 0x3f3   :  { %4070 = vmatpush.bf16.xpose.msrb.mxu2 %v6077_v25 }
 0x3f4   :  { %4084 = vmatpush.bf16.xpose.msrb.mxu3 %v6081_v26 }
 0x3fa   :  { %4043 = vmatpush.bf16.xpose.msrb.mxu0 %v6037_v34  ;;  %4057 = vmatpush.bf16.xpose.msrb.mxu1 %v6041_v35 }
 0x3fb   :  { %4071 = vmatpush.bf16.xpose.msrb.mxu2 %v6045_v37 }
 0x3fc   :  { %4085 = vmatpush.bf16.xpose.msrb.mxu3 %v6049_v38 }
 0x402   :  { %4044 = vmatpush.bf16.xpose.msrb.mxu0 %v6005_v51  ;;  %4058 = vmatpush.bf16.xpose.msrb.mxu1 %v6009_v52 }
 0x403   :  { %4072 = vmatpush.bf16.xpose.msrb.mxu2 %v6013_v53 }
 0x404   :  { %4086 = vmatpush.bf16.xpose.msrb.mxu3 %v6017_v54 }
 0x40a   :  { %4045 = vmatpush.bf16.xpose.msrb.mxu0 %v5973_v3  ;;  %4059 = vmatpush.bf16.xpose.msrb.mxu1 %v5977_v0 }
 0x40b   :  { %4073 = vmatpush.bf16.xpose.msrb.mxu2 %v5981_v6 }
 0x40c   :  { %4087 = vmatpush.bf16.xpose.msrb.mxu3 %v5985_v2 }
 0x40e   :  { %v3935_v18 = vpop.f32.mrf.mxu0  ;;  %v3949_v21 = vpop.f32.mrf.mxu1 }
 0x40f   :  { %v3936_v20 = vadd.f32 %v3935_v18, %v3922_v15 }
 0x411   :  { %4046 = vmatmul.bf16.vlgmr.msrb.gmra.mxu0 %v6892_v36  ;;  %4060 = vmatmul.bf16.vlgmr.msrb.gmra.mxu1 %v6896_v41  ;;  %v3950_v4 = vadd.f32 %v3949_v21, %v3936_v20  ;;  %v3924_v36 = vadd.f32 %v3923_v16, %v3910_v22 }
 0x412   :  { %4074 = vmatmul.bf16.vlgmr.msrb.gmra.mxu2 %v6894_v40 }
 0x413   :  { %4088 = vmatmul.bf16.vlgmr.msrb.gmra.mxu3 %v6898_v45 }
 0x416   :  { %v3937_v26 = vpop.f32.mrf.mxu0  ;;  %v3977_v41 = vpop.f32.mrf.mxu3 }
 0x417   :  { %v3963_v24 = vpop.f32.mrf.mxu2  ;;  %v3938_v27 = vadd.f32 %v3937_v26, %v3924_v36  ;;  %v3951_v28 = vpop.f32.mrf.mxu1 }
 0x418   :  { %v3964_v25 = vadd.f32 %v3963_v24, %v3950_v4 }
 0x419   :  { %v3952_v45 = vadd.f32 %v3951_v28, %v3938_v27 }
 0x41a   :  { %v3978_v40 = vadd.f32 %v3977_v41, %v3964_v25 }
 0x41c   :  { %4100 = vst [vmem:[#allocation8 + $0x30] sm:$0xff] %v3978_v40 }
 0x41e   :  { %v3979_v30 = vpop.f32.mrf.mxu3 }
 0x41f   :  { %v3965_v29 = vpop.f32.mrf.mxu2 }
 0x420   :  { %v3966_v12 = vadd.f32 %v3965_v29, %v3952_v45 }
 0x422   :  { %v3980_v31 = vadd.f32 %v3979_v30, %v3966_v12 }
 0x424   :  { %4108 = vst [vmem:[#allocation8 + $0x70] sm:$0xff] %v3980_v31 }
 0x44e   :  { %v3991_v32 = vpop.f32.mrf.mxu0  ;;  %v4005_v34 = vpop.f32.mrf.mxu1 }
 0x44f   :  { %v3992_v35 = vadd.f32 %v3991_v32, %v589_v33 }
 0x451   :  { %v4006_v39 = vadd.f32 %v4005_v34, %v3992_v35 }
 0x456   :  { %v4033_v38 = vpop.f32.mrf.mxu3  ;;  %v3993_v42 = vpop.f32.mrf.mxu0 }
 0x457   :  { %v4019_v37 = vpop.f32.mrf.mxu2  ;;  %v4007_v43 = vpop.f32.mrf.mxu1  ;;  %v3994_v46 = vadd.f32 %v3993_v42, %v589_v33 }
 0x458   :  { %v4020_v44 = vadd.f32 %v4019_v37, %v4006_v39 }
 0x459   :  { %v4008_v50 = vadd.f32 %v4007_v43, %v3994_v46 }
 0x45a   :  { %v4034_v49 = vadd.f32 %v4033_v38, %v4020_v44 }
 0x45e   :  { %v4035_v51 = vpop.f32.mrf.mxu3 }
 0x45f   :  { %v4021_v47 = vpop.f32.mrf.mxu2 }
 0x460   :  { %v4022_v55 = vadd.f32 %v4021_v47, %v4008_v50 }
 0x462   :  { %v4036_v58 = vadd.f32 %v4035_v51, %v4022_v55 }
 0x48e   :  { %v4047_v52 = vpop.f32.mrf.mxu0  ;;  %v4061_v54 = vpop.f32.mrf.mxu1 }
 0x48f   :  { %v4048_v53 = vadd.f32 %v4047_v52, %v4034_v49 }
 0x491   :  { %v4062_v56 = vadd.f32 %v4061_v54, %v4048_v53 }
 0x495   :  { %v4075_v57 = vpop.f32.mrf.mxu2 }
 0x496   :  { %v4076_v59 = vadd.f32 %v4075_v57, %v4062_v56  ;;  %v4089_v60 = vpop.f32.mrf.mxu3  ;;  %v4049_v61 = vpop.f32.mrf.mxu0 }
 0x497   :  { %v4050_v3 = vadd.f32 %v4049_v61, %v4036_v58  ;;  %v4063_v63 = vpop.f32.mrf.mxu1 }
 0x498   :  { %v4090_v62 = vadd.f32 %v4089_v60, %v4076_v59 }
 0x499   :  { %v4064_v0 = vadd.f32 %v4063_v63, %v4050_v3 }
 0x49a   :  { %4101 = vst [vmem:[#allocation8 + $0x38] sm:$0xff] %v4090_v62 }
 0x49d   :  { %v4077_v6 = vpop.f32.mrf.mxu2 }
 0x49e   :  { %v4078_v19 = vadd.f32 %v4077_v6, %v4064_v0  ;;  %v4091_v23 = vpop.f32.mrf.mxu3 }
 0x4a0   :  { %v4092_v1 = vadd.f32 %v4091_v23, %v4078_v19 }
 0x4a2   :  { %4109 = vst [vmem:[#allocation8 + $0x78] sm:$0xff] %v4092_v1 }
 0x4a3   :  { %4122 = dma.vmem_to_hbm [thread:$0]  %s4115_s2, 2048, %s4117_s30, [#allocation4], %s6849_s4, %s6849_s4, %s6850_s5  }
 0x4a4   :  { %6841 = dma.done.wait [#allocation4], 2048  }
 0x4a5   :  { %6842 = vsyncadd [#allocation4], 4294965248 }
 0x4a6   :  { %4127 = vsyncpa [#allocation3], 1 }
 0x4a7   :  { %4128 = vsyncpa [#allocation6], 1 }
 0x4a8   :  { %4129 = vsyncpa [#allocation4], 1 }

</bundles_post_ra>
